<compile_context>
chip_gen: v7x
topology: tpu7x:2x2x1
jax: 0.10.0
libtpu: 0.0.40
codegen_flags: <defaults>
</compile_context>

<pallas_src>
import functools

import jax
import jax.numpy as jnp
from jax.experimental import pallas as pl
from jax.experimental.pallas import tpu as pltpu


def _round_up(n, m):
    return ((n + m - 1) // m) * m


# ---------------------------------------------------------------------------
# Kernel: one batch tile of the full TransformModel forward (all layers fused).
# Weights are (in, out); MXU operands may be bf16, accumulation is f32.
# Padded hidden/output lanes stay exactly zero (zero-padded weights AND biases).
# ---------------------------------------------------------------------------
def _transform_kernel(x_ref,
                      w0_ref, b0_ref,
                      wr1_ref, br1_ref,
                      wr2_ref, br2_ref,
                      wf_ref, bf_ref,
                      o_ref):
    cd = w0_ref.dtype                       # MXU operand dtype (bf16 or f32)
    x = x_ref[...].astype(cd)               # in-kernel cast: x stays f32 in HBM

    # layers[0]: Linear(input_dim -> hidden_dim), no activation
    h = jnp.dot(x, w0_ref[...], preferred_element_type=jnp.float32) + b0_ref[...]

    # ResidualBlock 1: h = relu(h @ Wr1 + br1) + h
    r = jnp.dot(h.astype(cd), wr1_ref[...],
                preferred_element_type=jnp.float32) + br1_ref[...]
    h = jnp.maximum(r, 0.0) + h

    # ResidualBlock 2: h = relu(h @ Wr2 + br2) + h
    r = jnp.dot(h.astype(cd), wr2_ref[...],
                preferred_element_type=jnp.float32) + br2_ref[...]
    h = jnp.maximum(r, 0.0) + h

    # layers[-1]: Linear(hidden_dim -> output_dim), no activation
    out = jnp.dot(h.astype(cd), wf_ref[...],
                  preferred_element_type=jnp.float32) + bf_ref[...]
    o_ref[...] = out.astype(o_ref.dtype)


# ---------------------------------------------------------------------------
# One-time weight preparation (hoisted out of the per-call forward).
# ---------------------------------------------------------------------------
def prepare_params(params, compute_dtype=jnp.bfloat16):
    """Pad feature dims to multiples of 128 lanes and cast matmul operands.

    Call once at init; the per-call forward then launches only the fused
    kernel (no per-call pad/cast passes over the weights).  Biases stay f32
    (added after the f32 MXU accumulation).  Zero-padding BOTH weights and
    biases keeps padded lanes exactly zero through relu + residual adds.
    """
    D, H = params["W0"].shape
    O = params["Wf"].shape[1]
    D_pad, H_pad, O_pad = _round_up(D, 128), _round_up(H, 128), _round_up(O, 128)

    def pad_w(w, rows, cols):
        return jnp.pad(w, ((0, rows - w.shape[0]),
                           (0, cols - w.shape[1]))).astype(compute_dtype)

    def pad_b(b, cols):
        return jnp.pad(b, ((0, 0), (0, cols - b.shape[1]))).astype(jnp.float32)

    return dict(
        W0=pad_w(params["W0"], D_pad, H_pad),   b0=pad_b(params["b0"], H_pad),
        Wr1=pad_w(params["Wr1"], H_pad, H_pad), br1=pad_b(params["br1"], H_pad),
        Wr2=pad_w(params["Wr2"], H_pad, H_pad), br2=pad_b(params["br2"], H_pad),
        Wf=pad_w(params["Wf"], H_pad, O_pad),   bf=pad_b(params["bf"], O_pad),
    )


# ---------------------------------------------------------------------------
# Jitted forward (batch-tiled, single fused pallas_call).
# ---------------------------------------------------------------------------
@functools.partial(
    jax.jit, static_argnames=("out_dim", "batch_tile", "single_buffer_weights"))
def _transform_forward_jit(x, prepared, *, out_dim, batch_tile,
                           single_buffer_weights):
    B, D = x.shape
    D_pad, H_pad = prepared["W0"].shape
    O_pad = prepared["Wf"].shape[1]

    # PyTorch: x = x.to(layer_dtype) (f32).  No-op for f32 inputs; the cast to
    # the MXU operand dtype happens inside the kernel (saves one HBM pass).
    xf = x.astype(jnp.float32)
    if D != D_pad:  # lane-pad the input dim only when it is not 128-aligned
        xf = jnp.pad(xf, ((0, 0), (0, D_pad - D)))

    # Batch tile: multiple of 8 sublanes; guarantee >=2 grid steps when the
    # batch allows it (v7x megacore gets both cores busy, x/out DMA overlaps).
    bt = max(8, min(_round_up(batch_tile, 8), _round_up(B, 8)))
    while bt > 8 and pl.cdiv(B, bt) < 2:
        bt = max(8, _round_up(bt // 2, 8))
    grid = (pl.cdiv(B, bt),)  # ragged last tile: OOB rows are masked on store

    def full_spec(arr):
        idx = lambda i, _n=arr.ndim: (0,) * _n
        if single_buffer_weights:
            # Constant index map -> double-buffering buys nothing; single
            # buffer halves the resident-weight VMEM footprint.
            return pl.BlockSpec(arr.shape, idx, pipeline_mode=pl.Buffered(1))
        return pl.BlockSpec(arr.shape, idx)

    in_specs = [
        pl.BlockSpec((bt, D_pad), lambda i: (i, 0)),
        full_spec(prepared["W0"]),  full_spec(prepared["b0"]),
        full_spec(prepared["Wr1"]), full_spec(prepared["br1"]),
        full_spec(prepared["Wr2"]), full_spec(prepared["br2"]),
        full_spec(prepared["Wf"]),  full_spec(prepared["bf"]),
    ]
    out_spec = pl.BlockSpec((bt, O_pad), lambda i: (i, 0))

    out = pl.pallas_call(
        _transform_kernel,
        out_shape=jax.ShapeDtypeStruct((B, O_pad), jnp.float32),
        grid_spec=pltpu.PrefetchScalarGridSpec(
            num_scalar_prefetch=0,
            grid=grid,
            in_specs=in_specs,
            out_specs=out_spec,
        ),
        compiler_params=pltpu.CompilerParams(
            dimension_semantics=("parallel",),
            # Right-sized: actual need is ~2-3 MiB at these shapes; 32 MiB is
            # the scoped default and leaves ample headroom on v7x (64 MiB/TC).
            vmem_limit_bytes=32 * 1024 * 1024,
        ),
    )(xf,
      prepared["W0"], prepared["b0"],
      prepared["Wr1"], prepared["br1"],
      prepared["Wr2"], prepared["br2"],
      prepared["Wf"], prepared["bf"])

    # Lane slice only (no batch slice needed: out_shape is already (B, O_pad)).
    # Consumers that tolerate the 128-padded output can pass out_dim=None.
    if out_dim is not None and out_dim != O_pad:
        out = out[:, :out_dim]
    return out


# Probed once: does this Pallas build accept pl.Buffered(1) on weight blocks?
_SINGLE_BUFFER_OK = None


def transform_model_forward(x, prepared, *, out_dim=None, batch_tile=512):
    """Public forward.  `prepared` comes from prepare_params() (done once)."""
    global _SINGLE_BUFFER_OK
    if _SINGLE_BUFFER_OK is None:
        try:
            out = jax.block_until_ready(
                _transform_forward_jit(x, prepared, out_dim=out_dim,
                                       batch_tile=batch_tile,
                                       single_buffer_weights=True))
            _SINGLE_BUFFER_OK = True
            return out
        except Exception:
            # Fall back to default (double) buffering for the weight blocks.
            _SINGLE_BUFFER_OK = False
    return _transform_forward_jit(x, prepared, out_dim=out_dim,
                                  batch_tile=batch_tile,
                                  single_buffer_weights=_SINGLE_BUFFER_OK)


# ---------------------------------------------------------------------------
# Init + plain-JAX reference (mirrors the PyTorch module exactly).
# ---------------------------------------------------------------------------
def init_params(key, input_dim, hidden_dim, output_dim):
    """PyTorch-style init: U(-1/sqrt(fan_in), 1/sqrt(fan_in)); weights (in, out)."""
    def linear(k, din, dout):
        kw, kb = jax.random.split(k)
        bound = 1.0 / jnp.sqrt(din)
        w = jax.random.uniform(kw, (din, dout), jnp.float32, -bound, bound)
        b = jax.random.uniform(kb, (1, dout), jnp.float32, -bound, bound)
        return w, b

    k0, k1, k2, k3 = jax.random.split(key, 4)
    W0, b0 = linear(k0, input_dim, hidden_dim)
    Wr1, br1 = linear(k1, hidden_dim, hidden_dim)
    Wr2, br2 = linear(k2, hidden_dim, hidden_dim)
    Wf, bf = linear(k3, hidden_dim, output_dim)
    return dict(W0=W0, b0=b0, Wr1=Wr1, br1=br1, Wr2=Wr2, br2=br2, Wf=Wf, bf=bf)


def reference_forward(x, p):
    x = x.astype(jnp.float32)
    h = x @ p["W0"] + p["b0"]
    h = jnp.maximum(h @ p["Wr1"] + p["br1"], 0.0) + h
    h = jnp.maximum(h @ p["Wr2"] + p["br2"], 0.0) + h
    return h @ p["Wf"] + p["bf"]


if __name__ == "__main__":
    # Small shapes consistent with the module (num_layers=4 => 2 residual
    # blocks).  B is NOT a multiple of the batch tile (exercises the ragged,
    # masked last tile), hidden/output dims are not multiples of 128
    # (exercises lane padding), and the grid has 2 parallel steps.
    B, INPUT_DIM, HIDDEN_DIM, OUTPUT_DIM = 500, 128, 64, 48

    key = jax.random.PRNGKey(0)
    kx, kp = jax.random.split(key)
    x = jax.random.normal(kx, (B, INPUT_DIM), jnp.float32)
    params = init_params(kp, INPUT_DIM, HIDDEN_DIM, OUTPUT_DIM)

    ref = reference_forward(x, params)

    # Exact f32 path (matches the PyTorch module's f32 semantics).
    p_f32 = jax.block_until_ready(prepare_params(params, jnp.float32))
    out = transform_model_forward(x, p_f32, out_dim=OUTPUT_DIM)
    out = jax.block_until_ready(out)
    assert out.shape == (B, OUTPUT_DIM)
    assert jnp.allclose(out, ref, atol=1e-4, rtol=1e-4), "f32 mismatch vs reference"

    # Default fast path: bf16 MXU operands, f32 accumulation (looser tolerance).
    p_bf16 = jax.block_until_ready(prepare_params(params))  # bf16 by default
    out_bf16 = jax.block_until_ready(
        transform_model_forward(x, p_bf16, out_dim=OUTPUT_DIM))
    rel_err = jnp.max(jnp.abs(out_bf16 - ref)) / (jnp.max(jnp.abs(ref)) + 1e-6)
    assert float(rel_err) < 0.05, f"bf16 rel err too large: {float(rel_err)}"

    print("KERNEL_OK")
</pallas_src>

<mosaic_0001>
module attributes {stable_mosaic.version = 11 : i64} {
  func.func @_transform_kernel(%arg0: i32, %arg1: memref<256x128xf32, #tpu.memory_space<vmem>>, %arg2: memref<128x128xf32, #tpu.memory_space<vmem>>, %arg3: memref<1x128xf32, #tpu.memory_space<vmem>>, %arg4: memref<128x128xf32, #tpu.memory_space<vmem>>, %arg5: memref<1x128xf32, #tpu.memory_space<vmem>>, %arg6: memref<128x128xf32, #tpu.memory_space<vmem>>, %arg7: memref<1x128xf32, #tpu.memory_space<vmem>>, %arg8: memref<128x128xf32, #tpu.memory_space<vmem>>, %arg9: memref<1x128xf32, #tpu.memory_space<vmem>>, %arg10: memref<256x128xf32, #tpu.memory_space<vmem>>) attributes {dimension_semantics = [#tpu.dimension_semantics<parallel>], iteration_bounds = array<i64: 2>, scalar_prefetch = 0 : i64, scratch_operands = 0 : i64, tpu.core_type = #tpu.core_type<tc>, window_params = [{transform_indices = @transform_0, window_bounds = array<i64: 256, 128>}, {pipeline_mode = #tpu.pipeline_mode<synchronous>, transform_indices = @transform_1, window_bounds = array<i64: 128, 128>}, {pipeline_mode = #tpu.pipeline_mode<synchronous>, transform_indices = @transform_2, window_bounds = array<i64: 1, 128>}, {pipeline_mode = #tpu.pipeline_mode<synchronous>, transform_indices = @transform_3, window_bounds = array<i64: 128, 128>}, {pipeline_mode = #tpu.pipeline_mode<synchronous>, transform_indices = @transform_4, window_bounds = array<i64: 1, 128>}, {pipeline_mode = #tpu.pipeline_mode<synchronous>, transform_indices = @transform_5, window_bounds = array<i64: 128, 128>}, {pipeline_mode = #tpu.pipeline_mode<synchronous>, transform_indices = @transform_6, window_bounds = array<i64: 1, 128>}, {pipeline_mode = #tpu.pipeline_mode<synchronous>, transform_indices = @transform_7, window_bounds = array<i64: 128, 128>}, {pipeline_mode = #tpu.pipeline_mode<synchronous>, transform_indices = @transform_8, window_bounds = array<i64: 1, 128>}, {transform_indices = @transform_9, window_bounds = array<i64: 256, 128>}]} {
    %c0 = arith.constant 0 : index
    %c0_0 = arith.constant 0 : index
    %0 = vector.load %arg1[%c0, %c0_0] : memref<256x128xf32, #tpu.memory_space<vmem>>, vector<256x128xf32>
    %c0_1 = arith.constant 0 : index
    %c0_2 = arith.constant 0 : index
    %1 = vector.load %arg2[%c0_1, %c0_2] : memref<128x128xf32, #tpu.memory_space<vmem>>, vector<128x128xf32>
    %cst = arith.constant dense<0.000000e+00> : vector<256x128xf32>
    %2 = tpu.matmul %0, %1, %cst {dimension_numbers = #tpu.dot_dimension_numbers<[1], [0], [0], [1], [0, 0, 1, 1], [], []>} : vector<256x128xf32>, vector<128x128xf32>, vector<256x128xf32> -> vector<256x128xf32>
    %c0_3 = arith.constant 0 : index
    %c0_4 = arith.constant 0 : index
    %3 = vector.load %arg3[%c0_3, %c0_4] : memref<1x128xf32, #tpu.memory_space<vmem>>, vector<1x128xf32>
    %4 = vector.broadcast %3 : vector<1x128xf32> to vector<256x128xf32>
    %5 = arith.addf %2, %4 : vector<256x128xf32>
    %c0_5 = arith.constant 0 : index
    %c0_6 = arith.constant 0 : index
    %6 = vector.load %arg4[%c0_5, %c0_6] : memref<128x128xf32, #tpu.memory_space<vmem>>, vector<128x128xf32>
    %cst_7 = arith.constant dense<0.000000e+00> : vector<256x128xf32>
    %7 = tpu.matmul %5, %6, %cst_7 {dimension_numbers = #tpu.dot_dimension_numbers<[1], [0], [0], [1], [0, 0, 1, 1], [], []>} : vector<256x128xf32>, vector<128x128xf32>, vector<256x128xf32> -> vector<256x128xf32>
    %c0_8 = arith.constant 0 : index
    %c0_9 = arith.constant 0 : index
    %8 = vector.load %arg5[%c0_8, %c0_9] : memref<1x128xf32, #tpu.memory_space<vmem>>, vector<1x128xf32>
    %9 = vector.broadcast %8 : vector<1x128xf32> to vector<256x128xf32>
    %10 = arith.addf %7, %9 : vector<256x128xf32>
    %cst_10 = arith.constant 0.000000e+00 : f32
    %11 = vector.broadcast %cst_10 : f32 to vector<256x128xf32>
    %12 = arith.maximumf %10, %11 : vector<256x128xf32>
    %13 = arith.addf %12, %5 : vector<256x128xf32>
    %c0_11 = arith.constant 0 : index
    %c0_12 = arith.constant 0 : index
    %14 = vector.load %arg6[%c0_11, %c0_12] : memref<128x128xf32, #tpu.memory_space<vmem>>, vector<128x128xf32>
    %cst_13 = arith.constant dense<0.000000e+00> : vector<256x128xf32>
    %15 = tpu.matmul %13, %14, %cst_13 {dimension_numbers = #tpu.dot_dimension_numbers<[1], [0], [0], [1], [0, 0, 1, 1], [], []>} : vector<256x128xf32>, vector<128x128xf32>, vector<256x128xf32> -> vector<256x128xf32>
    %c0_14 = arith.constant 0 : index
    %c0_15 = arith.constant 0 : index
    %16 = vector.load %arg7[%c0_14, %c0_15] : memref<1x128xf32, #tpu.memory_space<vmem>>, vector<1x128xf32>
    %17 = vector.broadcast %16 : vector<1x128xf32> to vector<256x128xf32>
    %18 = arith.addf %15, %17 : vector<256x128xf32>
    %cst_16 = arith.constant 0.000000e+00 : f32
    %19 = vector.broadcast %cst_16 : f32 to vector<256x128xf32>
    %20 = arith.maximumf %18, %19 : vector<256x128xf32>
    %21 = arith.addf %20, %13 : vector<256x128xf32>
    %c0_17 = arith.constant 0 : index
    %c0_18 = arith.constant 0 : index
    %22 = vector.load %arg8[%c0_17, %c0_18] : memref<128x128xf32, #tpu.memory_space<vmem>>, vector<128x128xf32>
    %cst_19 = arith.constant dense<0.000000e+00> : vector<256x128xf32>
    %23 = tpu.matmul %21, %22, %cst_19 {dimension_numbers = #tpu.dot_dimension_numbers<[1], [0], [0], [1], [0, 0, 1, 1], [], []>} : vector<256x128xf32>, vector<128x128xf32>, vector<256x128xf32> -> vector<256x128xf32>
    %c0_20 = arith.constant 0 : index
    %c0_21 = arith.constant 0 : index
    %24 = vector.load %arg9[%c0_20, %c0_21] : memref<1x128xf32, #tpu.memory_space<vmem>>, vector<1x128xf32>
    %25 = vector.broadcast %24 : vector<1x128xf32> to vector<256x128xf32>
    %26 = arith.addf %23, %25 : vector<256x128xf32>
    %c0_22 = arith.constant 0 : index
    %c0_23 = arith.constant 0 : index
    %27 = vector.load %arg10[%c0_22, %c0_23] : memref<256x128xf32, #tpu.memory_space<vmem>>, vector<256x128xf32>
    tpu.vector_store %arg10[%c0_22, %c0_23], %26 {strides = array<i32>} : memref<256x128xf32, #tpu.memory_space<vmem>>, vector<256x128xf32>,
    return
  }
  func.func @transform_0(%arg0: i32) -> (i32, i32) {
    %c0_i32 = arith.constant 0 : i32
    %c0_i32_0 = arith.constant 0 : i32
    return %arg0, %c0_i32 : i32, i32
  }
  func.func @transform_1(%arg0: i32) -> (i32, i32) {
    %c0_i32 = arith.constant 0 : i32
    %c0_i32_0 = arith.constant 0 : i32
    %c0_i32_1 = arith.constant 0 : i32
    return %c0_i32, %c0_i32_0 : i32, i32
  }
  func.func @transform_2(%arg0: i32) -> (i32, i32) {
    %c0_i32 = arith.constant 0 : i32
    %c0_i32_0 = arith.constant 0 : i32
    %c0_i32_1 = arith.constant 0 : i32
    return %c0_i32, %c0_i32_0 : i32, i32
  }
  func.func @transform_3(%arg0: i32) -> (i32, i32) {
    %c0_i32 = arith.constant 0 : i32
    %c0_i32_0 = arith.constant 0 : i32
    %c0_i32_1 = arith.constant 0 : i32
    return %c0_i32, %c0_i32_0 : i32, i32
  }
  func.func @transform_4(%arg0: i32) -> (i32, i32) {
    %c0_i32 = arith.constant 0 : i32
    %c0_i32_0 = arith.constant 0 : i32
    %c0_i32_1 = arith.constant 0 : i32
    return %c0_i32, %c0_i32_0 : i32, i32
  }
  func.func @transform_5(%arg0: i32) -> (i32, i32) {
    %c0_i32 = arith.constant 0 : i32
    %c0_i32_0 = arith.constant 0 : i32
    %c0_i32_1 = arith.constant 0 : i32
    return %c0_i32, %c0_i32_0 : i32, i32
  }
  func.func @transform_6(%arg0: i32) -> (i32, i32) {
    %c0_i32 = arith.constant 0 : i32
    %c0_i32_0 = arith.constant 0 : i32
    %c0_i32_1 = arith.constant 0 : i32
    return %c0_i32, %c0_i32_0 : i32, i32
  }
  func.func @transform_7(%arg0: i32) -> (i32, i32) {
    %c0_i32 = arith.constant 0 : i32
    %c0_i32_0 = arith.constant 0 : i32
    %c0_i32_1 = arith.constant 0 : i32
    return %c0_i32, %c0_i32_0 : i32, i32
  }
  func.func @transform_8(%arg0: i32) -> (i32, i32) {
    %c0_i32 = arith.constant 0 : i32
    %c0_i32_0 = arith.constant 0 : i32
    %c0_i32_1 = arith.constant 0 : i32
    return %c0_i32, %c0_i32_0 : i32, i32
  }
  func.func @transform_9(%arg0: i32) -> (i32, i32) {
    %c0_i32 = arith.constant 0 : i32
    %c0_i32_0 = arith.constant 0 : i32
    return %arg0, %c0_i32 : i32, i32
  }
}

module attributes {stable_mosaic.version = 11 : i64} {
  func.func @_transform_kernel(%arg0: i32, %arg1: memref<256x128xf32, #tpu.memory_space<vmem>>, %arg2: memref<128x128xf32, #tpu.memory_space<vmem>>, %arg3: memref<1x128xf32, #tpu.memory_space<vmem>>, %arg4: memref<128x128xf32, #tpu.memory_space<vmem>>, %arg5: memref<1x128xf32, #tpu.memory_space<vmem>>, %arg6: memref<128x128xf32, #tpu.memory_space<vmem>>, %arg7: memref<1x128xf32, #tpu.memory_space<vmem>>, %arg8: memref<128x128xf32, #tpu.memory_space<vmem>>, %arg9: memref<1x128xf32, #tpu.memory_space<vmem>>, %arg10: memref<256x128xf32, #tpu.memory_space<vmem>>) attributes {dimension_semantics = [#tpu.dimension_semantics<parallel>], iteration_bounds = array<i64: 2>, scalar_prefetch = 0 : i64, scratch_operands = 0 : i64, tpu.core_type = #tpu.core_type<tc>, window_params = [{transform_indices = @transform_0, window_bounds = array<i64: 256, 128>}, {pipeline_mode = #tpu.pipeline_mode<synchronous>, transform_indices = @transform_1, window_bounds = array<i64: 128, 128>}, {pipeline_mode = #tpu.pipeline_mode<synchronous>, transform_indices = @transform_2, window_bounds = array<i64: 1, 128>}, {pipeline_mode = #tpu.pipeline_mode<synchronous>, transform_indices = @transform_3, window_bounds = array<i64: 128, 128>}, {pipeline_mode = #tpu.pipeline_mode<synchronous>, transform_indices = @transform_4, window_bounds = array<i64: 1, 128>}, {pipeline_mode = #tpu.pipeline_mode<synchronous>, transform_indices = @transform_5, window_bounds = array<i64: 128, 128>}, {pipeline_mode = #tpu.pipeline_mode<synchronous>, transform_indices = @transform_6, window_bounds = array<i64: 1, 128>}, {pipeline_mode = #tpu.pipeline_mode<synchronous>, transform_indices = @transform_7, window_bounds = array<i64: 128, 128>}, {pipeline_mode = #tpu.pipeline_mode<synchronous>, transform_indices = @transform_8, window_bounds = array<i64: 1, 128>}, {transform_indices = @transform_9, window_bounds = array<i64: 256, 128>}]} {
    %c0 = arith.constant 0 : index
    %c0_0 = arith.constant 0 : index
    %0 = vector.load %arg1[%c0, %c0_0] : memref<256x128xf32, #tpu.memory_space<vmem>>, vector<256x128xf32>
    %c0_1 = arith.constant 0 : index
    %c0_2 = arith.constant 0 : index
    %1 = vector.load %arg2[%c0_1, %c0_2] : memref<128x128xf32, #tpu.memory_space<vmem>>, vector<128x128xf32>
    %cst = arith.constant dense<0.000000e+00> : vector<256x128xf32>
    %2 = tpu.matmul %0, %1, %cst {dimension_numbers = #tpu.dot_dimension_numbers<[1], [0], [0], [1], [0, 0, 1, 1], [], []>} : vector<256x128xf32>, vector<128x128xf32>, vector<256x128xf32> -> vector<256x128xf32>
    %c0_3 = arith.constant 0 : index
    %c0_4 = arith.constant 0 : index
    %3 = vector.load %arg3[%c0_3, %c0_4] : memref<1x128xf32, #tpu.memory_space<vmem>>, vector<1x128xf32>
    %4 = vector.broadcast %3 : vector<1x128xf32> to vector<256x128xf32>
    %5 = arith.addf %2, %4 : vector<256x128xf32>
    %c0_5 = arith.constant 0 : index
    %c0_6 = arith.constant 0 : index
    %6 = vector.load %arg4[%c0_5, %c0_6] : memref<128x128xf32, #tpu.memory_space<vmem>>, vector<128x128xf32>
    %cst_7 = arith.constant dense<0.000000e+00> : vector<256x128xf32>
    %7 = tpu.matmul %5, %6, %cst_7 {dimension_numbers = #tpu.dot_dimension_numbers<[1], [0], [0], [1], [0, 0, 1, 1], [], []>} : vector<256x128xf32>, vector<128x128xf32>, vector<256x128xf32> -> vector<256x128xf32>
    %c0_8 = arith.constant 0 : index
    %c0_9 = arith.constant 0 : index
    %8 = vector.load %arg5[%c0_8, %c0_9] : memref<1x128xf32, #tpu.memory_space<vmem>>, vector<1x128xf32>
    %9 = vector.broadcast %8 : vector<1x128xf32> to vector<256x128xf32>
    %10 = arith.addf %7, %9 : vector<256x128xf32>
    %cst_10 = arith.constant 0.000000e+00 : f32
    %11 = vector.broadcast %cst_10 : f32 to vector<256x128xf32>
    %12 = arith.maximumf %10, %11 : vector<256x128xf32>
    %13 = arith.addf %12, %5 : vector<256x128xf32>
    %c0_11 = arith.constant 0 : index
    %c0_12 = arith.constant 0 : index
    %14 = vector.load %arg6[%c0_11, %c0_12] : memref<128x128xf32, #tpu.memory_space<vmem>>, vector<128x128xf32>
    %cst_13 = arith.constant dense<0.000000e+00> : vector<256x128xf32>
    %15 = tpu.matmul %13, %14, %cst_13 {dimension_numbers = #tpu.dot_dimension_numbers<[1], [0], [0], [1], [0, 0, 1, 1], [], []>} : vector<256x128xf32>, vector<128x128xf32>, vector<256x128xf32> -> vector<256x128xf32>
    %c0_14 = arith.constant 0 : index
    %c0_15 = arith.constant 0 : index
    %16 = vector.load %arg7[%c0_14, %c0_15] : memref<1x128xf32, #tpu.memory_space<vmem>>, vector<1x128xf32>
    %17 = vector.broadcast %16 : vector<1x128xf32> to vector<256x128xf32>
    %18 = arith.addf %15, %17 : vector<256x128xf32>
    %cst_16 = arith.constant 0.000000e+00 : f32
    %19 = vector.broadcast %cst_16 : f32 to vector<256x128xf32>
    %20 = arith.maximumf %18, %19 : vector<256x128xf32>
    %21 = arith.addf %20, %13 : vector<256x128xf32>
    %c0_17 = arith.constant 0 : index
    %c0_18 = arith.constant 0 : index
    %22 = vector.load %arg8[%c0_17, %c0_18] : memref<128x128xf32, #tpu.memory_space<vmem>>, vector<128x128xf32>
    %cst_19 = arith.constant dense<0.000000e+00> : vector<256x128xf32>
    %23 = tpu.matmul %21, %22, %cst_19 {dimension_numbers = #tpu.dot_dimension_numbers<[1], [0], [0], [1], [0, 0, 1, 1], [], []>} : vector<256x128xf32>, vector<128x128xf32>, vector<256x128xf32> -> vector<256x128xf32>
    %c0_20 = arith.constant 0 : index
    %c0_21 = arith.constant 0 : index
    %24 = vector.load %arg9[%c0_20, %c0_21] : memref<1x128xf32, #tpu.memory_space<vmem>>, vector<1x128xf32>
    %25 = vector.broadcast %24 : vector<1x128xf32> to vector<256x128xf32>
    %26 = arith.addf %23, %25 : vector<256x128xf32>
    %c0_22 = arith.constant 0 : index
    %c0_23 = arith.constant 0 : index
    %27 = vector.load %arg10[%c0_22, %c0_23] : memref<256x128xf32, #tpu.memory_space<vmem>>, vector<256x128xf32>
    tpu.vector_store %arg10[%c0_22, %c0_23], %26 {strides = array<i32>} : memref<256x128xf32, #tpu.memory_space<vmem>>, vector<256x128xf32>,
    return
  }
  func.func @transform_0(%arg0: i32) -> (i32, i32) {
    %c0_i32 = arith.constant 0 : i32
    %c0_i32_0 = arith.constant 0 : i32
    return %arg0, %c0_i32 : i32, i32
  }
  func.func @transform_1(%arg0: i32) -> (i32, i32) {
    %c0_i32 = arith.constant 0 : i32
    %c0_i32_0 = arith.constant 0 : i32
    %c0_i32_1 = arith.constant 0 : i32
    return %c0_i32, %c0_i32_0 : i32, i32
  }
  func.func @transform_2(%arg0: i32) -> (i32, i32) {
    %c0_i32 = arith.constant 0 : i32
    %c0_i32_0 = arith.constant 0 : i32
    %c0_i32_1 = arith.constant 0 : i32
    return %c0_i32, %c0_i32_0 : i32, i32
  }
  func.func @transform_3(%arg0: i32) -> (i32, i32) {
    %c0_i32 = arith.constant 0 : i32
    %c0_i32_0 = arith.constant 0 : i32
    %c0_i32_1 = arith.constant 0 : i32
    return %c0_i32, %c0_i32_0 : i32, i32
  }
  func.func @transform_4(%arg0: i32) -> (i32, i32) {
    %c0_i32 = arith.constant 0 : i32
    %c0_i32_0 = arith.constant 0 : i32
    %c0_i32_1 = arith.constant 0 : i32
    return %c0_i32, %c0_i32_0 : i32, i32
  }
  func.func @transform_5(%arg0: i32) -> (i32, i32) {
    %c0_i32 = arith.constant 0 : i32
    %c0_i32_0 = arith.constant 0 : i32
    %c0_i32_1 = arith.constant 0 : i32
    return %c0_i32, %c0_i32_0 : i32, i32
  }
  func.func @transform_6(%arg0: i32) -> (i32, i32) {
    %c0_i32 = arith.constant 0 : i32
    %c0_i32_0 = arith.constant 0 : i32
    %c0_i32_1 = arith.constant 0 : i32
    return %c0_i32, %c0_i32_0 : i32, i32
  }
  func.func @transform_7(%arg0: i32) -> (i32, i32) {
    %c0_i32 = arith.constant 0 : i32
    %c0_i32_0 = arith.constant 0 : i32
    %c0_i32_1 = arith.constant 0 : i32
    return %c0_i32, %c0_i32_0 : i32, i32
  }
  func.func @transform_8(%arg0: i32) -> (i32, i32) {
    %c0_i32 = arith.constant 0 : i32
    %c0_i32_0 = arith.constant 0 : i32
    %c0_i32_1 = arith.constant 0 : i32
    return %c0_i32, %c0_i32_0 : i32, i32
  }
  func.func @transform_9(%arg0: i32) -> (i32, i32) {
    %c0_i32 = arith.constant 0 : i32
    %c0_i32_0 = arith.constant 0 : i32
    return %arg0, %c0_i32 : i32, i32
  }
}

</mosaic_0001>

<bundles_post_ra>
// kernel: _transform_forward_jit.1
= control target key start
LH: loop header
LB: loop body
LE: loop exit
PB: predicated region body
PF: predicated region fallthrough
CT: control target
= control target key end

     0   :  { %s3977_s0 = inlined_call_operand.hbm [shape: f32[500,128], index: 0, kind: input, shape index: {}]   ;;  %s3978_s1 = inlined_call_operand.hbm [shape: f32[128,128], index: 1, kind: input, shape index: {}]   ;;  %s3979_s2 = inlined_call_operand.vmem [shape: f32[1,128], index: 2, kind: input, shape index: {}]   ;;  %s3980_s3 = inlined_call_operand.hbm [shape: f32[128,128], index: 3, kind: input, shape index: {}]   ;;  %s3981_s4 = inlined_call_operand.vmem [shape: f32[1,128], index: 4, kind: input, shape index: {}]   ;;  %s3982_s5 = inlined_call_operand.hbm [shape: f32[128,128], index: 5, kind: input, shape index: {}]   ;;  %s3983_s6 = inlined_call_operand.vmem [shape: f32[1,128], index: 6, kind: input, shape index: {}]   ;;  %s3984_s7 = inlined_call_operand.hbm [shape: f32[128,128], index: 7, kind: input, shape index: {}]   ;;  %s3985_s8 = inlined_call_operand.vmem [shape: f32[1,128], index: 8, kind: input, shape index: {}]   ;;  %s3986_s9 = inlined_call_operand.vmem [shape: f32[500,128], index: 9, kind: output, shape index: {}]  }
   0x1   :  { %3993 = sst [smem:[#allocation17_spill]] %s3985_s8 }
   0x2   :  { %3994 = sst [smem:[#allocation18_spill]] %s3986_s9 }
   0x3   :  { %14 = vsyncpa [#allocation3], 0 }
   0x4   :  { %16 = vsyncpa [#allocation3 + $0x1], 0 }
   0x5   :  { %17 = vsyncpa [#allocation5], 0 }
   0x6   :  { %18 = vsyncpa [#allocation8], 0  ;;  %s3128_s30 = smov 0   ;;  %s3130_s10 = smov 0  }
   0x7   :  { %s3132_s11 = smov 0   ;;  %s3134_s12 = smov 0  }
   0x8 LB: > { %s3147_s13 = sadd.s32 4294967295, %s3035_s12   ;;  %s3150_s14 = sadd.s32 1, %s3035_s12   ;;  %s3035_s12 = sphi %s3134_s12, %s4020_s12   ;;  %s3031_s11 = sphi %s3132_s11, %s4024_s11   ;;  %s3027_s10 = sphi %s3130_s10, %s4023_s10   ;;  %s3023_s30 = sphi %s3128_s30, %s4022_s30  }
   0x9   : > { %3995 = sst [smem:[#allocation14_spill]] %s3150_s14  ;;  %s28_s15 = ssub.s32 %s3035_s12, %s3150_s14 }
   0xa   : > { %s31_s16 = sadd.s32 1, %s3031_s11  ;;  %p29_p0 = scmp.eq.s32.totalorder %s28_s15, 0 }
   0xb   : > { %p38_p1 = scmp.ne.s32.totalorder %s3031_s11, %s3027_s10  ;;  %p39_p2 = scmp.eq.s32.totalorder %s3035_s12, 0 }
   0xc   : > { %p44_p3 = scmp.ne.s32.totalorder %s3027_s10, %s3023_s30  ;;  %p3987_p5 = scmp.eq.s32.totalorder %s3147_s13, 0 }
   0xd   : > { %s3160_s17 = scalar_select %p29_p0, %s3031_s11, %s31_s16  }
   0xe   : > { %p3162_p4 = por %p39_p2, %p38_p1  ;;  %p236_p6 = scmp.eq.s32.totalorder %s3147_s13, 1 }
   0xf   : > { %3996 = sst [smem:[#allocation15_spill]] %s3160_s17  ;;  %p1994_p7 = scmp.ge.s32.totalorder %s3035_s12, 1 }
  0x10   : > { %s3997_s18 = scalar_select %p3162_p4, 1, 0 }
  0x11   : > { %p3171_p8 = por %p3987_p5, %p44_p3  ;;  %p249_p9 = scmp.lt.s32.totalorder %s3035_s12, 3 }
  0x12   : > { %p3176_p10 = por %p236_p6, %p38_p1  ;;  %s3069_s22 = smov [#allocation4]  }
  0x13   : > { %s3998_s19 = scalar_select %p3171_p8, 1, 0 }
  0x14   : > { %s3999_s20 = scalar_select %p3176_p10, 1, 0 }
  0x15   : > { %p3180_p11 = pnand %p1994_p7, %p249_p9  ;;  %s261_s23 = sshll.u32 %s3069_s22, 4  ;;  %s3186_s23 = int_to_ptr.vmem [resolvable:$true] %s261_s23 }
  0x16   : > { %4000 = sst [smem:[#allocation16_spill]] %s3999_s20  ;;  %s3070_s25 = smov [#allocation7]  }
  0x17   : > { %s4001_s21 = scalar_select %p3180_p11, 1, 0 }
  0x18   : > { %p2696_p12 = pneg %p3180_p11  ;;  %s293_s26 = sshll.u32 %s3070_s25, 4  ;;  %s3194_s26 = int_to_ptr.vmem [resolvable:$true] %s293_s26 }
  0x19   : > { %s3071_s27 = smov [#allocation6]   ;;  %s2821_s15 = scalar_lea.hbm %s3978_s1, 2048 }
  0x1a   : > { %p3190_p13 = pnand %p2696_p12, %p3987_p5  ;;  %s3196_s28 = sshll.u32 %s3071_s27, 4  ;;  %s278_s28 = int_to_ptr.vmem [resolvable:$true] %s3196_s28 }
  0x1b   : > { %p2822_p0 = scmp.ne.s32.totalorder %s3978_s1, %s2821_s15  ;;  %p2828_p6 = scmp.lt.u32.totalorder %s2821_s15, %s3978_s1 }
  0x1c   : > { %p3206_p1 = pneg %p3190_p13 }
  0x1e   : > { %p2824_p2 = pnand %p3206_p1, %p2822_p0 }
  0x20   : > { %p2825_p3 = pneg %p2824_p2 }
  0x22   : > { %p2830_p7 = pnand %p2828_p6, %p2825_p3 }
  0x24   : > { %2833 = shalt.err (!%p2830_p7)
}
  0x25   : > { %s2834_s29 = scalar_lea.vmem %s3186_s23, 2048  ;;  %p2842_p10 = scmp.lt.s32.totalorder %s3186_s23, %s3186_s23 }
  0x26   : > { %p2835_p9 = scmp.ne.s32.totalorder %s3186_s23, %s2834_s29  ;;  %p2843_p8 = scmp.lt.s32.totalorder %s2834_s29, %s2834_s29 }
  0x28   : > { %p2837_p12 = pnand %p2835_p9, %p3206_p1  ;;  %p2844_p0 = por %p2843_p8, %p2842_p10 }
  0x2a   : > { %p2838_p5 = pneg %p2837_p12 }
  0x2c   : > { %p2845_p2 = pnand %p2844_p0, %p2838_p5 }
  0x2e   : > { %2848 = shalt.err (!%p2845_p2)
}
  0x2f   : > { %s3072_s30 = smov 128   ;;  %s3073_s15 = smov 8  }
  0x30   : > { %2699 = dma.hbm_to_vmem [thread:$0]  (!%p3190_p13), %s3978_s1, 2048, %s3186_s23, [#allocation5], %s3072_s30, %s3072_s30, %s3073_s15  }
  0x31   : > { %s2849_s29 = scalar_lea.hbm %s3982_s5, 2048 }
  0x32   : > { %p2850_p5 = scmp.ne.s32.totalorder %s3982_s5, %s2849_s29  ;;  %p2856_p3 = scmp.lt.u32.totalorder %s2849_s29, %s3982_s5 }
  0x34   : > { %p2852_p8 = pnand %p2850_p5, %p3206_p1 }
  0x36   : > { %p2853_p10 = pneg %p2852_p8 }
  0x38   : > { %p2858_p6 = pnand %p2856_p3, %p2853_p10 }
  0x3a   : > { %2861 = shalt.err (!%p2858_p6)
}
  0x3b   : > { %s2862_s23 = scalar_lea.vmem %s3194_s26, 2048  ;;  %p2870_p0 = scmp.lt.s32.totalorder %s3194_s26, %s3194_s26 }
  0x3c   : > { %p2863_p7 = scmp.ne.s32.totalorder %s3194_s26, %s2862_s23  ;;  %p2871_p2 = scmp.lt.s32.totalorder %s2862_s23, %s2862_s23 }
  0x3e   : > { %p2865_p9 = pnand %p2863_p7, %p3206_p1  ;;  %p2872_p5 = por %p2871_p2, %p2870_p0 }
  0x40   : > { %p2866_p12 = pneg %p2865_p9 }
  0x42   : > { %p2873_p8 = pnand %p2872_p5, %p2866_p12 }
  0x44   : > { %2876 = shalt.err (!%p2873_p8)
}
  0x45   : > { %2705 = dma.hbm_to_vmem [thread:$0]  (!%p3190_p13), %s3982_s5, 2048, %s3194_s26, [#allocation8], %s3072_s30, %s3072_s30, %s3073_s15  }
  0x46   : > { %s2877_s16 = scalar_lea.hbm %s3980_s3, 2048 }
  0x47   : > { %p2878_p10 = scmp.ne.s32.totalorder %s3980_s3, %s2877_s16  ;;  %p2884_p7 = scmp.lt.u32.totalorder %s2877_s16, %s3980_s3 }
  0x49   : > { %p2880_p3 = pnand %p2878_p10, %p3206_p1 }
  0x4b   : > { %p2881_p6 = pneg %p2880_p3 }
  0x4d   : > { %p2886_p9 = pnand %p2884_p7, %p2881_p6 }
  0x4f   : > { %2889 = shalt.err (!%p2886_p9)
}
  0x50   : > { %s2890_s23 = scalar_lea.vmem %s278_s28, 2048  ;;  %p2898_p5 = scmp.lt.s32.totalorder %s278_s28, %s278_s28 }
  0x51   : > { %p2891_p12 = scmp.ne.s32.totalorder %s278_s28, %s2890_s23  ;;  %p2899_p8 = scmp.lt.s32.totalorder %s2890_s23, %s2890_s23 }
  0x53   : > { %p2893_p0 = pnand %p2891_p12, %p3206_p1  ;;  %p2900_p11 = por %p2899_p8, %p2898_p5 }
  0x55   : > { %p2894_p2 = pneg %p2893_p0 }
  0x57   : > { %p2901_p4 = pnand %p2900_p11, %p2894_p2 }
  0x59   : > { %2904 = shalt.err (!%p2901_p4)
}
  0x5a   : > { %2702 = dma.hbm_to_vmem [thread:$0]  (!%p3190_p13), %s3980_s3, 2048, %s278_s28, [#allocation5], %s3072_s30, %s3072_s30, %s3073_s15  }
  0x5b   : > { %s3074_s9 = smov [#allocation9]   ;;  %s2905_s22 = scalar_lea.hbm %s3984_s7, 2048 }
  0x5c   : > { %s309_s14 = sshll.u32 %s3074_s9, 4  ;;  %p2906_p4 = scmp.ne.s32.totalorder %s3984_s7, %s2905_s22  ;;  %s310_s14 = int_to_ptr.vmem [resolvable:$true] %s309_s14 }
  0x5d   : > { %p2912_p3 = scmp.lt.u32.totalorder %s2905_s22, %s3984_s7 }
  0x5e   : > { %p2908_p11 = pnand %p2906_p4, %p3206_p1 }
  0x60   : > { %p2909_p10 = pneg %p2908_p11 }
  0x62   : > { %p2914_p6 = pnand %p2912_p3, %p2909_p10 }
  0x64   : > { %2917 = shalt.err (!%p2914_p6)
}
  0x65   : > { %s2918_s28 = scalar_lea.vmem %s310_s14, 2048  ;;  %p2926_p0 = scmp.lt.s32.totalorder %s310_s14, %s310_s14 }
  0x66   : > { %p2919_p7 = scmp.ne.s32.totalorder %s310_s14, %s2918_s28  ;;  %p2927_p2 = scmp.lt.s32.totalorder %s2918_s28, %s2918_s28 }
  0x68   : > { %p2921_p9 = pnand %p2919_p7, %p3206_p1  ;;  %p2928_p5 = por %p2927_p2, %p2926_p0 }
  0x6a   : > { %p2922_p12 = pneg %p2921_p9 }
  0x6c   : > { %p2929_p8 = pnand %p2928_p5, %p2922_p12 }
  0x6e   : > { %2932 = shalt.err (!%p2929_p8)
}
  0x6f   : > { %2708 = dma.hbm_to_vmem [thread:$0]  (!%p3190_p13), %s3984_s7, 2048, %s310_s14, [#allocation8], %s3072_s30, %s3072_s30, %s3073_s15  }
  0x70   : > { %p1999_p4 = scmp.ge.s32.totalorder %s3035_s12, 2 }
  0x71   : > { %p4004_p1 = scmp.ne.s32.totalorder (!%p1999_p4), %s3997_s18, 0 }
  0x72   : > { %322 = sbr.rel (%p1999_p4) target bundleno = 156 (0x9c), region = 48 }
  0x79   : > { %325 = sbr.rel (!%p4004_p1) target bundleno = 156 (0x9c), region = 52  ;;  %s326_s17 = sand.u32 (%p4004_p1), 1, %s3031_s11  }
  0x7a   : > { %s2001_s9 = sshll.u32 (%p4004_p1), %s3035_s12, 5  ;;  %s2000_s20 = sshll.u32 (%p4004_p1), %s326_s17, 8 }
  0x7b   : > { %s332_s16 = ssub.s32 (%p4004_p1), 63, %s2001_s9  ;;  %s3307_s25 = scalar_lea.sflag (%p4004_p1), [#allocation3], %s326_s17 }
  0x7c   : > { %p333_p11 = scmp.lt.s32.totalorder (%p4004_p1), %s332_s16, 32  ;;  %s330_s30 = scalar_lea.vmem (%p4004_p1), [#allocation2], %s2000_s20 }
  0x80   : > { %s4026_s16 = smov (!%p333_p11, %s332_s16), 32 }
  0x81   : > { %s3304_s24 = sshll.u32 %s4026_s16, 7 }
  0x82   : > { %s337_s22 = ssub.s32 4096, %s3304_s24 }
  0x83   : > { %338 = vsyncadd %s3307_s25, %s337_s22  ;;  %p2003_p13 = scmp.ne.s32.totalorder %s3304_s24, 0  ;;  %s2035_s18 = sshll.u32 %s3035_s12, 12 }
  0x84   : > { %s3315_s27 = scalar_lea.hbm %s3977_s0, %s2035_s18  ;;  %s343_s29 = sshll.u32 %s330_s30, 4  ;;  %s3317_s29 = int_to_ptr.vmem [resolvable:$true] %s343_s29 }
  0x85   : > { %s2933_s23 = scalar_lea.hbm %s3315_s27, %s3304_s24  ;;  %s2937_s12 = scalar_lea.hbm %s3977_s0, 8064 }
  0x86   : > { %p2934_p10 = scmp.ne.s32.totalorder %s3315_s27, %s2933_s23  ;;  %p2938_p7 = scmp.lt.u32.totalorder %s3315_s27, %s3977_s0 }
  0x87   : > { %p2939_p9 = scmp.lt.u32.totalorder %s2937_s12, %s2933_s23  ;;  %p2941_p0 = scmp.lt.u32.totalorder %s2933_s23, %s3315_s27 }
  0x88   : > { %p2935_p3 = pnand %p2934_p10, %p2003_p13 }
  0x89   : > { %p2940_p12 = por %p2939_p9, %p2938_p7 }
  0x8a   : > { %p2936_p6 = pneg %p2935_p3 }
  0x8b   : > { %p2942_p2 = por %p2941_p0, %p2940_p12 }
  0x8d   : > { %p2943_p5 = pnand %p2942_p2, %p2936_p6 }
  0x8f   : > { %2946 = shalt.err (!%p2943_p5)
}
  0x90   : > { %s2947_s9 = scalar_lea.vmem %s3317_s29, %s3304_s24  ;;  %s3075_s20 = smov [#allocation2]  }
  0x91   : > { %p2948_p8 = scmp.ne.s32.totalorder %s3317_s29, %s2947_s9  ;;  %s2951_s16 = sshll.u32 %s3075_s20, 4  ;;  %s2952_s16 = int_to_ptr.vmem [resolvable:$false] %s2951_s16 }
  0x92   : > { %s2953_s22 = scalar_lea.vmem %s2952_s16, 8192  ;;  %p2954_p11 = scmp.lt.s32.totalorder %s3317_s29, %s2952_s16 }
  0x93   : > { %p2949_p4 = pnand %p2948_p8, %p2003_p13  ;;  %p2955_p10 = scmp.lt.s32.totalorder %s2953_s22, %s2947_s9 }
  0x95   : > { %p2950_p1 = pneg %p2949_p4  ;;  %p2956_p3 = por %p2955_p10, %p2954_p11 }
  0x97   : > { %p2957_p7 = pnand %p2956_p3, %p2950_p1 }
  0x99   : > { %2960 = shalt.err (!%p2957_p7)
}
  0x9a   : > { %s3076_s30 = smov 128   ;;  %s3077_s18 = smov 8  }
  0x9b   : > { %349 = dma.hbm_to_vmem [thread:$0]  (%p2003_p13), %s3315_s27, %s3304_s24, %s3317_s29, %s3307_s25, %s3076_s30, %s3076_s30, %s3077_s18  }
  0x9c PF: > { %p4005_p6 = scmp.ne.s32.totalorder %s4001_s21, 0 }
  0x9d   : > { %s357_s15 = sand.u32 (!%p4005_p6), 1, %s3027_s10   ;;  %p4006_p9 = scmp.ne.s32.totalorder (!%p4005_p6), %s3998_s19, 0 }
  0x9e   : > { %355 = sbr.rel (%p4005_p6) target bundleno = 1196 (0x4ac), region = 56  ;;  %s3347_s14 = sshll.u32 (!%p4005_p6), %s357_s15, 8 }
  0x9f   : > { %s358_s23 = scalar_lea.sflag (!%p4005_p6), [#allocation3], %s357_s15  ;;  %s3350_s28 = scalar_lea.vmem (!%p4005_p6), [#allocation2], %s3347_s14 }
  0xa5   : > { %3010 = dma.done.wait (%p4006_p9), %s358_s23, 4096  }
  0xa6   : > { %3012 = vsyncadd (%p4006_p9), %s358_s23, 4294963200  ;;  %p4007_p13 = scmp.eq.s32.totalorder %s3147_s13, 0 }
  0xa8   : > { %3014 = dma.done.wait (%p4007_p13), [#allocation5], 4096   ;;  %p4008_p12 = pmov %p4007_p13 }
  0xaa   : > { %3016 = vsyncadd (%p4008_p12), [#allocation5], 4294963200  ;;  %p4009_p0 = pmov %p4008_p12 }
  0xac   : > { %3018 = dma.done.wait (%p4009_p0), [#allocation8], 4096   ;;  %p4010_p2 = pmov %p4009_p0 }
  0xad   : > { %v453_v0 = vld [vmem:[#allocation4] sm:$0xff]  ;;  %v454_v1 = vld [vmem:[#allocation4 + $0x8] sm:$0xff]  ;;  %v455_v2 = vld [vmem:[#allocation4 + $0x10] sm:$0xff]  ;;  %s4011_s8 = sld [smem:[#allocation17_spill]]  ;;  %s3771_s17 = scalar_lea.vmem [#allocation10], %s3347_s14  }
  0xae   : > { %3020 = vsyncadd (%p4010_p2), [#allocation8], 4294963200  ;;  %v2551_v3 = vpack.c.bf16 %v454_v1, %v453_v0  ;;  %v456_v4 = vld [vmem:[#allocation4 + $0x18] sm:$0xff]  ;;  %v457_v6 = vld [vmem:[#allocation4 + $0x20] sm:$0xff]  ;;  %s4012_s9 = sld [smem:[#allocation16_spill]] }
  0xaf   : > { %v2555_v5 = vpack.c.bf16 %v456_v4, %v455_v2  ;;  %v458_v7 = vld [vmem:[#allocation4 + $0x28] sm:$0xff]  ;;  %v421_v9 = vld [vmem:[%s3350_s28] sm:$0xff]  ;;  %v459_v10 = vld [vmem:[#allocation4 + $0x30] sm:$0xff] }
  0xb0   : > { %2552 = vmatprep.subr.bf16.mxu0 %v2551_v3  ;;  %v2559_v8 = vpack.c.bf16 %v458_v7, %v457_v6  ;;  %v460_v11 = vld [vmem:[#allocation4 + $0x38] sm:$0xff]  ;;  %2263 = vmatprep.mubr.f32.mxu0 %v421_v9  ;;  %v461_v13 = vld [vmem:[#allocation4 + $0x40] sm:$0xff]  ;;  %v462_v14 = vld [vmem:[#allocation4 + $0x48] sm:$0xff] }
  0xb1   : > { %2554 = vmatpush3.bf16.msra.mxu0 %v2551_v3  ;;  %v2563_v12 = vpack.c.bf16 %v460_v11, %v459_v10  ;;  %v2567_v15 = vpack.c.bf16 %v462_v14, %v461_v13  ;;  %v463_v16 = vld [vmem:[#allocation4 + $0x50] sm:$0xff]  ;;  %v464_v17 = vld [vmem:[#allocation4 + $0x58] sm:$0xff]  ;;  %v701_v18 = vld [vmem:[#allocation6] sm:$0xff] }
  0xb2   : > { %2556 = vmatprep.subr.bf16.mxu0 %v2555_v5  ;;  %v702_v19 = vld [vmem:[#allocation6 + $0x8] sm:$0xff]  ;;  %v703_v20 = vld [vmem:[#allocation6 + $0x10] sm:$0xff]  ;;  %v2571_v21 = vpack.c.bf16 %v464_v17, %v463_v16  ;;  %v465_v22 = vld [vmem:[#allocation4 + $0x60] sm:$0xff] }
  0xb3   : > { %v2583_v23 = vpack.c.bf16 %v702_v19, %v701_v18  ;;  %v704_v24 = vld [vmem:[#allocation6 + $0x18] sm:$0xff]  ;;  %v466_v25 = vld [vmem:[#allocation4 + $0x68] sm:$0xff]  ;;  %v705_v27 = vld [vmem:[#allocation6 + $0x20] sm:$0xff] }
  0xb4   : > { %v2587_v26 = vpack.c.bf16 %v704_v24, %v703_v20  ;;  %v706_v28 = vld [vmem:[#allocation6 + $0x28] sm:$0xff]  ;;  %v2575_v29 = vpack.c.bf16 %v466_v25, %v465_v22  ;;  %v467_v30 = vld [vmem:[#allocation4 + $0x70] sm:$0xff]  ;;  %v468_v32 = vld [vmem:[#allocation4 + $0x78] sm:$0xff]  ;;  %p4013_p5 = scmp.ne.s32.totalorder %s4012_s9, 0 }
  0xb5   : > { %2558 = vmatpush3.bf16.msra.mxu0 %v2555_v5  ;;  %2584 = vmatprep.subr.bf16.mxu1 %v2583_v23  ;;  %v2591_v31 = vpack.c.bf16 %v706_v28, %v705_v27  ;;  %v707_v33 = vld [vmem:[#allocation6 + $0x30] sm:$0xff]  ;;  %v708_v34 = vld [vmem:[#allocation6 + $0x38] sm:$0xff]  ;;  %v2579_v35 = vpack.c.bf16 %v468_v32, %v467_v30  ;;  %v709_v37 = vld [vmem:[#allocation6 + $0x40] sm:$0xff]  ;;  %s2019_s20 = sshll.u32 (%p4013_p5), %s3147_s13, 5  ;;  %s2036_s16 = sshll.u32 (%p4013_p5), %s3147_s13, 8 }
  0xb6   : > { %2560 = vmatprep.subr.bf16.mxu0 %v2559_v8  ;;  %2586 = vmatpush3.bf16.msra.mxu1 %v2583_v23  ;;  %v2595_v36 = vpack.c.bf16 %v708_v34, %v707_v33  ;;  %v710_v38 = vld [vmem:[#allocation6 + $0x48] sm:$0xff]  ;;  %v711_v40 = vld [vmem:[#allocation6 + $0x50] sm:$0xff]  ;;  %v712_v41 = vld [vmem:[#allocation6 + $0x58] sm:$0xff]  ;;  %s1613_s22 = ssub.s32 (%p4013_p5), 63, %s2019_s20  ;;  %s4014_s15 = sld [smem:[#allocation18_spill]] (%p4013_p5) }
  0xb7   : > { %2588 = vmatprep.subr.bf16.mxu1 %v2587_v26  ;;  %v2599_v39 = vpack.c.bf16 %v710_v38, %v709_v37  ;;  %v422_v42 = vld [vmem:[%s3350_s28 + $0x8] sm:$0xff]  ;;  %v423_v43 = vld [vmem:[%s3350_s28 + $0x10] sm:$0xff]  ;;  %v2603_v44 = vpack.c.bf16 %v712_v41, %v711_v40  ;;  %v713_v45 = vld [vmem:[#allocation6 + $0x60] sm:$0xff]  ;;  %p1614_p8 = scmp.lt.s32.totalorder (%p4013_p5), %s1613_s22, 32 }
  0xb8   : > { %v714_v46 = vld [vmem:[#allocation6 + $0x68] sm:$0xff]  ;;  %v424_v47 = vld [vmem:[%s3350_s28 + $0x18] sm:$0xff]  ;;  %v425_v48 = vld [vmem:[%s3350_s28 + $0x20] sm:$0xff] }
  0xb9   : > { %2562 = vmatpush3.bf16.msra.mxu0 %v2559_v8  ;;  %v2607_v49 = vpack.c.bf16 %v714_v46, %v713_v45  ;;  %v426_v50 = vld [vmem:[%s3350_s28 + $0x28] sm:$0xff]  ;;  %v427_v51 = vld [vmem:[%s3350_s28 + $0x30] sm:$0xff]  ;;  %v428_v52 = vld [vmem:[%s3350_s28 + $0x38] sm:$0xff] }
  0xba   : > { %2564 = vmatprep.subr.bf16.mxu0 %v2563_v12  ;;  %2590 = vmatpush3.bf16.msra.mxu1 %v2587_v26  ;;  %v429_v53 = vld [vmem:[%s3350_s28 + $0x40] sm:$0xff]  ;;  %v430_v54 = vld [vmem:[%s3350_s28 + $0x48] sm:$0xff]  ;;  %v431_v55 = vld [vmem:[%s3350_s28 + $0x50] sm:$0xff] }
  0xbb   : > { %2592 = vmatprep.subr.bf16.mxu1 %v2591_v31  ;;  %v432_v56 = vld [vmem:[%s3350_s28 + $0x58] sm:$0xff]  ;;  %v433_v57 = vld [vmem:[%s3350_s28 + $0x60] sm:$0xff]  ;;  %v434_v58 = vld [vmem:[%s3350_s28 + $0x68] sm:$0xff] }
  0xbc   : > { %v435_v59 = vld [vmem:[%s3350_s28 + $0x70] sm:$0xff]  ;;  %v436_v60 = vld [vmem:[%s3350_s28 + $0x78] sm:$0xff]  ;;  %v437_v61 = vld [vmem:[%s3350_s28 + $0x80] sm:$0xff]  ;;  %s3842_s14 = scalar_lea.vmem (%p4013_p5), %s4014_s15, %s2036_s16  }
  0xbd   : > { %2566 = vmatpush3.bf16.msra.mxu0 %v2563_v12  ;;  %v438_v62 = vld [vmem:[%s3350_s28 + $0x88] sm:$0xff]  ;;  %v439_v63 = vld [vmem:[%s3350_s28 + $0x90] sm:$0xff]  ;;  %v440_v0 = vld [vmem:[%s3350_s28 + $0x98] sm:$0xff] }
  0xbe   : > { %2568 = vmatprep.subr.bf16.mxu0 %v2567_v15  ;;  %2594 = vmatpush3.bf16.msra.mxu1 %v2591_v31  ;;  %v441_v1 = vld [vmem:[%s3350_s28 + $0xa0] sm:$0xff]  ;;  %v442_v2 = vld [vmem:[%s3350_s28 + $0xa8] sm:$0xff]  ;;  %v443_v3 = vld [vmem:[%s3350_s28 + $0xb0] sm:$0xff] }
  0xbf   : > { %2596 = vmatprep.subr.bf16.mxu1 %v2595_v36  ;;  %v444_v4 = vld [vmem:[%s3350_s28 + $0xb8] sm:$0xff]  ;;  %v445_v5 = vld [vmem:[%s3350_s28 + $0xc0] sm:$0xff]  ;;  %v446_v6 = vld [vmem:[%s3350_s28 + $0xc8] sm:$0xff] }
  0xc0   : > { %v447_v7 = vld [vmem:[%s3350_s28 + $0xd0] sm:$0xff]  ;;  %v448_v8 = vld [vmem:[%s3350_s28 + $0xd8] sm:$0xff]  ;;  %v449_v9 = vld [vmem:[%s3350_s28 + $0xe0] sm:$0xff] }
  0xc1   : > { %2570 = vmatpush3.bf16.msra.mxu0 %v2567_v15  ;;  %v450_v10 = vld [vmem:[%s3350_s28 + $0xe8] sm:$0xff]  ;;  %v451_v11 = vld [vmem:[%s3350_s28 + $0xf0] sm:$0xff]  ;;  %v452_v12 = vld [vmem:[%s3350_s28 + $0xf8] sm:$0xff] }
  0xc2   : > { %2572 = vmatprep.subr.bf16.mxu0 %v2571_v21  ;;  %2598 = vmatpush3.bf16.msra.mxu1 %v2595_v36  ;;  %v715_v13 = vld [vmem:[#allocation6 + $0x70] sm:$0xff]  ;;  %v716_v14 = vld [vmem:[#allocation6 + $0x78] sm:$0xff]  ;;  %v1013_v16 = vld [vmem:[#allocation7] sm:$0xff] }
  0xc3   : > { %2600 = vmatprep.subr.bf16.mxu1 %v2599_v39  ;;  %v2611_v15 = vpack.c.bf16 %v716_v14, %v715_v13  ;;  %v1014_v17 = vld [vmem:[#allocation7 + $0x8] sm:$0xff]  ;;  %v1015_v18 = vld [vmem:[#allocation7 + $0x10] sm:$0xff]  ;;  %v1016_v20 = vld [vmem:[#allocation7 + $0x18] sm:$0xff] }
  0xc4   : > { %v2615_v19 = vpack.c.bf16 %v1014_v17, %v1013_v16  ;;  %v1017_v22 = vld [vmem:[#allocation7 + $0x20] sm:$0xff]  ;;  %v1018_v23 = vld [vmem:[#allocation7 + $0x28] sm:$0xff]  ;;  %v1019_v25 = vld [vmem:[#allocation7 + $0x30] sm:$0xff] }
  0xc5   : > { %2574 = vmatpush3.bf16.msra.mxu0 %v2571_v21  ;;  %v2619_v21 = vpack.c.bf16 %v1016_v20, %v1015_v18  ;;  %v2623_v24 = vpack.c.bf16 %v1018_v23, %v1017_v22  ;;  %v1020_v26 = vld [vmem:[#allocation7 + $0x38] sm:$0xff]  ;;  %v1021_v28 = vld [vmem:[#allocation7 + $0x40] sm:$0xff]  ;;  %v1023_v31 = vld [vmem:[#allocation7 + $0x50] sm:$0xff] }
  0xc6   : > { %2576 = vmatprep.subr.bf16.mxu0 %v2575_v29  ;;  %2602 = vmatpush3.bf16.msra.mxu1 %v2599_v39  ;;  %v2627_v27 = vpack.c.bf16 %v1020_v26, %v1019_v25  ;;  %v1024_v32 = vld [vmem:[#allocation7 + $0x58] sm:$0xff]  ;;  %v1025_v34 = vld [vmem:[#allocation7 + $0x60] sm:$0xff] }
  0xc7   : > { %2604 = vmatprep.subr.bf16.mxu1 %v2603_v44  ;;  %v2635_v33 = vpack.c.bf16 %v1024_v32, %v1023_v31  ;;  %v3399_v37 = vld [vmem:[%s3979_s2] ss:$0 sm:$0xff] }
  0xc9   : > { %2578 = vmatpush3.bf16.msra.mxu0 %v2575_v29  ;;  %v1022_v29 = vld [vmem:[#allocation7 + $0x48] sm:$0xff] }
  0xca   : > { %2580 = vmatprep.subr.bf16.mxu0 %v2579_v35  ;;  %2606 = vmatpush3.bf16.msra.mxu1 %v2603_v44  ;;  %v2631_v30 = vpack.c.bf16 %v1022_v29, %v1021_v28 }
  0xcb   : > { %2608 = vmatprep.subr.bf16.mxu1 %v2607_v49 }
  0xcd   : > { %2582 = vmatpush3.bf16.msra.mxu0 %v2579_v35  ;;  %v1026_v35 = vld [vmem:[#allocation7 + $0x68] sm:$0xff] }
  0xce   : > { %2610 = vmatpush3.bf16.msra.mxu1 %v2607_v49  ;;  %2616 = vmatprep.subr.bf16.mxu0 %v2615_v19  ;;  %v2639_v36 = vpack.c.bf16 %v1026_v35, %v1025_v34 }
  0xcf   : > { %2612 = vmatprep.subr.bf16.mxu1 %v2611_v15 }
  0xd0   : > { %2264 = vmatmul.mubr.f32.vlgmr.msra.gmra.mrb[0].mxu0 %v422_v42 }
  0xd1   : > { %2266 = vmatprep.mubr.f32.mxu0 %v423_v43  ;;  %2618 = vmatpush3.bf16.msra.mxu0 %v2615_v19 }
  0xd2   : > { %2614 = vmatpush3.bf16.msra.mxu1 %v2611_v15  ;;  %2620 = vmatprep.subr.bf16.mxu0 %v2619_v21 }
  0xd4   : > { %2267 = vmatmul.mubr.f32.gmra.mrb[2].mxu0 %v424_v47 }
  0xd5   : > { %2269 = vmatprep.mubr.f32.mxu0 %v425_v48  ;;  %2622 = vmatpush3.bf16.msra.mxu0 %v2619_v21 }
  0xd6   : > { %2624 = vmatprep.subr.bf16.mxu0 %v2623_v24 }
  0xd8   : > { %2270 = vmatmul.mubr.f32.gmra.mrb[4].mxu0 %v426_v50 }
  0xd9   : > { %2272 = vmatprep.mubr.f32.mxu0 %v427_v51  ;;  %2626 = vmatpush3.bf16.msra.mxu0 %v2623_v24 }
  0xda   : > { %2628 = vmatprep.subr.bf16.mxu0 %v2627_v27 }
  0xdc   : > { %2273 = vmatmul.mubr.f32.gmra.mrb[6].mxu0 %v428_v52 }
  0xdd   : > { %2275 = vmatprep.mubr.f32.mxu0 %v429_v53  ;;  %2630 = vmatpush3.bf16.msra.mxu0 %v2627_v27 }
  0xde   : > { %2632 = vmatprep.subr.bf16.mxu0 %v2631_v30 }
  0xe0   : > { %2276 = vmatmul.mubr.f32.gmra.mrb[8].mxu0 %v430_v54 }
  0xe1   : > { %2278 = vmatprep.mubr.f32.mxu0 %v431_v55  ;;  %2634 = vmatpush3.bf16.msra.mxu0 %v2631_v30 }
  0xe2   : > { %2636 = vmatprep.subr.bf16.mxu0 %v2635_v33 }
  0xe4   : > { %2279 = vmatmul.mubr.f32.gmra.mrb[10].mxu0 %v432_v56 }
  0xe5   : > { %2281 = vmatprep.mubr.f32.mxu0 %v433_v57  ;;  %2638 = vmatpush3.bf16.msra.mxu0 %v2635_v33 }
  0xe6   : > { %2640 = vmatprep.subr.bf16.mxu0 %v2639_v36 }
  0xe8   : > { %2282 = vmatmul.mubr.f32.gmra.mrb[12].mxu0 %v434_v58 }
  0xe9   : > { %2284 = vmatprep.mubr.f32.mxu0 %v435_v59  ;;  %2642 = vmatpush3.bf16.msra.mxu0 %v2639_v36 }
  0xec   : > { %2285 = vmatmul.mubr.f32.gmra.mrb[14].mxu0 %v436_v60 }
  0xed   : > { %2287 = vmatprep.mubr.f32.mxu0 %v437_v61 }
  0xf0   : > { %2288 = vmatmul.mubr.f32.gmra.mrb[16].mxu0 %v438_v62 }
  0xf1   : > { %2290 = vmatprep.mubr.f32.mxu0 %v439_v63 }
  0xf4   : > { %2291 = vmatmul.mubr.f32.gmra.mrb[18].mxu0 %v440_v0 }
  0xf5   : > { %2293 = vmatprep.mubr.f32.mxu0 %v441_v1 }
  0xf8   : > { %2294 = vmatmul.mubr.f32.gmra.mrb[20].mxu0 %v442_v2 }
  0xf9   : > { %2296 = vmatprep.mubr.f32.mxu0 %v443_v3 }
  0xfc   : > { %2297 = vmatmul.mubr.f32.gmra.mrb[22].mxu0 %v444_v4 }
  0xfd   : > { %2299 = vmatprep.mubr.f32.mxu0 %v445_v5 }
 0x100   : > { %2300 = vmatmul.mubr.f32.gmra.mrb[24].mxu0 %v446_v6 }
 0x101   : > { %2302 = vmatprep.mubr.f32.mxu0 %v447_v7 }
 0x104   : > { %2303 = vmatmul.mubr.f32.gmra.mrb[26].mxu0 %v448_v8 }
 0x105   : > { %2305 = vmatprep.mubr.f32.mxu0 %v449_v9 }
 0x108   : > { %2306 = vmatmul.mubr.f32.gmra.mrb[28].mxu0 %v450_v10 }
 0x109   : > { %2308 = vmatprep.mubr.f32.mxu0 %v451_v11 }
 0x10c   : > { %2309 = vmatmul.mubr.f32.gmra.mrb[30].mxu0 %v452_v12 }
 0x1a3   : > { %v2265_v38 = vpop.f32.mrb[0].mxu0 }
 0x1a4   : > { %v542_v39 = vpop.f32.mrb[1].mxu0  ;;  %v3405_v41 = vadd.f32 %v2265_v38, %v3399_v37 }
 0x1a5   : > { %v3402_v40 = vadd.f32 %v3399_v37, %v542_v39  ;;  %v1027_v39 = vld [vmem:[#allocation7 + $0x70] sm:$0xff] }
 0x1a7   : > { %v2268_v42 = vpop.f32.mrb[2].mxu0  ;;  %2343 = vmatprep.mubr.f32.mxu1 %v3402_v40 }
 0x1a8   : > { %v552_v43 = vpop.f32.mrb[3].mxu0  ;;  %2344 = vmatmul.mubr.f32.vlgmr.msra.gmra.mrb[0].mxu1 %v3405_v41  ;;  %v3413_v45 = vadd.f32 %v2268_v42, %v3399_v37  ;;  %v1028_v42 = vld [vmem:[#allocation7 + $0x78] sm:$0xff] }
 0x1a9   : > { %v3410_v44 = vadd.f32 %v3399_v37, %v552_v43  ;;  %v2643_v43 = vpack.c.bf16 %v1028_v42, %v1027_v39 }
 0x1ab   : > { %v2271_v46 = vpop.f32.mrb[4].mxu0  ;;  %2346 = vmatprep.mubr.f32.mxu1 %v3410_v44  ;;  %2644 = vmatprep.subr.bf16.mxu0 %v2643_v43 }
 0x1ac   : > { %v562_v47 = vpop.f32.mrb[5].mxu0  ;;  %2347 = vmatmul.mubr.f32.gmra.mrb[2].mxu1 %v3413_v45  ;;  %v3421_v49 = vadd.f32 %v2271_v46, %v3399_v37  ;;  %2646 = vmatpush3.bf16.msra.mxu0 %v2643_v43  ;;  %v1325_v46 = vld [vmem:[#allocation9] sm:$0xff] }
 0x1ad   : > { %v3418_v48 = vadd.f32 %v3399_v37, %v562_v47  ;;  %v1326_v47 = vld [vmem:[#allocation9 + $0x8] sm:$0xff] }
 0x1af   : > { %v2274_v50 = vpop.f32.mrb[6].mxu0  ;;  %2349 = vmatprep.mubr.f32.mxu1 %v3418_v48 }
 0x1b0   : > { %v572_v51 = vpop.f32.mrb[7].mxu0  ;;  %2350 = vmatmul.mubr.f32.gmra.mrb[4].mxu1 %v3421_v49  ;;  %v3429_v53 = vadd.f32 %v2274_v50, %v3399_v37  ;;  %v1327_v50 = vld [vmem:[#allocation9 + $0x10] sm:$0xff] }
 0x1b1   : > { %v3426_v52 = vadd.f32 %v3399_v37, %v572_v51  ;;  %v2647_v51 = vpack.c.bf16 %v1326_v47, %v1325_v46 }
 0x1b3   : > { %v2277_v54 = vpop.f32.mrb[8].mxu0  ;;  %2352 = vmatprep.mubr.f32.mxu1 %v3426_v52  ;;  %2648 = vmatprep.subr.bf16.mxu1 %v2647_v51 }
 0x1b4   : > { %v582_v55 = vpop.f32.mrb[9].mxu0  ;;  %2353 = vmatmul.mubr.f32.gmra.mrb[6].mxu1 %v3429_v53  ;;  %v3437_v57 = vadd.f32 %v2277_v54, %v3399_v37  ;;  %v1328_v54 = vld [vmem:[#allocation9 + $0x18] sm:$0xff] }
 0x1b5   : > { %v3434_v56 = vadd.f32 %v3399_v37, %v582_v55  ;;  %v2651_v55 = vpack.c.bf16 %v1328_v54, %v1327_v50  ;;  %2650 = vmatpush3.bf16.msra.mxu1 %v2647_v51 }
 0x1b7   : > { %v2280_v58 = vpop.f32.mrb[10].mxu0  ;;  %2355 = vmatprep.mubr.f32.mxu1 %v3434_v56  ;;  %2652 = vmatprep.subr.bf16.mxu1 %v2651_v55 }
 0x1b8   : > { %v592_v59 = vpop.f32.mrb[11].mxu0  ;;  %2356 = vmatmul.mubr.f32.gmra.mrb[8].mxu1 %v3437_v57  ;;  %v3445_v61 = vadd.f32 %v2280_v58, %v3399_v37  ;;  %v1329_v58 = vld [vmem:[#allocation9 + $0x20] sm:$0xff] }
 0x1b9   : > { %v3442_v60 = vadd.f32 %v3399_v37, %v592_v59  ;;  %v1330_v59 = vld [vmem:[#allocation9 + $0x28] sm:$0xff]  ;;  %2654 = vmatpush3.bf16.msra.mxu1 %v2651_v55 }
 0x1bb   : > { %v2283_v62 = vpop.f32.mrb[12].mxu0  ;;  %2358 = vmatprep.mubr.f32.mxu1 %v3442_v60 }
 0x1bc   : > { %v602_v63 = vpop.f32.mrb[13].mxu0  ;;  %2359 = vmatmul.mubr.f32.gmra.mrb[10].mxu1 %v3445_v61  ;;  %v3453_v1 = vadd.f32 %v2283_v62, %v3399_v37  ;;  %v1331_v62 = vld [vmem:[#allocation9 + $0x30] sm:$0xff] }
 0x1bd   : > { %v3450_v0 = vadd.f32 %v3399_v37, %v602_v63  ;;  %v1332_v63 = vld [vmem:[#allocation9 + $0x38] sm:$0xff] }
 0x1bf   : > { %v2286_v2 = vpop.f32.mrb[14].mxu0  ;;  %2361 = vmatprep.mubr.f32.mxu1 %v3450_v0 }
 0x1c0   : > { %v612_v3 = vpop.f32.mrb[15].mxu0  ;;  %2362 = vmatmul.mubr.f32.gmra.mrb[12].mxu1 %v3453_v1  ;;  %v3461_v5 = vadd.f32 %v2286_v2, %v3399_v37  ;;  %v2659_v2 = vpack.c.bf16 %v1332_v63, %v1331_v62 }
 0x1c1   : > { %v3458_v4 = vadd.f32 %v3399_v37, %v612_v3  ;;  %v1333_v3 = vld [vmem:[#allocation9 + $0x40] sm:$0xff] }
 0x1c3   : > { %v2289_v6 = vpop.f32.mrb[16].mxu0  ;;  %2364 = vmatprep.mubr.f32.mxu1 %v3458_v4 }
 0x1c4   : > { %v622_v7 = vpop.f32.mrb[17].mxu0  ;;  %2365 = vmatmul.mubr.f32.gmra.mrb[14].mxu1 %v3461_v5  ;;  %v3469_v9 = vadd.f32 %v2289_v6, %v3399_v37  ;;  %v1334_v6 = vld [vmem:[#allocation9 + $0x48] sm:$0xff] }
 0x1c5   : > { %v3466_v8 = vadd.f32 %v3399_v37, %v622_v7  ;;  %v2663_v7 = vpack.c.bf16 %v1334_v6, %v1333_v3 }
 0x1c7   : > { %v2292_v10 = vpop.f32.mrb[18].mxu0  ;;  %2367 = vmatprep.mubr.f32.mxu1 %v3466_v8 }
 0x1c8   : > { %v632_v11 = vpop.f32.mrb[19].mxu0  ;;  %2368 = vmatmul.mubr.f32.gmra.mrb[16].mxu1 %v3469_v9  ;;  %v3477_v13 = vadd.f32 %v2292_v10, %v3399_v37  ;;  %v1335_v10 = vld [vmem:[#allocation9 + $0x50] sm:$0xff] }
 0x1c9   : > { %v3474_v12 = vadd.f32 %v3399_v37, %v632_v11  ;;  %v1336_v11 = vld [vmem:[#allocation9 + $0x58] sm:$0xff] }
 0x1cb   : > { %v2295_v14 = vpop.f32.mrb[20].mxu0  ;;  %2370 = vmatprep.mubr.f32.mxu1 %v3474_v12 }
 0x1cc   : > { %v642_v15 = vpop.f32.mrb[21].mxu0  ;;  %2371 = vmatmul.mubr.f32.gmra.mrb[18].mxu1 %v3477_v13  ;;  %v3485_v17 = vadd.f32 %v2295_v14, %v3399_v37  ;;  %v2667_v14 = vpack.c.bf16 %v1336_v11, %v1335_v10 }
 0x1cd   : > { %v3482_v16 = vadd.f32 %v3399_v37, %v642_v15  ;;  %v1337_v15 = vld [vmem:[#allocation9 + $0x60] sm:$0xff] }
 0x1cf   : > { %v2298_v18 = vpop.f32.mrb[22].mxu0  ;;  %2373 = vmatprep.mubr.f32.mxu1 %v3482_v16 }
 0x1d0   : > { %v652_v19 = vpop.f32.mrb[23].mxu0  ;;  %2374 = vmatmul.mubr.f32.gmra.mrb[20].mxu1 %v3485_v17  ;;  %v3493_v21 = vadd.f32 %v2298_v18, %v3399_v37  ;;  %v1338_v18 = vld [vmem:[#allocation9 + $0x68] sm:$0xff] }
 0x1d1   : > { %v3490_v20 = vadd.f32 %v3399_v37, %v652_v19  ;;  %v2671_v19 = vpack.c.bf16 %v1338_v18, %v1337_v15 }
 0x1d3   : > { %v2301_v22 = vpop.f32.mrb[24].mxu0  ;;  %2376 = vmatprep.mubr.f32.mxu1 %v3490_v20 }
 0x1d4   : > { %v662_v23 = vpop.f32.mrb[25].mxu0  ;;  %2377 = vmatmul.mubr.f32.gmra.mrb[22].mxu1 %v3493_v21  ;;  %v3501_v25 = vadd.f32 %v2301_v22, %v3399_v37  ;;  %v3532_v22 = vld [vmem:[%s3981_s4] ss:$0 sm:$0xff] }
 0x1d5   : > { %v3498_v24 = vadd.f32 %v3399_v37, %v662_v23 }
 0x1d7   : > { %v2304_v26 = vpop.f32.mrb[26].mxu0  ;;  %2379 = vmatprep.mubr.f32.mxu1 %v3498_v24 }
 0x1d8   : > { %v672_v27 = vpop.f32.mrb[27].mxu0  ;;  %2380 = vmatmul.mubr.f32.gmra.mrb[24].mxu1 %v3501_v25  ;;  %v3509_v29 = vadd.f32 %v2304_v26, %v3399_v37 }
 0x1d9   : > { %v3506_v28 = vadd.f32 %v3399_v37, %v672_v27 }
 0x1db   : > { %v2307_v30 = vpop.f32.mrb[28].mxu0  ;;  %2382 = vmatprep.mubr.f32.mxu1 %v3506_v28 }
 0x1dc   : > { %v682_v31 = vpop.f32.mrb[29].mxu0  ;;  %2383 = vmatmul.mubr.f32.gmra.mrb[26].mxu1 %v3509_v29  ;;  %v3517_v33 = vadd.f32 %v2307_v30, %v3399_v37 }
 0x1dd   : > { %v3514_v32 = vadd.f32 %v3399_v37, %v682_v31 }
 0x1df   : > { %v2310_v34 = vpop.f32.mrb[30].mxu0  ;;  %2385 = vmatprep.mubr.f32.mxu1 %v3514_v32 }
 0x1e0   : > { %v692_v35 = vpop.f32.mrb[31].mxu0  ;;  %2386 = vmatmul.mubr.f32.gmra.mrb[28].mxu1 %v3517_v33  ;;  %v3525_v38 = vadd.f32 %v2310_v34, %v3399_v37 }
 0x1e1   : > { %v3522_v36 = vadd.f32 %v3399_v37, %v692_v35  ;;  %v2655_v37 = vpack.c.bf16 %v1330_v59, %v1329_v58 }
 0x1e3   : > { %2388 = vmatprep.mubr.f32.mxu1 %v3522_v36  ;;  %2656 = vmatprep.subr.bf16.mxu1 %v2655_v37 }
 0x1e4   : > { %2389 = vmatmul.mubr.f32.gmra.mrb[30].mxu1 %v3525_v38 }
 0x1e5   : > { %2658 = vmatpush3.bf16.msra.mxu1 %v2655_v37 }
 0x1e6   : > { %2660 = vmatprep.subr.bf16.mxu1 %v2659_v2 }
 0x1e9   : > { %2662 = vmatpush3.bf16.msra.mxu1 %v2659_v2 }
 0x1ea   : > { %2664 = vmatprep.subr.bf16.mxu1 %v2663_v7 }
 0x1ed   : > { %2666 = vmatpush3.bf16.msra.mxu1 %v2663_v7 }
 0x1ee   : > { %2668 = vmatprep.subr.bf16.mxu1 %v2667_v14 }
 0x1f1   : > { %2670 = vmatpush3.bf16.msra.mxu1 %v2667_v14 }
 0x1f2   : > { %2672 = vmatprep.subr.bf16.mxu1 %v2671_v19 }
 0x1f5   : > { %2674 = vmatpush3.bf16.msra.mxu1 %v2671_v19 }
 0x27b   : > { %v2345_v23 = vpop.f32.mrb[0].mxu1 }
 0x27c   : > { %v796_v26 = vadd.f32 %v2345_v23, %v3532_v22  ;;  %v790_v27 = vpop.f32.mrb[1].mxu1 }
 0x27d   : > { %v791_v30 = vadd.f32 %v3532_v22, %v790_v27 }
 0x27e   : > { %v950_v31 = vmax.f32 %v796_v26, 0.0 }
 0x27f   : > { %v949_v34 = vmax.f32 %v791_v30, 0.0  ;;  %v2348_v35 = vpop.f32.mrb[2].mxu1 }
 0x280   : > { %v806_v39 = vadd.f32 %v2348_v35, %v3532_v22  ;;  %v800_v42 = vpop.f32.mrb[3].mxu1  ;;  %v3542_v47 = vadd.f32 %v950_v31, %v3405_v41 }
 0x281   : > { %v3538_v43 = vadd.f32 %v949_v34, %v3402_v40  ;;  %v801_v46 = vadd.f32 %v3532_v22, %v800_v42 }
 0x282   : > { %v952_v50 = vmax.f32 %v806_v39, 0.0 }
 0x283   : > { %v951_v51 = vmax.f32 %v801_v46, 0.0  ;;  %v2351_v54 = vpop.f32.mrb[4].mxu1  ;;  %2423 = vmatprep.mubr.f32.mxu0 %v3538_v43 }
 0x284   : > { %v816_v55 = vadd.f32 %v2351_v54, %v3532_v22  ;;  %v810_v58 = vpop.f32.mrb[5].mxu1  ;;  %2424 = vmatmul.mubr.f32.vlgmr.msra.gmra.mrb[32].mxu0 %v3542_v47  ;;  %v3552_v37 = vadd.f32 %v952_v50, %v3413_v45 }
 0x285   : > { %v3548_v59 = vadd.f32 %v951_v51, %v3410_v44  ;;  %v811_v40 = vadd.f32 %v3532_v22, %v810_v58 }
 0x286   : > { %v954_v41 = vmax.f32 %v816_v55, 0.0 }
 0x287   : > { %v953_v62 = vmax.f32 %v811_v40, 0.0  ;;  %v2354_v63 = vpop.f32.mrb[6].mxu1  ;;  %2426 = vmatprep.mubr.f32.mxu0 %v3548_v59 }
 0x288   : > { %v826_v2 = vadd.f32 %v2354_v63, %v3532_v22  ;;  %v820_v3 = vpop.f32.mrb[7].mxu1  ;;  %2427 = vmatmul.mubr.f32.gmra.mrb[34].mxu0 %v3552_v37  ;;  %v3562_v7 = vadd.f32 %v954_v41, %v3421_v49 }
 0x289   : > { %v3558_v6 = vadd.f32 %v953_v62, %v3418_v48  ;;  %v821_v44 = vadd.f32 %v3532_v22, %v820_v3 }
 0x28a   : > { %v956_v45 = vmax.f32 %v826_v2, 0.0 }
 0x28b   : > { %v955_v10 = vmax.f32 %v821_v44, 0.0  ;;  %v2357_v11 = vpop.f32.mrb[8].mxu1  ;;  %2429 = vmatprep.mubr.f32.mxu0 %v3558_v6 }
 0x28c   : > { %v836_v14 = vadd.f32 %v2357_v11, %v3532_v22  ;;  %v830_v15 = vpop.f32.mrb[9].mxu1  ;;  %2430 = vmatmul.mubr.f32.gmra.mrb[36].mxu0 %v3562_v7  ;;  %v3572_v19 = vadd.f32 %v956_v45, %v3429_v53 }
 0x28d   : > { %v3568_v18 = vadd.f32 %v955_v10, %v3426_v52  ;;  %v831_v48 = vadd.f32 %v3532_v22, %v830_v15 }
 0x28e   : > { %v958_v49 = vmax.f32 %v836_v14, 0.0 }
 0x28f   : > { %v957_v23 = vmax.f32 %v831_v48, 0.0  ;;  %v2360_v26 = vpop.f32.mrb[10].mxu1  ;;  %2432 = vmatprep.mubr.f32.mxu0 %v3568_v18 }
 0x290   : > { %v846_v27 = vadd.f32 %v2360_v26, %v3532_v22  ;;  %v840_v30 = vpop.f32.mrb[11].mxu1  ;;  %2433 = vmatmul.mubr.f32.gmra.mrb[38].mxu0 %v3572_v19  ;;  %v3582_v34 = vadd.f32 %v958_v49, %v3437_v57 }
 0x291   : > { %v3578_v31 = vadd.f32 %v957_v23, %v3434_v56  ;;  %v841_v52 = vadd.f32 %v3532_v22, %v840_v30 }
 0x292   : > { %v960_v53 = vmax.f32 %v846_v27, 0.0 }
 0x293   : > { %v959_v35 = vmax.f32 %v841_v52, 0.0  ;;  %v2363_v39 = vpop.f32.mrb[12].mxu1  ;;  %2435 = vmatprep.mubr.f32.mxu0 %v3578_v31 }
 0x294   : > { %v856_v42 = vadd.f32 %v2363_v39, %v3532_v22  ;;  %v850_v46 = vpop.f32.mrb[13].mxu1  ;;  %2436 = vmatmul.mubr.f32.gmra.mrb[40].mxu0 %v3582_v34  ;;  %v3592_v51 = vadd.f32 %v960_v53, %v3445_v61 }
 0x295   : > { %v3588_v50 = vadd.f32 %v959_v35, %v3442_v60  ;;  %v851_v56 = vadd.f32 %v3532_v22, %v850_v46 }
 0x296   : > { %v962_v57 = vmax.f32 %v856_v42, 0.0 }
 0x297   : > { %v961_v54 = vmax.f32 %v851_v56, 0.0  ;;  %v2366_v55 = vpop.f32.mrb[14].mxu1  ;;  %2438 = vmatprep.mubr.f32.mxu0 %v3588_v50 }
 0x298   : > { %v866_v58 = vadd.f32 %v2366_v55, %v3532_v22  ;;  %v860_v40 = vpop.f32.mrb[15].mxu1  ;;  %2439 = vmatmul.mubr.f32.gmra.mrb[42].mxu0 %v3592_v51  ;;  %v3602_v62 = vadd.f32 %v962_v57, %v3453_v1 }
 0x299   : > { %v3598_v41 = vadd.f32 %v961_v54, %v3450_v0  ;;  %v861_v60 = vadd.f32 %v3532_v22, %v860_v40 }
 0x29a   : > { %v964_v61 = vmax.f32 %v866_v58, 0.0 }
 0x29b   : > { %v963_v63 = vmax.f32 %v861_v60, 0.0  ;;  %v2369_v2 = vpop.f32.mrb[16].mxu1  ;;  %2441 = vmatprep.mubr.f32.mxu0 %v3598_v41 }
 0x29c   : > { %v876_v3 = vadd.f32 %v2369_v2, %v3532_v22  ;;  %v870_v44 = vpop.f32.mrb[17].mxu1  ;;  %2442 = vmatmul.mubr.f32.gmra.mrb[44].mxu0 %v3602_v62  ;;  %v3612_v10 = vadd.f32 %v964_v61, %v3461_v5 }
 0x29d   : > { %v3608_v45 = vadd.f32 %v963_v63, %v3458_v4  ;;  %v871_v0 = vadd.f32 %v3532_v22, %v870_v44 }
 0x29e   : > { %v966_v1 = vmax.f32 %v876_v3, 0.0 }
 0x29f   : > { %v965_v11 = vmax.f32 %v871_v0, 0.0  ;;  %v2372_v14 = vpop.f32.mrb[18].mxu1  ;;  %2444 = vmatprep.mubr.f32.mxu0 %v3608_v45 }
 0x2a0   : > { %v886_v15 = vadd.f32 %v2372_v14, %v3532_v22  ;;  %v880_v48 = vpop.f32.mrb[19].mxu1  ;;  %2445 = vmatmul.mubr.f32.gmra.mrb[46].mxu0 %v3612_v10  ;;  %v3622_v23 = vadd.f32 %v966_v1, %v3469_v9 }
 0x2a1   : > { %v3618_v49 = vadd.f32 %v965_v11, %v3466_v8  ;;  %v881_v4 = vadd.f32 %v3532_v22, %v880_v48 }
 0x2a2   : > { %v968_v5 = vmax.f32 %v886_v15, 0.0 }
 0x2a3   : > { %v967_v26 = vmax.f32 %v881_v4, 0.0  ;;  %v2375_v27 = vpop.f32.mrb[20].mxu1  ;;  %2447 = vmatprep.mubr.f32.mxu0 %v3618_v49 }
 0x2a4   : > { %v896_v30 = vadd.f32 %v2375_v27, %v3532_v22  ;;  %v890_v52 = vpop.f32.mrb[21].mxu1  ;;  %2448 = vmatmul.mubr.f32.gmra.mrb[48].mxu0 %v3622_v23  ;;  %v3632_v35 = vadd.f32 %v968_v5, %v3477_v13 }
 0x2a5   : > { %v3628_v53 = vadd.f32 %v967_v26, %v3474_v12  ;;  %v891_v8 = vadd.f32 %v3532_v22, %v890_v52 }
 0x2a6   : > { %v970_v9 = vmax.f32 %v896_v30, 0.0 }
 0x2a7   : > { %v969_v39 = vmax.f32 %v891_v8, 0.0  ;;  %v2378_v42 = vpop.f32.mrb[22].mxu1  ;;  %2450 = vmatprep.mubr.f32.mxu0 %v3628_v53 }
 0x2a8   : > { %v906_v46 = vadd.f32 %v2378_v42, %v3532_v22  ;;  %v900_v56 = vpop.f32.mrb[23].mxu1  ;;  %2451 = vmatmul.mubr.f32.gmra.mrb[50].mxu0 %v3632_v35  ;;  %v3642_v54 = vadd.f32 %v970_v9, %v3485_v17 }
 0x2a9   : > { %v3638_v57 = vadd.f32 %v969_v39, %v3482_v16  ;;  %v901_v12 = vadd.f32 %v3532_v22, %v900_v56 }
 0x2aa   : > { %v972_v13 = vmax.f32 %v906_v46, 0.0 }
 0x2ab   : > { %v971_v55 = vmax.f32 %v901_v12, 0.0  ;;  %v2381_v58 = vpop.f32.mrb[24].mxu1  ;;  %2453 = vmatprep.mubr.f32.mxu0 %v3638_v57  ;;  %v3697_v12 = vld [vmem:[%s3983_s6] ss:$0 sm:$0xff] }
 0x2ac   : > { %v916_v40 = vadd.f32 %v2381_v58, %v3532_v22  ;;  %v910_v60 = vpop.f32.mrb[25].mxu1  ;;  %2454 = vmatmul.mubr.f32.gmra.mrb[52].mxu0 %v3642_v54  ;;  %v3652_v63 = vadd.f32 %v972_v13, %v3493_v21 }
 0x2ad   : > { %v3648_v61 = vadd.f32 %v971_v55, %v3490_v20  ;;  %v911_v16 = vadd.f32 %v3532_v22, %v910_v60 }
 0x2ae   : > { %v974_v17 = vmax.f32 %v916_v40, 0.0 }
 0x2af   : > { %v973_v2 = vmax.f32 %v911_v16, 0.0  ;;  %v2384_v3 = vpop.f32.mrb[26].mxu1  ;;  %2456 = vmatprep.mubr.f32.mxu0 %v3648_v61 }
 0x2b0   : > { %v926_v44 = vadd.f32 %v2384_v3, %v3532_v22  ;;  %v920_v0 = vpop.f32.mrb[27].mxu1  ;;  %2457 = vmatmul.mubr.f32.gmra.mrb[54].mxu0 %v3652_v63  ;;  %v3662_v11 = vadd.f32 %v974_v17, %v3501_v25 }
 0x2b1   : > { %v3658_v1 = vadd.f32 %v973_v2, %v3498_v24  ;;  %v921_v20 = vadd.f32 %v3532_v22, %v920_v0 }
 0x2b2   : > { %v976_v21 = vmax.f32 %v926_v44, 0.0 }
 0x2b3   : > { %v975_v14 = vmax.f32 %v921_v20, 0.0  ;;  %v2387_v15 = vpop.f32.mrb[28].mxu1  ;;  %2459 = vmatprep.mubr.f32.mxu0 %v3658_v1 }
 0x2b4   : > { %v936_v48 = vadd.f32 %v2387_v15, %v3532_v22  ;;  %v930_v4 = vpop.f32.mrb[29].mxu1  ;;  %2460 = vmatmul.mubr.f32.gmra.mrb[56].mxu0 %v3662_v11  ;;  %v3672_v26 = vadd.f32 %v976_v21, %v3509_v29 }
 0x2b5   : > { %v3668_v5 = vadd.f32 %v975_v14, %v3506_v28  ;;  %v931_v24 = vadd.f32 %v3532_v22, %v930_v4 }
 0x2b6   : > { %v978_v25 = vmax.f32 %v936_v48, 0.0 }
 0x2b7   : > { %v977_v27 = vmax.f32 %v931_v24, 0.0  ;;  %v2390_v30 = vpop.f32.mrb[30].mxu1  ;;  %2462 = vmatprep.mubr.f32.mxu0 %v3668_v5 }
 0x2b8   : > { %v946_v52 = vadd.f32 %v2390_v30, %v3532_v22  ;;  %v940_v8 = vpop.f32.mrb[31].mxu1  ;;  %2463 = vmatmul.mubr.f32.gmra.mrb[58].mxu0 %v3672_v26  ;;  %v3682_v39 = vadd.f32 %v978_v25, %v3517_v33 }
 0x2b9   : > { %v3678_v9 = vadd.f32 %v977_v27, %v3514_v32  ;;  %v941_v28 = vadd.f32 %v3532_v22, %v940_v8  ;;  %v1339_v32 = vld [vmem:[#allocation9 + $0x70] sm:$0xff]  ;;  %v1340_v22 = vld [vmem:[#allocation9 + $0x78] sm:$0xff] }
 0x2ba   : > { %v980_v29 = vmax.f32 %v946_v52, 0.0  ;;  %v2675_v33 = vpack.c.bf16 %v1340_v22, %v1339_v32 }
 0x2bb   : > { %v979_v42 = vmax.f32 %v941_v28, 0.0  ;;  %2465 = vmatprep.mubr.f32.mxu0 %v3678_v9 }
 0x2bc   : > { %2466 = vmatmul.mubr.f32.gmra.mrb[60].mxu0 %v3682_v39  ;;  %v3690_v56 = vadd.f32 %v980_v29, %v3525_v38  ;;  %2676 = vmatprep.subr.bf16.mxu1 %v2675_v33 }
 0x2bd   : > { %v3687_v46 = vadd.f32 %v979_v42, %v3522_v36  ;;  %2678 = vmatpush3.bf16.msra.mxu1 %v2675_v33 }
 0x2bf   : > { %2468 = vmatprep.mubr.f32.mxu0 %v3687_v46 }
 0x2c0   : > { %2469 = vmatmul.mubr.f32.gmra.mrb[62].mxu0 %v3690_v56 }
 0x357   : > { %v2425_v13 = vpop.f32.mrb[32].mxu0 }
 0x358   : > { %v1108_v36 = vadd.f32 %v2425_v13, %v3697_v12  ;;  %v1102_v55 = vpop.f32.mrb[33].mxu0 }
 0x359   : > { %v1103_v38 = vadd.f32 %v3697_v12, %v1102_v55 }
 0x35a   : > { %v1262_v58 = vmax.f32 %v1108_v36, 0.0 }
 0x35b   : > { %v1261_v40 = vmax.f32 %v1103_v38, 0.0  ;;  %v2428_v60 = vpop.f32.mrb[34].mxu0 }
 0x35c   : > { %v1118_v16 = vadd.f32 %v2428_v60, %v3697_v12  ;;  %v1112_v17 = vpop.f32.mrb[35].mxu0  ;;  %v1294_v44 = vadd.f32 %v1262_v58, %v3542_v47 }
 0x35d   : > { %v1293_v2 = vadd.f32 %v1261_v40, %v3538_v43  ;;  %v1113_v3 = vadd.f32 %v3697_v12, %v1112_v17 }
 0x35e   : > { %v1264_v0 = vmax.f32 %v1118_v16, 0.0 }
 0x35f   : > { %v1263_v20 = vmax.f32 %v1113_v3, 0.0  ;;  %v2431_v21 = vpop.f32.mrb[36].mxu0  ;;  %2503 = vmatprep.mubr.f32.mxu1 %v1293_v2 }
 0x360   : > { %v1128_v14 = vadd.f32 %v2431_v21, %v3697_v12  ;;  %v1122_v15 = vpop.f32.mrb[37].mxu0  ;;  %2504 = vmatmul.mubr.f32.vlgmr.msra.gmra.mrb[32].mxu1 %v1294_v44  ;;  %v1296_v24 = vadd.f32 %v1264_v0, %v3552_v37 }
 0x361   : > { %v1295_v48 = vadd.f32 %v1263_v20, %v3548_v59  ;;  %v1123_v4 = vadd.f32 %v3697_v12, %v1122_v15 }
 0x362   : > { %v1266_v25 = vmax.f32 %v1128_v14, 0.0 }
 0x363   : > { %v1265_v43 = vmax.f32 %v1123_v4, 0.0  ;;  %v2434_v27 = vpop.f32.mrb[38].mxu0  ;;  %2506 = vmatprep.mubr.f32.mxu1 %v1295_v48 }
 0x364   : > { %v1138_v47 = vadd.f32 %v2434_v27, %v3697_v12  ;;  %v1132_v30 = vpop.f32.mrb[39].mxu0  ;;  %2507 = vmatmul.mubr.f32.gmra.mrb[34].mxu1 %v1296_v24  ;;  %v1298_v28 = vadd.f32 %v1266_v25, %v3562_v7 }
 0x365   : > { %v1297_v52 = vadd.f32 %v1265_v43, %v3558_v6  ;;  %v1133_v8 = vadd.f32 %v3697_v12, %v1132_v30 }
 0x366   : > { %v1268_v29 = vmax.f32 %v1138_v47, 0.0 }
 0x367   : > { %v1267_v59 = vmax.f32 %v1133_v8, 0.0  ;;  %v2437_v42 = vpop.f32.mrb[40].mxu0  ;;  %2509 = vmatprep.mubr.f32.mxu1 %v1297_v52 }
 0x368   : > { %v1148_v37 = vadd.f32 %v2437_v42, %v3697_v12  ;;  %v1142_v32 = vpop.f32.mrb[41].mxu0  ;;  %2510 = vmatmul.mubr.f32.gmra.mrb[36].mxu1 %v1298_v28  ;;  %v1300_v13 = vadd.f32 %v1268_v29, %v3572_v19 }
 0x369   : > { %v1299_v22 = vadd.f32 %v1267_v59, %v3568_v18  ;;  %v1143_v33 = vadd.f32 %v3697_v12, %v1142_v32 }
 0x36a   : > { %v1270_v36 = vmax.f32 %v1148_v37, 0.0 }
 0x36b   : > { %v1269_v6 = vmax.f32 %v1143_v33, 0.0  ;;  %v2440_v55 = vpop.f32.mrb[42].mxu0  ;;  %2512 = vmatprep.mubr.f32.mxu1 %v1299_v22 }
 0x36c   : > { %v1158_v7 = vadd.f32 %v2440_v55, %v3697_v12  ;;  %v1152_v38 = vpop.f32.mrb[43].mxu0  ;;  %2513 = vmatmul.mubr.f32.gmra.mrb[38].mxu1 %v1300_v13  ;;  %v1302_v60 = vadd.f32 %v1270_v36, %v3582_v34 }
 0x36d   : > { %v1301_v58 = vadd.f32 %v1269_v6, %v3578_v31  ;;  %v1153_v40 = vadd.f32 %v3697_v12, %v1152_v38 }
 0x36e   : > { %v1272_v16 = vmax.f32 %v1158_v7, 0.0 }
 0x36f   : > { %v1271_v18 = vmax.f32 %v1153_v40, 0.0  ;;  %v2443_v17 = vpop.f32.mrb[44].mxu0  ;;  %2515 = vmatprep.mubr.f32.mxu1 %v1301_v58 }
 0x370   : > { %v1168_v19 = vadd.f32 %v2443_v17, %v3697_v12  ;;  %v1162_v2 = vpop.f32.mrb[45].mxu0  ;;  %2516 = vmatmul.mubr.f32.gmra.mrb[40].mxu1 %v1302_v60  ;;  %v1304_v0 = vadd.f32 %v1272_v16, %v3592_v51 }
 0x371   : > { %v1303_v3 = vadd.f32 %v1271_v18, %v3588_v50  ;;  %v1163_v44 = vadd.f32 %v3697_v12, %v1162_v2 }
 0x372   : > { %v1274_v20 = vmax.f32 %v1168_v19, 0.0 }
 0x373   : > { %v1273_v31 = vmax.f32 %v1163_v44, 0.0  ;;  %v2446_v21 = vpop.f32.mrb[46].mxu0  ;;  %2518 = vmatprep.mubr.f32.mxu1 %v1303_v3 }
 0x374   : > { %v1178_v34 = vadd.f32 %v2446_v21, %v3697_v12  ;;  %v1172_v14 = vpop.f32.mrb[47].mxu0  ;;  %2519 = vmatmul.mubr.f32.gmra.mrb[42].mxu1 %v1304_v0  ;;  %v1306_v4 = vadd.f32 %v1274_v20, %v3602_v62 }
 0x375   : > { %v1305_v15 = vadd.f32 %v1273_v31, %v3598_v41  ;;  %v1173_v48 = vadd.f32 %v3697_v12, %v1172_v14 }
 0x376   : > { %v1276_v24 = vmax.f32 %v1178_v34, 0.0 }
 0x377   : > { %v1275_v50 = vmax.f32 %v1173_v48, 0.0  ;;  %v2449_v25 = vpop.f32.mrb[48].mxu0  ;;  %2521 = vmatprep.mubr.f32.mxu1 %v1305_v15 }
 0x378   : > { %v1188_v51 = vadd.f32 %v2449_v25, %v3697_v12  ;;  %v1182_v43 = vpop.f32.mrb[49].mxu0  ;;  %2522 = vmatmul.mubr.f32.gmra.mrb[44].mxu1 %v1306_v4  ;;  %v1308_v30 = vadd.f32 %v1276_v24, %v3612_v10 }
 0x379   : > { %v1307_v27 = vadd.f32 %v1275_v50, %v3608_v45  ;;  %v1183_v47 = vadd.f32 %v3697_v12, %v1182_v43 }
 0x37a   : > { %v1278_v52 = vmax.f32 %v1188_v51, 0.0 }
 0x37b   : > { %v1277_v41 = vmax.f32 %v1183_v47, 0.0  ;;  %v2452_v8 = vpop.f32.mrb[50].mxu0  ;;  %2524 = vmatprep.mubr.f32.mxu1 %v1307_v27 }
 0x37c   : > { %v1198_v62 = vadd.f32 %v2452_v8, %v3697_v12  ;;  %v1192_v28 = vpop.f32.mrb[51].mxu0  ;;  %2525 = vmatmul.mubr.f32.gmra.mrb[46].mxu1 %v1308_v30  ;;  %v1310_v42 = vadd.f32 %v1278_v52, %v3622_v23 }
 0x37d   : > { %v1309_v29 = vadd.f32 %v1277_v41, %v3618_v49  ;;  %v1193_v59 = vadd.f32 %v3697_v12, %v1192_v28  ;;  %v3766_v41 = vld [vmem:[%s4011_s8] ss:$0 sm:$0xff] }
 0x37e   : > { %v1280_v37 = vmax.f32 %v1198_v62, 0.0 }
 0x37f   : > { %v1279_v45 = vmax.f32 %v1193_v59, 0.0  ;;  %v2455_v32 = vpop.f32.mrb[52].mxu0  ;;  %2527 = vmatprep.mubr.f32.mxu1 %v1309_v29 }
 0x380   : > { %v1208_v10 = vadd.f32 %v2455_v32, %v3697_v12  ;;  %v1202_v22 = vpop.f32.mrb[53].mxu0  ;;  %2528 = vmatmul.mubr.f32.gmra.mrb[48].mxu1 %v1310_v42  ;;  %v1312_v36 = vadd.f32 %v1280_v37, %v3632_v35 }
 0x381   : > { %v1311_v33 = vadd.f32 %v1279_v45, %v3628_v53  ;;  %v1203_v13 = vadd.f32 %v3697_v12, %v1202_v22 }
 0x382   : > { %v1282_v6 = vmax.f32 %v1208_v10, 0.0 }
 0x383   : > { %v1281_v49 = vmax.f32 %v1203_v13, 0.0  ;;  %v2458_v55 = vpop.f32.mrb[54].mxu0  ;;  %2530 = vmatprep.mubr.f32.mxu1 %v1311_v33 }
 0x384   : > { %v1218_v23 = vadd.f32 %v2458_v55, %v3697_v12  ;;  %v1212_v7 = vpop.f32.mrb[55].mxu0  ;;  %2531 = vmatmul.mubr.f32.gmra.mrb[50].mxu1 %v1312_v36  ;;  %v1314_v40 = vadd.f32 %v1282_v6, %v3642_v54 }
 0x385   : > { %v1313_v38 = vadd.f32 %v1281_v49, %v3638_v57  ;;  %v1213_v58 = vadd.f32 %v3697_v12, %v1212_v7 }
 0x386   : > { %v1284_v60 = vmax.f32 %v1218_v23, 0.0 }
 0x387   : > { %v1283_v53 = vmax.f32 %v1213_v58, 0.0  ;;  %v2461_v16 = vpop.f32.mrb[56].mxu0  ;;  %2533 = vmatprep.mubr.f32.mxu1 %v1313_v38 }
 0x388   : > { %v1228_v35 = vadd.f32 %v2461_v16, %v3697_v12  ;;  %v1222_v18 = vpop.f32.mrb[57].mxu0  ;;  %2534 = vmatmul.mubr.f32.gmra.mrb[52].mxu1 %v1314_v40  ;;  %v1316_v2 = vadd.f32 %v1284_v60, %v3652_v63 }
 0x389   : > { %v1315_v17 = vadd.f32 %v1283_v53, %v3648_v61  ;;  %v1223_v19 = vadd.f32 %v3697_v12, %v1222_v18 }
 0x38a   : > { %v1286_v3 = vmax.f32 %v1228_v35, 0.0 }
 0x38b   : > { %v1285_v57 = vmax.f32 %v1223_v19, 0.0  ;;  %v2464_v44 = vpop.f32.mrb[58].mxu0  ;;  %2536 = vmatprep.mubr.f32.mxu1 %v1315_v17 }
 0x38c   : > { %v1238_v54 = vadd.f32 %v2464_v44, %v3697_v12  ;;  %v1232_v0 = vpop.f32.mrb[59].mxu0  ;;  %2537 = vmatmul.mubr.f32.gmra.mrb[54].mxu1 %v1316_v2  ;;  %v1318_v21 = vadd.f32 %v1286_v3, %v3662_v11 }
 0x38d   : > { %v1317_v20 = vadd.f32 %v1285_v57, %v3658_v1  ;;  %v1233_v31 = vadd.f32 %v3697_v12, %v1232_v0 }
 0x38e   : > { %v1288_v34 = vmax.f32 %v1238_v54, 0.0 }
 0x38f   : > { %v1287_v61 = vmax.f32 %v1233_v31, 0.0  ;;  %v2467_v14 = vpop.f32.mrb[60].mxu0  ;;  %2539 = vmatprep.mubr.f32.mxu1 %v1317_v20 }
 0x390   : > { %v1248_v63 = vadd.f32 %v2467_v14, %v3697_v12  ;;  %v1242_v15 = vpop.f32.mrb[61].mxu0  ;;  %2540 = vmatmul.mubr.f32.gmra.mrb[56].mxu1 %v1318_v21  ;;  %v1320_v24 = vadd.f32 %v1288_v34, %v3672_v26 }
 0x391   : > { %v1319_v48 = vadd.f32 %v1287_v61, %v3668_v5  ;;  %v1243_v4 = vadd.f32 %v3697_v12, %v1242_v15 }
 0x392   : > { %v1290_v50 = vmax.f32 %v1248_v63, 0.0 }
 0x393   : > { %v1289_v1 = vmax.f32 %v1243_v4, 0.0  ;;  %v2470_v25 = vpop.f32.mrb[62].mxu0  ;;  %2542 = vmatprep.mubr.f32.mxu1 %v1319_v48 }
 0x394   : > { %v1258_v11 = vadd.f32 %v2470_v25, %v3697_v12  ;;  %v1252_v51 = vpop.f32.mrb[63].mxu0  ;;  %2543 = vmatmul.mubr.f32.gmra.mrb[58].mxu1 %v1320_v24  ;;  %v1322_v47 = vadd.f32 %v1290_v50, %v3682_v39 }
 0x395   : > { %v1321_v43 = vadd.f32 %v1289_v1, %v3678_v9  ;;  %v1253_v27 = vadd.f32 %v3697_v12, %v1252_v51 }
 0x396   : > { %v1292_v5 = vmax.f32 %v1258_v11, 0.0 }
 0x397   : > { %v1291_v30 = vmax.f32 %v1253_v27, 0.0  ;;  %2545 = vmatprep.mubr.f32.mxu1 %v1321_v43 }
 0x398   : > { %2546 = vmatmul.mubr.f32.gmra.mrb[60].mxu1 %v1322_v47  ;;  %v1324_v52 = vadd.f32 %v1292_v5, %v3690_v56 }
 0x399   : > { %v1323_v26 = vadd.f32 %v1291_v30, %v3687_v46 }
 0x39b   : > { %2548 = vmatprep.mubr.f32.mxu1 %v1323_v26 }
 0x39c   : > { %2549 = vmatmul.mubr.f32.gmra.mrb[62].mxu1 %v1324_v52 }
 0x433   : > { %v2505_v9 = vpop.f32.mrb[32].mxu1 }
 0x434   : > { %v1420_v12 = vadd.f32 %v2505_v9, %v3766_v41  ;;  %v1414_v8 = vpop.f32.mrb[33].mxu1 }
 0x435   : > { %v1415_v39 = vadd.f32 %v3766_v41, %v1414_v8 }
 0x436   : > { %1574 = vst [vmem:[%s3771_s17 + $0x8] sm:$0xff] %v1420_v12 }
 0x437   : > { %1573 = vst [vmem:[%s3771_s17] sm:$0xff] %v1415_v39  ;;  %v2508_v46 = vpop.f32.mrb[34].mxu1 }
 0x438   : > { %v1430_v56 = vadd.f32 %v2508_v46, %v3766_v41  ;;  %v1424_v62 = vpop.f32.mrb[35].mxu1 }
 0x439   : > { %v1425_v28 = vadd.f32 %v3766_v41, %v1424_v62 }
 0x43a   : > { %1576 = vst [vmem:[%s3771_s17 + $0x18] sm:$0xff] %v1430_v56 }
 0x43b   : > { %1575 = vst [vmem:[%s3771_s17 + $0x10] sm:$0xff] %v1425_v28  ;;  %v2511_v29 = vpop.f32.mrb[36].mxu1 }
 0x43c   : > { %v1440_v59 = vadd.f32 %v2511_v29, %v3766_v41  ;;  %v1434_v42 = vpop.f32.mrb[37].mxu1 }
 0x43d   : > { %v1435_v37 = vadd.f32 %v3766_v41, %v1434_v42 }
 0x43e   : > { %1578 = vst [vmem:[%s3771_s17 + $0x28] sm:$0xff] %v1440_v59 }
 0x43f   : > { %1577 = vst [vmem:[%s3771_s17 + $0x20] sm:$0xff] %v1435_v37  ;;  %v2514_v45 = vpop.f32.mrb[38].mxu1 }
 0x440   : > { %v1450_v32 = vadd.f32 %v2514_v45, %v3766_v41  ;;  %v1444_v10 = vpop.f32.mrb[39].mxu1 }
 0x441   : > { %v1445_v22 = vadd.f32 %v3766_v41, %v1444_v10 }
 0x442   : > { %1580 = vst [vmem:[%s3771_s17 + $0x38] sm:$0xff] %v1450_v32 }
 0x443   : > { %1579 = vst [vmem:[%s3771_s17 + $0x30] sm:$0xff] %v1445_v22  ;;  %v2517_v33 = vpop.f32.mrb[40].mxu1 }
 0x444   : > { %v1460_v13 = vadd.f32 %v2517_v33, %v3766_v41  ;;  %v1454_v36 = vpop.f32.mrb[41].mxu1 }
 0x445   : > { %v1455_v6 = vadd.f32 %v3766_v41, %v1454_v36 }
 0x446   : > { %1582 = vst [vmem:[%s3771_s17 + $0x48] sm:$0xff] %v1460_v13 }
 0x447   : > { %1581 = vst [vmem:[%s3771_s17 + $0x40] sm:$0xff] %v1455_v6  ;;  %v2520_v49 = vpop.f32.mrb[42].mxu1 }
 0x448   : > { %v1470_v55 = vadd.f32 %v2520_v49, %v3766_v41  ;;  %v1464_v23 = vpop.f32.mrb[43].mxu1 }
 0x449   : > { %v1465_v7 = vadd.f32 %v3766_v41, %v1464_v23 }
 0x44a   : > { %1584 = vst [vmem:[%s3771_s17 + $0x58] sm:$0xff] %v1470_v55 }
 0x44b   : > { %1583 = vst [vmem:[%s3771_s17 + $0x50] sm:$0xff] %v1465_v7  ;;  %v2523_v38 = vpop.f32.mrb[44].mxu1 }
 0x44c   : > { %v1480_v58 = vadd.f32 %v2523_v38, %v3766_v41  ;;  %v1474_v40 = vpop.f32.mrb[45].mxu1 }
 0x44d   : > { %v1475_v60 = vadd.f32 %v3766_v41, %v1474_v40 }
 0x44e   : > { %1586 = vst [vmem:[%s3771_s17 + $0x68] sm:$0xff] %v1480_v58 }
 0x44f   : > { %1585 = vst [vmem:[%s3771_s17 + $0x60] sm:$0xff] %v1475_v60  ;;  %v2526_v53 = vpop.f32.mrb[46].mxu1 }
 0x450   : > { %v1490_v16 = vadd.f32 %v2526_v53, %v3766_v41  ;;  %v1484_v35 = vpop.f32.mrb[47].mxu1 }
 0x451   : > { %v1485_v18 = vadd.f32 %v3766_v41, %v1484_v35 }
 0x452   : > { %1588 = vst [vmem:[%s3771_s17 + $0x78] sm:$0xff] %v1490_v16 }
 0x453   : > { %1587 = vst [vmem:[%s3771_s17 + $0x70] sm:$0xff] %v1485_v18  ;;  %v2529_v17 = vpop.f32.mrb[48].mxu1 }
 0x454   : > { %v1500_v19 = vadd.f32 %v2529_v17, %v3766_v41  ;;  %v1494_v2 = vpop.f32.mrb[49].mxu1 }
 0x455   : > { %v1495_v3 = vadd.f32 %v3766_v41, %v1494_v2 }
 0x456   : > { %1590 = vst [vmem:[%s3771_s17 + $0x88] sm:$0xff] %v1500_v19 }
 0x457   : > { %1589 = vst [vmem:[%s3771_s17 + $0x80] sm:$0xff] %v1495_v3  ;;  %v2532_v57 = vpop.f32.mrb[50].mxu1 }
 0x458   : > { %v1510_v44 = vadd.f32 %v2532_v57, %v3766_v41  ;;  %v1504_v54 = vpop.f32.mrb[51].mxu1 }
 0x459   : > { %v1505_v0 = vadd.f32 %v3766_v41, %v1504_v54 }
 0x45a   : > { %1592 = vst [vmem:[%s3771_s17 + $0x98] sm:$0xff] %v1510_v44 }
 0x45b   : > { %1591 = vst [vmem:[%s3771_s17 + $0x90] sm:$0xff] %v1505_v0  ;;  %v2535_v20 = vpop.f32.mrb[52].mxu1 }
 0x45c   : > { %v1520_v31 = vadd.f32 %v2535_v20, %v3766_v41  ;;  %v1514_v21 = vpop.f32.mrb[53].mxu1 }
 0x45d   : > { %v1515_v34 = vadd.f32 %v3766_v41, %v1514_v21 }
 0x45e   : > { %1594 = vst [vmem:[%s3771_s17 + $0xa8] sm:$0xff] %v1520_v31 }
 0x45f   : > { %1593 = vst [vmem:[%s3771_s17 + $0xa0] sm:$0xff] %v1515_v34  ;;  %v2538_v61 = vpop.f32.mrb[54].mxu1 }
 0x460   : > { %v1530_v14 = vadd.f32 %v2538_v61, %v3766_v41  ;;  %v1524_v63 = vpop.f32.mrb[55].mxu1 }
 0x461   : > { %v1525_v15 = vadd.f32 %v3766_v41, %v1524_v63 }
 0x462   : > { %1596 = vst [vmem:[%s3771_s17 + $0xb8] sm:$0xff] %v1530_v14 }
 0x463   : > { %1595 = vst [vmem:[%s3771_s17 + $0xb0] sm:$0xff] %v1525_v15  ;;  %v2541_v48 = vpop.f32.mrb[56].mxu1 }
 0x464   : > { %v1540_v4 = vadd.f32 %v2541_v48, %v3766_v41  ;;  %v1534_v24 = vpop.f32.mrb[57].mxu1 }
 0x465   : > { %v1535_v50 = vadd.f32 %v3766_v41, %v1534_v24 }
 0x466   : > { %1598 = vst [vmem:[%s3771_s17 + $0xc8] sm:$0xff] %v1540_v4 }
 0x467   : > { %1597 = vst [vmem:[%s3771_s17 + $0xc0] sm:$0xff] %v1535_v50  ;;  %v2544_v1 = vpop.f32.mrb[58].mxu1 }
 0x468   : > { %v1550_v25 = vadd.f32 %v2544_v1, %v3766_v41  ;;  %v1544_v11 = vpop.f32.mrb[59].mxu1 }
 0x469   : > { %v1545_v51 = vadd.f32 %v3766_v41, %v1544_v11 }
 0x46a   : > { %1600 = vst [vmem:[%s3771_s17 + $0xd8] sm:$0xff] %v1550_v25 }
 0x46b   : > { %1599 = vst [vmem:[%s3771_s17 + $0xd0] sm:$0xff] %v1545_v51  ;;  %v2547_v43 = vpop.f32.mrb[60].mxu1 }
 0x46c   : > { %v1560_v27 = vadd.f32 %v2547_v43, %v3766_v41  ;;  %v1554_v47 = vpop.f32.mrb[61].mxu1 }
 0x46d   : > { %v1555_v5 = vadd.f32 %v3766_v41, %v1554_v47  ;;  %1611 = sbr.rel (!%p4013_p5) target bundleno = 1196 (0x4ac), region = 80 }
 0x46e   : > { %1602 = vst [vmem:[%s3771_s17 + $0xe8] sm:$0xff] %v1560_v27 }
 0x46f   : > { %1601 = vst [vmem:[%s3771_s17 + $0xe0] sm:$0xff] %v1555_v5  ;;  %v2550_v30 = vpop.f32.mrb[62].mxu1 }
 0x470   : > { %v1570_v26 = vadd.f32 %v2550_v30, %v3766_v41  ;;  %v1564_v52 = vpop.f32.mrb[63].mxu1 }
 0x471   : > { %v1565_v9 = vadd.f32 %v3766_v41, %v1564_v52 }
 0x472   : > { %1604 = vst [vmem:[%s3771_s17 + $0xf8] sm:$0xff] %v1570_v26 }
 0x473   : > { %1603 = vst [vmem:[%s3771_s17 + $0xf0] sm:$0xff] %v1565_v9 }
 0x474   : > { %s4028_s22 = smov (!%p1614_p8, %s1613_s22), 32 }
 0x475   : > { %s2020_s23 = sshll.u32 %s4028_s22, 7 }
 0x476   : > { %p2023_p4 = scmp.eq.s32.totalorder %s2020_s23, 0 }
 0x477   : > { %s3848_s28 = sshrl.u32 (!%p2023_p4), %s4028_s22, 5 }
 0x478   : > { %1622 = sbr.rel (%p2023_p4) target bundleno = 1196 (0x4ac), region = 84  ;;  %p2024_p1 = scmp.le.s32.totalorder (!%p2023_p4), %s3848_s28, 0 }
 0x47f   : > { %1910 = sbr.rel (%p2024_p1) target bundleno = 1175 (0x497), region = 166  ;;  %s4015_s13 = smov (!%p2024_p1), %s3842_s14 }
 0x480   : > { %s4016_s19 = smov (!%p2024_p1), %s3771_s17  ;;  %s3857_s21 = smov (!%p2024_p1), 0  }
 0x481   : > { %s3859_s24 = smov (!%p2024_p1), 0  }
 0x486 LB: >> { %v1746_v41 = vld [vmem:[%s3043_s19] sm:$0xff]  ;;  %v1748_v12 = vld [vmem:[%s3043_s19 + $0x8] sm:$0xff]  ;;  %v1750_v8 = vld [vmem:[%s3043_s19 + $0x10] sm:$0xff]  ;;  %s1810_s25 = sadd.s32 1, %s3047_s21  ;;  %s1740_s24 = sadd.s32 1, %s3051_s24   ;;  %s3051_s24 = sphi %s3859_s24, %s1740_s24   ;;  %s3047_s21 = sphi %s3857_s21, %s4019_s21   ;;  %s3043_s19 = sphi %s4016_s19, %s4018_s19   ;;  %s3039_s13 = sphi %s4015_s13, %s4017_s13  }
 0x487   : >> { %1747 = vst [vmem:[%s3039_s13] sm:$0xff] %v1746_v41  ;;  %1749 = vst [vmem:[%s3039_s13 + $0x8] sm:$0xff] %v1748_v12  ;;  %v1752_v39 = vld [vmem:[%s3043_s19 + $0x18] sm:$0xff]  ;;  %v1754_v46 = vld [vmem:[%s3043_s19 + $0x20] sm:$0xff]  ;;  %p1811_p11 = scmp.ge.s32.totalorder %s1810_s25, %s3848_s28  ;;  %p1739_p10 = scmp.ge.s32.totalorder %s1740_s24, %s3848_s28 }
 0x488   : >> { %1751 = vst [vmem:[%s3039_s13 + $0x10] sm:$0xff] %v1750_v8  ;;  %v1756_v56 = vld [vmem:[%s3043_s19 + $0x28] sm:$0xff]  ;;  %1753 = vst [vmem:[%s3039_s13 + $0x18] sm:$0xff] %v1752_v39  ;;  %v1758_v62 = vld [vmem:[%s3043_s19 + $0x30] sm:$0xff] }
 0x489   : >> { %1755 = vst [vmem:[%s3039_s13 + $0x20] sm:$0xff] %v1754_v46  ;;  %1757 = vst [vmem:[%s3039_s13 + $0x28] sm:$0xff] %v1756_v56  ;;  %v1760_v28 = vld [vmem:[%s3043_s19 + $0x38] sm:$0xff]  ;;  %v1762_v29 = vld [vmem:[%s3043_s19 + $0x40] sm:$0xff]  ;;  %s4030_s25 = smov (%p1811_p11, %s1810_s25), 0 }
 0x48a   : >> { %1759 = vst [vmem:[%s3039_s13 + $0x30] sm:$0xff] %v1758_v62  ;;  %1761 = vst [vmem:[%s3039_s13 + $0x38] sm:$0xff] %v1760_v28  ;;  %v1764_v59 = vld [vmem:[%s3043_s19 + $0x48] sm:$0xff]  ;;  %v1766_v42 = vld [vmem:[%s3043_s19 + $0x50] sm:$0xff]  ;;  %s2025_s27 = sshll.u32 %s4030_s25, 8  ;;  %s4019_s21 = smov %s4030_s25 }
 0x48b   : >> { %1763 = vst [vmem:[%s3039_s13 + $0x40] sm:$0xff] %v1762_v29  ;;  %v1768_v37 = vld [vmem:[%s3043_s19 + $0x58] sm:$0xff]  ;;  %1765 = vst [vmem:[%s3039_s13 + $0x48] sm:$0xff] %v1764_v59  ;;  %v1770_v45 = vld [vmem:[%s3043_s19 + $0x60] sm:$0xff]  ;;  %s3915_s29 = scalar_lea.vmem %s3771_s17, %s2025_s27 [#allocation10]   ;;  %s1816_s26 = scalar_lea.vmem %s3842_s14, %s2025_s27  }
 0x48c   : >> { %1767 = vst [vmem:[%s3039_s13 + $0x50] sm:$0xff] %v1766_v42  ;;  %1769 = vst [vmem:[%s3039_s13 + $0x58] sm:$0xff] %v1768_v37  ;;  %v1772_v32 = vld [vmem:[%s3043_s19 + $0x68] sm:$0xff]  ;;  %v1774_v10 = vld [vmem:[%s3043_s19 + $0x70] sm:$0xff] }
 0x48d   : >> { %1771 = vst [vmem:[%s3039_s13 + $0x60] sm:$0xff] %v1770_v45  ;;  %1773 = vst [vmem:[%s3039_s13 + $0x68] sm:$0xff] %v1772_v32  ;;  %v1776_v22 = vld [vmem:[%s3043_s19 + $0x78] sm:$0xff]  ;;  %v1778_v33 = vld [vmem:[%s3043_s19 + $0x80] sm:$0xff] }
 0x48e   : >> { %1775 = vst [vmem:[%s3039_s13 + $0x70] sm:$0xff] %v1774_v10  ;;  %v1780_v13 = vld [vmem:[%s3043_s19 + $0x88] sm:$0xff]  ;;  %1777 = vst [vmem:[%s3039_s13 + $0x78] sm:$0xff] %v1776_v22  ;;  %v1782_v36 = vld [vmem:[%s3043_s19 + $0x90] sm:$0xff] }
 0x48f   : >> { %1779 = vst [vmem:[%s3039_s13 + $0x80] sm:$0xff] %v1778_v33  ;;  %1781 = vst [vmem:[%s3039_s13 + $0x88] sm:$0xff] %v1780_v13  ;;  %v1784_v6 = vld [vmem:[%s3043_s19 + $0x98] sm:$0xff]  ;;  %v1786_v49 = vld [vmem:[%s3043_s19 + $0xa0] sm:$0xff] }
 0x490   : >> { %1783 = vst [vmem:[%s3039_s13 + $0x90] sm:$0xff] %v1782_v36  ;;  %1785 = vst [vmem:[%s3039_s13 + $0x98] sm:$0xff] %v1784_v6  ;;  %v1788_v55 = vld [vmem:[%s3043_s19 + $0xa8] sm:$0xff]  ;;  %v1790_v23 = vld [vmem:[%s3043_s19 + $0xb0] sm:$0xff]  ;;  %1742 = sbr.rel (!%p1739_p10) target bundleno = 1158 (0x486), region = 172 }
 0x491   : >> { %1787 = vst [vmem:[%s3039_s13 + $0xa0] sm:$0xff] %v1786_v49  ;;  %v1792_v7 = vld [vmem:[%s3043_s19 + $0xb8] sm:$0xff]  ;;  %1789 = vst [vmem:[%s3039_s13 + $0xa8] sm:$0xff] %v1788_v55  ;;  %v1794_v38 = vld [vmem:[%s3043_s19 + $0xc0] sm:$0xff] }
 0x492   : >> { %1791 = vst [vmem:[%s3039_s13 + $0xb0] sm:$0xff] %v1790_v23  ;;  %1793 = vst [vmem:[%s3039_s13 + $0xb8] sm:$0xff] %v1792_v7  ;;  %v1796_v58 = vld [vmem:[%s3043_s19 + $0xc8] sm:$0xff]  ;;  %v1798_v40 = vld [vmem:[%s3043_s19 + $0xd0] sm:$0xff] }
 0x493   : >> { %1795 = vst [vmem:[%s3039_s13 + $0xc0] sm:$0xff] %v1794_v38  ;;  %1797 = vst [vmem:[%s3039_s13 + $0xc8] sm:$0xff] %v1796_v58  ;;  %v1800_v60 = vld [vmem:[%s3043_s19 + $0xd8] sm:$0xff]  ;;  %v1802_v53 = vld [vmem:[%s3043_s19 + $0xe0] sm:$0xff] }
 0x494   : >> { %1799 = vst [vmem:[%s3039_s13 + $0xd0] sm:$0xff] %v1798_v40  ;;  %v1804_v16 = vld [vmem:[%s3043_s19 + $0xe8] sm:$0xff]  ;;  %1801 = vst [vmem:[%s3039_s13 + $0xd8] sm:$0xff] %v1800_v60  ;;  %v1806_v35 = vld [vmem:[%s3043_s19 + $0xf0] sm:$0xff] }
 0x495   : >> { %1803 = vst [vmem:[%s3039_s13 + $0xe0] sm:$0xff] %v1802_v53  ;;  %1805 = vst [vmem:[%s3039_s13 + $0xe8] sm:$0xff] %v1804_v16  ;;  %v1808_v18 = vld [vmem:[%s3043_s19 + $0xf8] sm:$0xff]  ;;  %s4018_s19 = smov %s3915_s29 }
 0x496   : >> { %1807 = vst [vmem:[%s3039_s13 + $0xf0] sm:$0xff] %v1806_v35  ;;  %1809 = vst [vmem:[%s3039_s13 + $0xf8] sm:$0xff] %v1808_v18  ;;  %s4017_s13 = smov %s1816_s26 }
 0x497 PF: > { %s3956_s12 = sand.u32 31, %s4028_s22   ;;  %s2037_s8 = sshll.u32 %s3848_s28, 8 }
 0x498   : > { %s1821_s9 = scalar_lea.vmem %s3771_s17, %s2037_s8 [#allocation10]   ;;  %s1823_s20 = scalar_lea.vmem %s3842_s14, %s2037_s8  }
 0x499   : > { %p2030_p3 = scmp.le.s32.totalorder %s3956_s12, 0 }
 0x49a   : > { %s3053_s16 = smov (!%p2030_p3), %s1823_s20   ;;  %s3057_s30 = smov (!%p2030_p3), %s1821_s9  }
 0x49b   : > { %1924 = sbr.rel (%p2030_p3) target bundleno = 1196 (0x4ac), region = 177  ;;  %s3061_s18 = smov (!%p2030_p3), 0  }
 0x49c   : > { %s3065_s15 = smov (!%p2030_p3), 0  }
 0x4a2 LB: >> { %v1833_v17 = vld [vmem:[%s3059_s30] sm:$0xff]  ;;  %s1835_s22 = sadd.s32 1, %s3063_s18  ;;  %s1827_s15 = sadd.s32 1, %s3067_s15   ;;  %s3067_s15 = sphi %s3065_s15, %s1827_s15   ;;  %s3063_s18 = sphi %s3061_s18, %s3062_s18   ;;  %s3059_s30 = sphi %s3057_s30, %s1840_s30   ;;  %s3055_s16 = sphi %s3053_s16, %s1841_s16  }
 0x4a3   : >> { %1834 = vst [vmem:[%s3055_s16] sm:$0xff] %v1833_v17  ;;  %p1836_p7 = scmp.ge.s32.totalorder %s1835_s22, %s3956_s12  ;;  %p1826_p6 = scmp.ge.s32.totalorder %s1827_s15, %s3956_s12 }
 0x4a5   : >> { %s4032_s22 = smov (%p1836_p7, %s1835_s22), 0  ;;  %1829 = sbr.rel (!%p1826_p6) target bundleno = 1186 (0x4a2), region = 183 }
 0x4a6   : >> { %s2031_s17 = sshll.u32 %s4032_s22, 3  ;;  %s3062_s18 = smov %s4032_s22  }
 0x4a7   : >> { %s1840_s30 = scalar_lea.vmem %s1821_s9, %s2031_s17 [#allocation10]   ;;  %s1841_s16 = scalar_lea.vmem %s1823_s20, %s2031_s17  }
 0x4ac PF: > { %s4020_s12 = sld [smem:[#allocation14_spill]]  ;;  %s4021_s14 = sld [smem:[#allocation15_spill]] }
 0x4ad   : > { %s4022_s30 = smov %s3027_s10  ;;  %s4023_s10 = smov %s3031_s11 }
 0x4b2   : > { %p21_p9 = scmp.ge.s32.totalorder %s4020_s12, 4   ;;  %s4024_s11 = smov %s4021_s14 }
 0x4b4   :  { %23 = sbr.rel (!%p21_p9) target bundleno = 8 (0x8), region = 194 }
 0x4bb   :  { %1857 = vsyncpa [#allocation3], 1 }
 0x4bc   :  { %1859 = vsyncpa [#allocation3 + $0x1], 1 }
 0x4bd   :  { %1860 = vsyncpa [#allocation5], 1 }
 0x4be   :  { %1861 = vsyncpa [#allocation8], 1 }

// kernel: _transform_forward_jit.1
= control target key start
LH: loop header
LB: loop body
LE: loop exit
PB: predicated region body
PF: predicated region fallthrough
CT: control target
= control target key end

     0   :  { %s3977_s0 = inlined_call_operand.hbm [shape: f32[500,128], index: 0, kind: input, shape index: {}]   ;;  %s3978_s1 = inlined_call_operand.hbm [shape: f32[128,128], index: 1, kind: input, shape index: {}]   ;;  %s3979_s2 = inlined_call_operand.vmem [shape: f32[1,128], index: 2, kind: input, shape index: {}]   ;;  %s3980_s3 = inlined_call_operand.hbm [shape: f32[128,128], index: 3, kind: input, shape index: {}]   ;;  %s3981_s4 = inlined_call_operand.vmem [shape: f32[1,128], index: 4, kind: input, shape index: {}]   ;;  %s3982_s5 = inlined_call_operand.hbm [shape: f32[128,128], index: 5, kind: input, shape index: {}]   ;;  %s3983_s6 = inlined_call_operand.vmem [shape: f32[1,128], index: 6, kind: input, shape index: {}]   ;;  %s3984_s7 = inlined_call_operand.hbm [shape: f32[128,128], index: 7, kind: input, shape index: {}]   ;;  %s3985_s8 = inlined_call_operand.vmem [shape: f32[1,128], index: 8, kind: input, shape index: {}]   ;;  %s3986_s9 = inlined_call_operand.vmem [shape: f32[500,128], index: 9, kind: output, shape index: {}]  }
   0x1   :  { %3993 = sst [smem:[#allocation17_spill]] %s3985_s8 }
   0x2   :  { %3994 = sst [smem:[#allocation18_spill]] %s3986_s9 }
   0x3   :  { %14 = vsyncpa [#allocation3], 0 }
   0x4   :  { %16 = vsyncpa [#allocation3 + $0x1], 0 }
   0x5   :  { %17 = vsyncpa [#allocation5], 0 }
   0x6   :  { %18 = vsyncpa [#allocation8], 0  ;;  %s3128_s30 = smov 0   ;;  %s3130_s10 = smov 0  }
   0x7   :  { %s3132_s11 = smov 0   ;;  %s3134_s12 = smov 0  }
   0x8 LB: > { %s3147_s13 = sadd.s32 4294967295, %s3035_s12   ;;  %s3150_s14 = sadd.s32 1, %s3035_s12   ;;  %s3035_s12 = sphi %s3134_s12, %s4020_s12   ;;  %s3031_s11 = sphi %s3132_s11, %s4024_s11   ;;  %s3027_s10 = sphi %s3130_s10, %s4023_s10   ;;  %s3023_s30 = sphi %s3128_s30, %s4022_s30  }
   0x9   : > { %3995 = sst [smem:[#allocation14_spill]] %s3150_s14  ;;  %s28_s15 = ssub.s32 %s3035_s12, %s3150_s14 }
   0xa   : > { %s31_s16 = sadd.s32 1, %s3031_s11  ;;  %p29_p0 = scmp.eq.s32.totalorder %s28_s15, 0 }
   0xb   : > { %p38_p1 = scmp.ne.s32.totalorder %s3031_s11, %s3027_s10  ;;  %p39_p2 = scmp.eq.s32.totalorder %s3035_s12, 0 }
   0xc   : > { %p44_p3 = scmp.ne.s32.totalorder %s3027_s10, %s3023_s30  ;;  %p3987_p5 = scmp.eq.s32.totalorder %s3147_s13, 0 }
   0xd   : > { %s3160_s17 = scalar_select %p29_p0, %s3031_s11, %s31_s16  }
   0xe   : > { %p3162_p4 = por %p39_p2, %p38_p1  ;;  %p236_p6 = scmp.eq.s32.totalorder %s3147_s13, 1 }
   0xf   : > { %3996 = sst [smem:[#allocation15_spill]] %s3160_s17  ;;  %p1994_p7 = scmp.ge.s32.totalorder %s3035_s12, 1 }
  0x10   : > { %s3997_s18 = scalar_select %p3162_p4, 1, 0 }
  0x11   : > { %p3171_p8 = por %p3987_p5, %p44_p3  ;;  %p249_p9 = scmp.lt.s32.totalorder %s3035_s12, 3 }
  0x12   : > { %p3176_p10 = por %p236_p6, %p38_p1  ;;  %s3069_s22 = smov [#allocation4]  }
  0x13   : > { %s3998_s19 = scalar_select %p3171_p8, 1, 0 }
  0x14   : > { %s3999_s20 = scalar_select %p3176_p10, 1, 0 }
  0x15   : > { %p3180_p11 = pnand %p1994_p7, %p249_p9  ;;  %s261_s23 = sshll.u32 %s3069_s22, 4  ;;  %s3186_s23 = int_to_ptr.vmem [resolvable:$true] %s261_s23 }
  0x16   : > { %4000 = sst [smem:[#allocation16_spill]] %s3999_s20  ;;  %s3070_s25 = smov [#allocation7]  }
  0x17   : > { %s4001_s21 = scalar_select %p3180_p11, 1, 0 }
  0x18   : > { %p2696_p12 = pneg %p3180_p11  ;;  %s293_s26 = sshll.u32 %s3070_s25, 4  ;;  %s3194_s26 = int_to_ptr.vmem [resolvable:$true] %s293_s26 }
  0x19   : > { %s3071_s27 = smov [#allocation6]   ;;  %s2821_s15 = scalar_lea.hbm %s3978_s1, 2048 }
  0x1a   : > { %p3190_p13 = pnand %p2696_p12, %p3987_p5  ;;  %s3196_s28 = sshll.u32 %s3071_s27, 4  ;;  %s278_s28 = int_to_ptr.vmem [resolvable:$true] %s3196_s28 }
  0x1b   : > { %p2822_p0 = scmp.ne.s32.totalorder %s3978_s1, %s2821_s15  ;;  %p2828_p6 = scmp.lt.u32.totalorder %s2821_s15, %s3978_s1 }
  0x1c   : > { %p3206_p1 = pneg %p3190_p13 }
  0x1e   : > { %p2824_p2 = pnand %p3206_p1, %p2822_p0 }
  0x20   : > { %p2825_p3 = pneg %p2824_p2 }
  0x22   : > { %p2830_p7 = pnand %p2828_p6, %p2825_p3 }
  0x24   : > { %2833 = shalt.err (!%p2830_p7)
}
  0x25   : > { %s2834_s29 = scalar_lea.vmem %s3186_s23, 2048  ;;  %p2842_p10 = scmp.lt.s32.totalorder %s3186_s23, %s3186_s23 }
  0x26   : > { %p2835_p9 = scmp.ne.s32.totalorder %s3186_s23, %s2834_s29  ;;  %p2843_p8 = scmp.lt.s32.totalorder %s2834_s29, %s2834_s29 }
  0x28   : > { %p2837_p12 = pnand %p2835_p9, %p3206_p1  ;;  %p2844_p0 = por %p2843_p8, %p2842_p10 }
  0x2a   : > { %p2838_p5 = pneg %p2837_p12 }
  0x2c   : > { %p2845_p2 = pnand %p2844_p0, %p2838_p5 }
  0x2e   : > { %2848 = shalt.err (!%p2845_p2)
}
  0x2f   : > { %s3072_s30 = smov 128   ;;  %s3073_s15 = smov 8  }
  0x30   : > { %2699 = dma.hbm_to_vmem [thread:$0]  (!%p3190_p13), %s3978_s1, 2048, %s3186_s23, [#allocation5], %s3072_s30, %s3072_s30, %s3073_s15  }
  0x31   : > { %s2849_s29 = scalar_lea.hbm %s3982_s5, 2048 }
  0x32   : > { %p2850_p5 = scmp.ne.s32.totalorder %s3982_s5, %s2849_s29  ;;  %p2856_p3 = scmp.lt.u32.totalorder %s2849_s29, %s3982_s5 }
  0x34   : > { %p2852_p8 = pnand %p2850_p5, %p3206_p1 }
  0x36   : > { %p2853_p10 = pneg %p2852_p8 }
  0x38   : > { %p2858_p6 = pnand %p2856_p3, %p2853_p10 }
  0x3a   : > { %2861 = shalt.err (!%p2858_p6)
}
  0x3b   : > { %s2862_s23 = scalar_lea.vmem %s3194_s26, 2048  ;;  %p2870_p0 = scmp.lt.s32.totalorder %s3194_s26, %s3194_s26 }
  0x3c   : > { %p2863_p7 = scmp.ne.s32.totalorder %s3194_s26, %s2862_s23  ;;  %p2871_p2 = scmp.lt.s32.totalorder %s2862_s23, %s2862_s23 }
  0x3e   : > { %p2865_p9 = pnand %p2863_p7, %p3206_p1  ;;  %p2872_p5 = por %p2871_p2, %p2870_p0 }
  0x40   : > { %p2866_p12 = pneg %p2865_p9 }
  0x42   : > { %p2873_p8 = pnand %p2872_p5, %p2866_p12 }
  0x44   : > { %2876 = shalt.err (!%p2873_p8)
}
  0x45   : > { %2705 = dma.hbm_to_vmem [thread:$0]  (!%p3190_p13), %s3982_s5, 2048, %s3194_s26, [#allocation8], %s3072_s30, %s3072_s30, %s3073_s15  }
  0x46   : > { %s2877_s16 = scalar_lea.hbm %s3980_s3, 2048 }
  0x47   : > { %p2878_p10 = scmp.ne.s32.totalorder %s3980_s3, %s2877_s16  ;;  %p2884_p7 = scmp.lt.u32.totalorder %s2877_s16, %s3980_s3 }
  0x49   : > { %p2880_p3 = pnand %p2878_p10, %p3206_p1 }
  0x4b   : > { %p2881_p6 = pneg %p2880_p3 }
  0x4d   : > { %p2886_p9 = pnand %p2884_p7, %p2881_p6 }
  0x4f   : > { %2889 = shalt.err (!%p2886_p9)
}
  0x50   : > { %s2890_s23 = scalar_lea.vmem %s278_s28, 2048  ;;  %p2898_p5 = scmp.lt.s32.totalorder %s278_s28, %s278_s28 }
  0x51   : > { %p2891_p12 = scmp.ne.s32.totalorder %s278_s28, %s2890_s23  ;;  %p2899_p8 = scmp.lt.s32.totalorder %s2890_s23, %s2890_s23 }
  0x53   : > { %p2893_p0 = pnand %p2891_p12, %p3206_p1  ;;  %p2900_p11 = por %p2899_p8, %p2898_p5 }
  0x55   : > { %p2894_p2 = pneg %p2893_p0 }
  0x57   : > { %p2901_p4 = pnand %p2900_p11, %p2894_p2 }
  0x59   : > { %2904 = shalt.err (!%p2901_p4)
}
  0x5a   : > { %2702 = dma.hbm_to_vmem [thread:$0]  (!%p3190_p13), %s3980_s3, 2048, %s278_s28, [#allocation5], %s3072_s30, %s3072_s30, %s3073_s15  }
  0x5b   : > { %s3074_s9 = smov [#allocation9]   ;;  %s2905_s22 = scalar_lea.hbm %s3984_s7, 2048 }
  0x5c   : > { %s309_s14 = sshll.u32 %s3074_s9, 4  ;;  %p2906_p4 = scmp.ne.s32.totalorder %s3984_s7, %s2905_s22  ;;  %s310_s14 = int_to_ptr.vmem [resolvable:$true] %s309_s14 }
  0x5d   : > { %p2912_p3 = scmp.lt.u32.totalorder %s2905_s22, %s3984_s7 }
  0x5e   : > { %p2908_p11 = pnand %p2906_p4, %p3206_p1 }
  0x60   : > { %p2909_p10 = pneg %p2908_p11 }
  0x62   : > { %p2914_p6 = pnand %p2912_p3, %p2909_p10 }
  0x64   : > { %2917 = shalt.err (!%p2914_p6)
}
  0x65   : > { %s2918_s28 = scalar_lea.vmem %s310_s14, 2048  ;;  %p2926_p0 = scmp.lt.s32.totalorder %s310_s14, %s310_s14 }
  0x66   : > { %p2919_p7 = scmp.ne.s32.totalorder %s310_s14, %s2918_s28  ;;  %p2927_p2 = scmp.lt.s32.totalorder %s2918_s28, %s2918_s28 }
  0x68   : > { %p2921_p9 = pnand %p2919_p7, %p3206_p1  ;;  %p2928_p5 = por %p2927_p2, %p2926_p0 }
  0x6a   : > { %p2922_p12 = pneg %p2921_p9 }
  0x6c   : > { %p2929_p8 = pnand %p2928_p5, %p2922_p12 }
  0x6e   : > { %2932 = shalt.err (!%p2929_p8)
}
  0x6f   : > { %2708 = dma.hbm_to_vmem [thread:$0]  (!%p3190_p13), %s3984_s7, 2048, %s310_s14, [#allocation8], %s3072_s30, %s3072_s30, %s3073_s15  }
  0x70   : > { %p1999_p4 = scmp.ge.s32.totalorder %s3035_s12, 2 }
  0x71   : > { %p4004_p1 = scmp.ne.s32.totalorder (!%p1999_p4), %s3997_s18, 0 }
  0x72   : > { %322 = sbr.rel (%p1999_p4) target bundleno = 156 (0x9c), region = 48 }
  0x79   : > { %325 = sbr.rel (!%p4004_p1) target bundleno = 156 (0x9c), region = 52  ;;  %s326_s17 = sand.u32 (%p4004_p1), 1, %s3031_s11  }
  0x7a   : > { %s2001_s9 = sshll.u32 (%p4004_p1), %s3035_s12, 5  ;;  %s2000_s20 = sshll.u32 (%p4004_p1), %s326_s17, 8 }
  0x7b   : > { %s332_s16 = ssub.s32 (%p4004_p1), 63, %s2001_s9  ;;  %s3307_s25 = scalar_lea.sflag (%p4004_p1), [#allocation3], %s326_s17 }
  0x7c   : > { %p333_p11 = scmp.lt.s32.totalorder (%p4004_p1), %s332_s16, 32  ;;  %s330_s30 = scalar_lea.vmem (%p4004_p1), [#allocation2], %s2000_s20 }
  0x80   : > { %s4026_s16 = smov (!%p333_p11, %s332_s16), 32 }
  0x81   : > { %s3304_s24 = sshll.u32 %s4026_s16, 7 }
  0x82   : > { %s337_s22 = ssub.s32 4096, %s3304_s24 }
  0x83   : > { %338 = vsyncadd %s3307_s25, %s337_s22  ;;  %p2003_p13 = scmp.ne.s32.totalorder %s3304_s24, 0  ;;  %s2035_s18 = sshll.u32 %s3035_s12, 12 }
  0x84   : > { %s3315_s27 = scalar_lea.hbm %s3977_s0, %s2035_s18  ;;  %s343_s29 = sshll.u32 %s330_s30, 4  ;;  %s3317_s29 = int_to_ptr.vmem [resolvable:$true] %s343_s29 }
  0x85   : > { %s2933_s23 = scalar_lea.hbm %s3315_s27, %s3304_s24  ;;  %s2937_s12 = scalar_lea.hbm %s3977_s0, 8064 }
  0x86   : > { %p2934_p10 = scmp.ne.s32.totalorder %s3315_s27, %s2933_s23  ;;  %p2938_p7 = scmp.lt.u32.totalorder %s3315_s27, %s3977_s0 }
  0x87   : > { %p2939_p9 = scmp.lt.u32.totalorder %s2937_s12, %s2933_s23  ;;  %p2941_p0 = scmp.lt.u32.totalorder %s2933_s23, %s3315_s27 }
  0x88   : > { %p2935_p3 = pnand %p2934_p10, %p2003_p13 }
  0x89   : > { %p2940_p12 = por %p2939_p9, %p2938_p7 }
  0x8a   : > { %p2936_p6 = pneg %p2935_p3 }
  0x8b   : > { %p2942_p2 = por %p2941_p0, %p2940_p12 }
  0x8d   : > { %p2943_p5 = pnand %p2942_p2, %p2936_p6 }
  0x8f   : > { %2946 = shalt.err (!%p2943_p5)
}
  0x90   : > { %s2947_s9 = scalar_lea.vmem %s3317_s29, %s3304_s24  ;;  %s3075_s20 = smov [#allocation2]  }
  0x91   : > { %p2948_p8 = scmp.ne.s32.totalorder %s3317_s29, %s2947_s9  ;;  %s2951_s16 = sshll.u32 %s3075_s20, 4  ;;  %s2952_s16 = int_to_ptr.vmem [resolvable:$false] %s2951_s16 }
  0x92   : > { %s2953_s22 = scalar_lea.vmem %s2952_s16, 8192  ;;  %p2954_p11 = scmp.lt.s32.totalorder %s3317_s29, %s2952_s16 }
  0x93   : > { %p2949_p4 = pnand %p2948_p8, %p2003_p13  ;;  %p2955_p10 = scmp.lt.s32.totalorder %s2953_s22, %s2947_s9 }
  0x95   : > { %p2950_p1 = pneg %p2949_p4  ;;  %p2956_p3 = por %p2955_p10, %p2954_p11 }
  0x97   : > { %p2957_p7 = pnand %p2956_p3, %p2950_p1 }
  0x99   : > { %2960 = shalt.err (!%p2957_p7)
}
  0x9a   : > { %s3076_s30 = smov 128   ;;  %s3077_s18 = smov 8  }
  0x9b   : > { %349 = dma.hbm_to_vmem [thread:$0]  (%p2003_p13), %s3315_s27, %s3304_s24, %s3317_s29, %s3307_s25, %s3076_s30, %s3076_s30, %s3077_s18  }
  0x9c PF: > { %p4005_p6 = scmp.ne.s32.totalorder %s4001_s21, 0 }
  0x9d   : > { %s357_s15 = sand.u32 (!%p4005_p6), 1, %s3027_s10   ;;  %p4006_p9 = scmp.ne.s32.totalorder (!%p4005_p6), %s3998_s19, 0 }
  0x9e   : > { %355 = sbr.rel (%p4005_p6) target bundleno = 1196 (0x4ac), region = 56  ;;  %s3347_s14 = sshll.u32 (!%p4005_p6), %s357_s15, 8 }
  0x9f   : > { %s358_s23 = scalar_lea.sflag (!%p4005_p6), [#allocation3], %s357_s15  ;;  %s3350_s28 = scalar_lea.vmem (!%p4005_p6), [#allocation2], %s3347_s14 }
  0xa5   : > { %3010 = dma.done.wait (%p4006_p9), %s358_s23, 4096  }
  0xa6   : > { %3012 = vsyncadd (%p4006_p9), %s358_s23, 4294963200  ;;  %p4007_p13 = scmp.eq.s32.totalorder %s3147_s13, 0 }
  0xa8   : > { %3014 = dma.done.wait (%p4007_p13), [#allocation5], 4096   ;;  %p4008_p12 = pmov %p4007_p13 }
  0xaa   : > { %3016 = vsyncadd (%p4008_p12), [#allocation5], 4294963200  ;;  %p4009_p0 = pmov %p4008_p12 }
  0xac   : > { %3018 = dma.done.wait (%p4009_p0), [#allocation8], 4096   ;;  %p4010_p2 = pmov %p4009_p0 }
  0xad   : > { %v453_v0 = vld [vmem:[#allocation4] sm:$0xff]  ;;  %v454_v1 = vld [vmem:[#allocation4 + $0x8] sm:$0xff]  ;;  %v455_v2 = vld [vmem:[#allocation4 + $0x10] sm:$0xff]  ;;  %s4011_s8 = sld [smem:[#allocation17_spill]]  ;;  %s3771_s17 = scalar_lea.vmem [#allocation10], %s3347_s14  }
  0xae   : > { %3020 = vsyncadd (%p4010_p2), [#allocation8], 4294963200  ;;  %v2551_v3 = vpack.c.bf16 %v454_v1, %v453_v0  ;;  %v456_v4 = vld [vmem:[#allocation4 + $0x18] sm:$0xff]  ;;  %v457_v6 = vld [vmem:[#allocation4 + $0x20] sm:$0xff]  ;;  %s4012_s9 = sld [smem:[#allocation16_spill]] }
  0xaf   : > { %v2555_v5 = vpack.c.bf16 %v456_v4, %v455_v2  ;;  %v458_v7 = vld [vmem:[#allocation4 + $0x28] sm:$0xff]  ;;  %v421_v9 = vld [vmem:[%s3350_s28] sm:$0xff]  ;;  %v459_v10 = vld [vmem:[#allocation4 + $0x30] sm:$0xff] }
  0xb0   : > { %2552 = vmatprep.subr.bf16.mxu0 %v2551_v3  ;;  %v2559_v8 = vpack.c.bf16 %v458_v7, %v457_v6  ;;  %v460_v11 = vld [vmem:[#allocation4 + $0x38] sm:$0xff]  ;;  %2263 = vmatprep.mubr.f32.mxu0 %v421_v9  ;;  %v461_v13 = vld [vmem:[#allocation4 + $0x40] sm:$0xff]  ;;  %v462_v14 = vld [vmem:[#allocation4 + $0x48] sm:$0xff] }
  0xb1   : > { %2554 = vmatpush3.bf16.msra.mxu0 %v2551_v3  ;;  %v2563_v12 = vpack.c.bf16 %v460_v11, %v459_v10  ;;  %v2567_v15 = vpack.c.bf16 %v462_v14, %v461_v13  ;;  %v463_v16 = vld [vmem:[#allocation4 + $0x50] sm:$0xff]  ;;  %v464_v17 = vld [vmem:[#allocation4 + $0x58] sm:$0xff]  ;;  %v701_v18 = vld [vmem:[#allocation6] sm:$0xff] }
  0xb2   : > { %2556 = vmatprep.subr.bf16.mxu0 %v2555_v5  ;;  %v702_v19 = vld [vmem:[#allocation6 + $0x8] sm:$0xff]  ;;  %v703_v20 = vld [vmem:[#allocation6 + $0x10] sm:$0xff]  ;;  %v2571_v21 = vpack.c.bf16 %v464_v17, %v463_v16  ;;  %v465_v22 = vld [vmem:[#allocation4 + $0x60] sm:$0xff] }
  0xb3   : > { %v2583_v23 = vpack.c.bf16 %v702_v19, %v701_v18  ;;  %v704_v24 = vld [vmem:[#allocation6 + $0x18] sm:$0xff]  ;;  %v466_v25 = vld [vmem:[#allocation4 + $0x68] sm:$0xff]  ;;  %v705_v27 = vld [vmem:[#allocation6 + $0x20] sm:$0xff] }
  0xb4   : > { %v2587_v26 = vpack.c.bf16 %v704_v24, %v703_v20  ;;  %v706_v28 = vld [vmem:[#allocation6 + $0x28] sm:$0xff]  ;;  %v2575_v29 = vpack.c.bf16 %v466_v25, %v465_v22  ;;  %v467_v30 = vld [vmem:[#allocation4 + $0x70] sm:$0xff]  ;;  %v468_v32 = vld [vmem:[#allocation4 + $0x78] sm:$0xff]  ;;  %p4013_p5 = scmp.ne.s32.totalorder %s4012_s9, 0 }
  0xb5   : > { %2558 = vmatpush3.bf16.msra.mxu0 %v2555_v5  ;;  %2584 = vmatprep.subr.bf16.mxu1 %v2583_v23  ;;  %v2591_v31 = vpack.c.bf16 %v706_v28, %v705_v27  ;;  %v707_v33 = vld [vmem:[#allocation6 + $0x30] sm:$0xff]  ;;  %v708_v34 = vld [vmem:[#allocation6 + $0x38] sm:$0xff]  ;;  %v2579_v35 = vpack.c.bf16 %v468_v32, %v467_v30  ;;  %v709_v37 = vld [vmem:[#allocation6 + $0x40] sm:$0xff]  ;;  %s2019_s20 = sshll.u32 (%p4013_p5), %s3147_s13, 5  ;;  %s2036_s16 = sshll.u32 (%p4013_p5), %s3147_s13, 8 }
  0xb6   : > { %2560 = vmatprep.subr.bf16.mxu0 %v2559_v8  ;;  %2586 = vmatpush3.bf16.msra.mxu1 %v2583_v23  ;;  %v2595_v36 = vpack.c.bf16 %v708_v34, %v707_v33  ;;  %v710_v38 = vld [vmem:[#allocation6 + $0x48] sm:$0xff]  ;;  %v711_v40 = vld [vmem:[#allocation6 + $0x50] sm:$0xff]  ;;  %v712_v41 = vld [vmem:[#allocation6 + $0x58] sm:$0xff]  ;;  %s1613_s22 = ssub.s32 (%p4013_p5), 63, %s2019_s20  ;;  %s4014_s15 = sld [smem:[#allocation18_spill]] (%p4013_p5) }
  0xb7   : > { %2588 = vmatprep.subr.bf16.mxu1 %v2587_v26  ;;  %v2599_v39 = vpack.c.bf16 %v710_v38, %v709_v37  ;;  %v422_v42 = vld [vmem:[%s3350_s28 + $0x8] sm:$0xff]  ;;  %v423_v43 = vld [vmem:[%s3350_s28 + $0x10] sm:$0xff]  ;;  %v2603_v44 = vpack.c.bf16 %v712_v41, %v711_v40  ;;  %v713_v45 = vld [vmem:[#allocation6 + $0x60] sm:$0xff]  ;;  %p1614_p8 = scmp.lt.s32.totalorder (%p4013_p5), %s1613_s22, 32 }
  0xb8   : > { %v714_v46 = vld [vmem:[#allocation6 + $0x68] sm:$0xff]  ;;  %v424_v47 = vld [vmem:[%s3350_s28 + $0x18] sm:$0xff]  ;;  %v425_v48 = vld [vmem:[%s3350_s28 + $0x20] sm:$0xff] }
  0xb9   : > { %2562 = vmatpush3.bf16.msra.mxu0 %v2559_v8  ;;  %v2607_v49 = vpack.c.bf16 %v714_v46, %v713_v45  ;;  %v426_v50 = vld [vmem:[%s3350_s28 + $0x28] sm:$0xff]  ;;  %v427_v51 = vld [vmem:[%s3350_s28 + $0x30] sm:$0xff]  ;;  %v428_v52 = vld [vmem:[%s3350_s28 + $0x38] sm:$0xff] }
  0xba   : > { %2564 = vmatprep.subr.bf16.mxu0 %v2563_v12  ;;  %2590 = vmatpush3.bf16.msra.mxu1 %v2587_v26  ;;  %v429_v53 = vld [vmem:[%s3350_s28 + $0x40] sm:$0xff]  ;;  %v430_v54 = vld [vmem:[%s3350_s28 + $0x48] sm:$0xff]  ;;  %v431_v55 = vld [vmem:[%s3350_s28 + $0x50] sm:$0xff] }
  0xbb   : > { %2592 = vmatprep.subr.bf16.mxu1 %v2591_v31  ;;  %v432_v56 = vld [vmem:[%s3350_s28 + $0x58] sm:$0xff]  ;;  %v433_v57 = vld [vmem:[%s3350_s28 + $0x60] sm:$0xff]  ;;  %v434_v58 = vld [vmem:[%s3350_s28 + $0x68] sm:$0xff] }
  0xbc   : > { %v435_v59 = vld [vmem:[%s3350_s28 + $0x70] sm:$0xff]  ;;  %v436_v60 = vld [vmem:[%s3350_s28 + $0x78] sm:$0xff]  ;;  %v437_v61 = vld [vmem:[%s3350_s28 + $0x80] sm:$0xff]  ;;  %s3842_s14 = scalar_lea.vmem (%p4013_p5), %s4014_s15, %s2036_s16  }
  0xbd   : > { %2566 = vmatpush3.bf16.msra.mxu0 %v2563_v12  ;;  %v438_v62 = vld [vmem:[%s3350_s28 + $0x88] sm:$0xff]  ;;  %v439_v63 = vld [vmem:[%s3350_s28 + $0x90] sm:$0xff]  ;;  %v440_v0 = vld [vmem:[%s3350_s28 + $0x98] sm:$0xff] }
  0xbe   : > { %2568 = vmatprep.subr.bf16.mxu0 %v2567_v15  ;;  %2594 = vmatpush3.bf16.msra.mxu1 %v2591_v31  ;;  %v441_v1 = vld [vmem:[%s3350_s28 + $0xa0] sm:$0xff]  ;;  %v442_v2 = vld [vmem:[%s3350_s28 + $0xa8] sm:$0xff]  ;;  %v443_v3 = vld [vmem:[%s3350_s28 + $0xb0] sm:$0xff] }
  0xbf   : > { %2596 = vmatprep.subr.bf16.mxu1 %v2595_v36  ;;  %v444_v4 = vld [vmem:[%s3350_s28 + $0xb8] sm:$0xff]  ;;  %v445_v5 = vld [vmem:[%s3350_s28 + $0xc0] sm:$0xff]  ;;  %v446_v6 = vld [vmem:[%s3350_s28 + $0xc8] sm:$0xff] }
  0xc0   : > { %v447_v7 = vld [vmem:[%s3350_s28 + $0xd0] sm:$0xff]  ;;  %v448_v8 = vld [vmem:[%s3350_s28 + $0xd8] sm:$0xff]  ;;  %v449_v9 = vld [vmem:[%s3350_s28 + $0xe0] sm:$0xff] }
  0xc1   : > { %2570 = vmatpush3.bf16.msra.mxu0 %v2567_v15  ;;  %v450_v10 = vld [vmem:[%s3350_s28 + $0xe8] sm:$0xff]  ;;  %v451_v11 = vld [vmem:[%s3350_s28 + $0xf0] sm:$0xff]  ;;  %v452_v12 = vld [vmem:[%s3350_s28 + $0xf8] sm:$0xff] }
  0xc2   : > { %2572 = vmatprep.subr.bf16.mxu0 %v2571_v21  ;;  %2598 = vmatpush3.bf16.msra.mxu1 %v2595_v36  ;;  %v715_v13 = vld [vmem:[#allocation6 + $0x70] sm:$0xff]  ;;  %v716_v14 = vld [vmem:[#allocation6 + $0x78] sm:$0xff]  ;;  %v1013_v16 = vld [vmem:[#allocation7] sm:$0xff] }
  0xc3   : > { %2600 = vmatprep.subr.bf16.mxu1 %v2599_v39  ;;  %v2611_v15 = vpack.c.bf16 %v716_v14, %v715_v13  ;;  %v1014_v17 = vld [vmem:[#allocation7 + $0x8] sm:$0xff]  ;;  %v1015_v18 = vld [vmem:[#allocation7 + $0x10] sm:$0xff]  ;;  %v1016_v20 = vld [vmem:[#allocation7 + $0x18] sm:$0xff] }
  0xc4   : > { %v2615_v19 = vpack.c.bf16 %v1014_v17, %v1013_v16  ;;  %v1017_v22 = vld [vmem:[#allocation7 + $0x20] sm:$0xff]  ;;  %v1018_v23 = vld [vmem:[#allocation7 + $0x28] sm:$0xff]  ;;  %v1019_v25 = vld [vmem:[#allocation7 + $0x30] sm:$0xff] }
  0xc5   : > { %2574 = vmatpush3.bf16.msra.mxu0 %v2571_v21  ;;  %v2619_v21 = vpack.c.bf16 %v1016_v20, %v1015_v18  ;;  %v2623_v24 = vpack.c.bf16 %v1018_v23, %v1017_v22  ;;  %v1020_v26 = vld [vmem:[#allocation7 + $0x38] sm:$0xff]  ;;  %v1021_v28 = vld [vmem:[#allocation7 + $0x40] sm:$0xff]  ;;  %v1023_v31 = vld [vmem:[#allocation7 + $0x50] sm:$0xff] }
  0xc6   : > { %2576 = vmatprep.subr.bf16.mxu0 %v2575_v29  ;;  %2602 = vmatpush3.bf16.msra.mxu1 %v2599_v39  ;;  %v2627_v27 = vpack.c.bf16 %v1020_v26, %v1019_v25  ;;  %v1024_v32 = vld [vmem:[#allocation7 + $0x58] sm:$0xff]  ;;  %v1025_v34 = vld [vmem:[#allocation7 + $0x60] sm:$0xff] }
  0xc7   : > { %2604 = vmatprep.subr.bf16.mxu1 %v2603_v44  ;;  %v2635_v33 = vpack.c.bf16 %v1024_v32, %v1023_v31  ;;  %v3399_v37 = vld [vmem:[%s3979_s2] ss:$0 sm:$0xff] }
  0xc9   : > { %2578 = vmatpush3.bf16.msra.mxu0 %v2575_v29  ;;  %v1022_v29 = vld [vmem:[#allocation7 + $0x48] sm:$0xff] }
  0xca   : > { %2580 = vmatprep.subr.bf16.mxu0 %v2579_v35  ;;  %2606 = vmatpush3.bf16.msra.mxu1 %v2603_v44  ;;  %v2631_v30 = vpack.c.bf16 %v1022_v29, %v1021_v28 }
  0xcb   : > { %2608 = vmatprep.subr.bf16.mxu1 %v2607_v49 }
  0xcd   : > { %2582 = vmatpush3.bf16.msra.mxu0 %v2579_v35  ;;  %v1026_v35 = vld [vmem:[#allocation7 + $0x68] sm:$0xff] }
  0xce   : > { %2610 = vmatpush3.bf16.msra.mxu1 %v2607_v49  ;;  %2616 = vmatprep.subr.bf16.mxu0 %v2615_v19  ;;  %v2639_v36 = vpack.c.bf16 %v1026_v35, %v1025_v34 }
  0xcf   : > { %2612 = vmatprep.subr.bf16.mxu1 %v2611_v15 }
  0xd0   : > { %2264 = vmatmul.mubr.f32.vlgmr.msra.gmra.mrb[0].mxu0 %v422_v42 }
  0xd1   : > { %2266 = vmatprep.mubr.f32.mxu0 %v423_v43  ;;  %2618 = vmatpush3.bf16.msra.mxu0 %v2615_v19 }
  0xd2   : > { %2614 = vmatpush3.bf16.msra.mxu1 %v2611_v15  ;;  %2620 = vmatprep.subr.bf16.mxu0 %v2619_v21 }
  0xd4   : > { %2267 = vmatmul.mubr.f32.gmra.mrb[2].mxu0 %v424_v47 }
  0xd5   : > { %2269 = vmatprep.mubr.f32.mxu0 %v425_v48  ;;  %2622 = vmatpush3.bf16.msra.mxu0 %v2619_v21 }
  0xd6   : > { %2624 = vmatprep.subr.bf16.mxu0 %v2623_v24 }
  0xd8   : > { %2270 = vmatmul.mubr.f32.gmra.mrb[4].mxu0 %v426_v50 }
  0xd9   : > { %2272 = vmatprep.mubr.f32.mxu0 %v427_v51  ;;  %2626 = vmatpush3.bf16.msra.mxu0 %v2623_v24 }
  0xda   : > { %2628 = vmatprep.subr.bf16.mxu0 %v2627_v27 }
  0xdc   : > { %2273 = vmatmul.mubr.f32.gmra.mrb[6].mxu0 %v428_v52 }
  0xdd   : > { %2275 = vmatprep.mubr.f32.mxu0 %v429_v53  ;;  %2630 = vmatpush3.bf16.msra.mxu0 %v2627_v27 }
  0xde   : > { %2632 = vmatprep.subr.bf16.mxu0 %v2631_v30 }
  0xe0   : > { %2276 = vmatmul.mubr.f32.gmra.mrb[8].mxu0 %v430_v54 }
  0xe1   : > { %2278 = vmatprep.mubr.f32.mxu0 %v431_v55  ;;  %2634 = vmatpush3.bf16.msra.mxu0 %v2631_v30 }
  0xe2   : > { %2636 = vmatprep.subr.bf16.mxu0 %v2635_v33 }
  0xe4   : > { %2279 = vmatmul.mubr.f32.gmra.mrb[10].mxu0 %v432_v56 }
  0xe5   : > { %2281 = vmatprep.mubr.f32.mxu0 %v433_v57  ;;  %2638 = vmatpush3.bf16.msra.mxu0 %v2635_v33 }
  0xe6   : > { %2640 = vmatprep.subr.bf16.mxu0 %v2639_v36 }
  0xe8   : > { %2282 = vmatmul.mubr.f32.gmra.mrb[12].mxu0 %v434_v58 }
  0xe9   : > { %2284 = vmatprep.mubr.f32.mxu0 %v435_v59  ;;  %2642 = vmatpush3.bf16.msra.mxu0 %v2639_v36 }
  0xec   : > { %2285 = vmatmul.mubr.f32.gmra.mrb[14].mxu0 %v436_v60 }
  0xed   : > { %2287 = vmatprep.mubr.f32.mxu0 %v437_v61 }
  0xf0   : > { %2288 = vmatmul.mubr.f32.gmra.mrb[16].mxu0 %v438_v62 }
  0xf1   : > { %2290 = vmatprep.mubr.f32.mxu0 %v439_v63 }
  0xf4   : > { %2291 = vmatmul.mubr.f32.gmra.mrb[18].mxu0 %v440_v0 }
  0xf5   : > { %2293 = vmatprep.mubr.f32.mxu0 %v441_v1 }
  0xf8   : > { %2294 = vmatmul.mubr.f32.gmra.mrb[20].mxu0 %v442_v2 }
  0xf9   : > { %2296 = vmatprep.mubr.f32.mxu0 %v443_v3 }
  0xfc   : > { %2297 = vmatmul.mubr.f32.gmra.mrb[22].mxu0 %v444_v4 }
  0xfd   : > { %2299 = vmatprep.mubr.f32.mxu0 %v445_v5 }
 0x100   : > { %2300 = vmatmul.mubr.f32.gmra.mrb[24].mxu0 %v446_v6 }
 0x101   : > { %2302 = vmatprep.mubr.f32.mxu0 %v447_v7 }
 0x104   : > { %2303 = vmatmul.mubr.f32.gmra.mrb[26].mxu0 %v448_v8 }
 0x105   : > { %2305 = vmatprep.mubr.f32.mxu0 %v449_v9 }
 0x108   : > { %2306 = vmatmul.mubr.f32.gmra.mrb[28].mxu0 %v450_v10 }
 0x109   : > { %2308 = vmatprep.mubr.f32.mxu0 %v451_v11 }
 0x10c   : > { %2309 = vmatmul.mubr.f32.gmra.mrb[30].mxu0 %v452_v12 }
 0x1a3   : > { %v2265_v38 = vpop.f32.mrb[0].mxu0 }
 0x1a4   : > { %v542_v39 = vpop.f32.mrb[1].mxu0  ;;  %v3405_v41 = vadd.f32 %v2265_v38, %v3399_v37 }
 0x1a5   : > { %v3402_v40 = vadd.f32 %v3399_v37, %v542_v39  ;;  %v1027_v39 = vld [vmem:[#allocation7 + $0x70] sm:$0xff] }
 0x1a7   : > { %v2268_v42 = vpop.f32.mrb[2].mxu0  ;;  %2343 = vmatprep.mubr.f32.mxu1 %v3402_v40 }
 0x1a8   : > { %v552_v43 = vpop.f32.mrb[3].mxu0  ;;  %2344 = vmatmul.mubr.f32.vlgmr.msra.gmra.mrb[0].mxu1 %v3405_v41  ;;  %v3413_v45 = vadd.f32 %v2268_v42, %v3399_v37  ;;  %v1028_v42 = vld [vmem:[#allocation7 + $0x78] sm:$0xff] }
 0x1a9   : > { %v3410_v44 = vadd.f32 %v3399_v37, %v552_v43  ;;  %v2643_v43 = vpack.c.bf16 %v1028_v42, %v1027_v39 }
 0x1ab   : > { %v2271_v46 = vpop.f32.mrb[4].mxu0  ;;  %2346 = vmatprep.mubr.f32.mxu1 %v3410_v44  ;;  %2644 = vmatprep.subr.bf16.mxu0 %v2643_v43 }
 0x1ac   : > { %v562_v47 = vpop.f32.mrb[5].mxu0  ;;  %2347 = vmatmul.mubr.f32.gmra.mrb[2].mxu1 %v3413_v45  ;;  %v3421_v49 = vadd.f32 %v2271_v46, %v3399_v37  ;;  %2646 = vmatpush3.bf16.msra.mxu0 %v2643_v43  ;;  %v1325_v46 = vld [vmem:[#allocation9] sm:$0xff] }
 0x1ad   : > { %v3418_v48 = vadd.f32 %v3399_v37, %v562_v47  ;;  %v1326_v47 = vld [vmem:[#allocation9 + $0x8] sm:$0xff] }
 0x1af   : > { %v2274_v50 = vpop.f32.mrb[6].mxu0  ;;  %2349 = vmatprep.mubr.f32.mxu1 %v3418_v48 }
 0x1b0   : > { %v572_v51 = vpop.f32.mrb[7].mxu0  ;;  %2350 = vmatmul.mubr.f32.gmra.mrb[4].mxu1 %v3421_v49  ;;  %v3429_v53 = vadd.f32 %v2274_v50, %v3399_v37  ;;  %v1327_v50 = vld [vmem:[#allocation9 + $0x10] sm:$0xff] }
 0x1b1   : > { %v3426_v52 = vadd.f32 %v3399_v37, %v572_v51  ;;  %v2647_v51 = vpack.c.bf16 %v1326_v47, %v1325_v46 }
 0x1b3   : > { %v2277_v54 = vpop.f32.mrb[8].mxu0  ;;  %2352 = vmatprep.mubr.f32.mxu1 %v3426_v52  ;;  %2648 = vmatprep.subr.bf16.mxu1 %v2647_v51 }
 0x1b4   : > { %v582_v55 = vpop.f32.mrb[9].mxu0  ;;  %2353 = vmatmul.mubr.f32.gmra.mrb[6].mxu1 %v3429_v53  ;;  %v3437_v57 = vadd.f32 %v2277_v54, %v3399_v37  ;;  %v1328_v54 = vld [vmem:[#allocation9 + $0x18] sm:$0xff] }
 0x1b5   : > { %v3434_v56 = vadd.f32 %v3399_v37, %v582_v55  ;;  %v2651_v55 = vpack.c.bf16 %v1328_v54, %v1327_v50  ;;  %2650 = vmatpush3.bf16.msra.mxu1 %v2647_v51 }
 0x1b7   : > { %v2280_v58 = vpop.f32.mrb[10].mxu0  ;;  %2355 = vmatprep.mubr.f32.mxu1 %v3434_v56  ;;  %2652 = vmatprep.subr.bf16.mxu1 %v2651_v55 }
 0x1b8   : > { %v592_v59 = vpop.f32.mrb[11].mxu0  ;;  %2356 = vmatmul.mubr.f32.gmra.mrb[8].mxu1 %v3437_v57  ;;  %v3445_v61 = vadd.f32 %v2280_v58, %v3399_v37  ;;  %v1329_v58 = vld [vmem:[#allocation9 + $0x20] sm:$0xff] }
 0x1b9   : > { %v3442_v60 = vadd.f32 %v3399_v37, %v592_v59  ;;  %v1330_v59 = vld [vmem:[#allocation9 + $0x28] sm:$0xff]  ;;  %2654 = vmatpush3.bf16.msra.mxu1 %v2651_v55 }
 0x1bb   : > { %v2283_v62 = vpop.f32.mrb[12].mxu0  ;;  %2358 = vmatprep.mubr.f32.mxu1 %v3442_v60 }
 0x1bc   : > { %v602_v63 = vpop.f32.mrb[13].mxu0  ;;  %2359 = vmatmul.mubr.f32.gmra.mrb[10].mxu1 %v3445_v61  ;;  %v3453_v1 = vadd.f32 %v2283_v62, %v3399_v37  ;;  %v1331_v62 = vld [vmem:[#allocation9 + $0x30] sm:$0xff] }
 0x1bd   : > { %v3450_v0 = vadd.f32 %v3399_v37, %v602_v63  ;;  %v1332_v63 = vld [vmem:[#allocation9 + $0x38] sm:$0xff] }
 0x1bf   : > { %v2286_v2 = vpop.f32.mrb[14].mxu0  ;;  %2361 = vmatprep.mubr.f32.mxu1 %v3450_v0 }
 0x1c0   : > { %v612_v3 = vpop.f32.mrb[15].mxu0  ;;  %2362 = vmatmul.mubr.f32.gmra.mrb[12].mxu1 %v3453_v1  ;;  %v3461_v5 = vadd.f32 %v2286_v2, %v3399_v37  ;;  %v2659_v2 = vpack.c.bf16 %v1332_v63, %v1331_v62 }
 0x1c1   : > { %v3458_v4 = vadd.f32 %v3399_v37, %v612_v3  ;;  %v1333_v3 = vld [vmem:[#allocation9 + $0x40] sm:$0xff] }
 0x1c3   : > { %v2289_v6 = vpop.f32.mrb[16].mxu0  ;;  %2364 = vmatprep.mubr.f32.mxu1 %v3458_v4 }
 0x1c4   : > { %v622_v7 = vpop.f32.mrb[17].mxu0  ;;  %2365 = vmatmul.mubr.f32.gmra.mrb[14].mxu1 %v3461_v5  ;;  %v3469_v9 = vadd.f32 %v2289_v6, %v3399_v37  ;;  %v1334_v6 = vld [vmem:[#allocation9 + $0x48] sm:$0xff] }
 0x1c5   : > { %v3466_v8 = vadd.f32 %v3399_v37, %v622_v7  ;;  %v2663_v7 = vpack.c.bf16 %v1334_v6, %v1333_v3 }
 0x1c7   : > { %v2292_v10 = vpop.f32.mrb[18].mxu0  ;;  %2367 = vmatprep.mubr.f32.mxu1 %v3466_v8 }
 0x1c8   : > { %v632_v11 = vpop.f32.mrb[19].mxu0  ;;  %2368 = vmatmul.mubr.f32.gmra.mrb[16].mxu1 %v3469_v9  ;;  %v3477_v13 = vadd.f32 %v2292_v10, %v3399_v37  ;;  %v1335_v10 = vld [vmem:[#allocation9 + $0x50] sm:$0xff] }
 0x1c9   : > { %v3474_v12 = vadd.f32 %v3399_v37, %v632_v11  ;;  %v1336_v11 = vld [vmem:[#allocation9 + $0x58] sm:$0xff] }
 0x1cb   : > { %v2295_v14 = vpop.f32.mrb[20].mxu0  ;;  %2370 = vmatprep.mubr.f32.mxu1 %v3474_v12 }
 0x1cc   : > { %v642_v15 = vpop.f32.mrb[21].mxu0  ;;  %2371 = vmatmul.mubr.f32.gmra.mrb[18].mxu1 %v3477_v13  ;;  %v3485_v17 = vadd.f32 %v2295_v14, %v3399_v37  ;;  %v2667_v14 = vpack.c.bf16 %v1336_v11, %v1335_v10 }
 0x1cd   : > { %v3482_v16 = vadd.f32 %v3399_v37, %v642_v15  ;;  %v1337_v15 = vld [vmem:[#allocation9 + $0x60] sm:$0xff] }
 0x1cf   : > { %v2298_v18 = vpop.f32.mrb[22].mxu0  ;;  %2373 = vmatprep.mubr.f32.mxu1 %v3482_v16 }
 0x1d0   : > { %v652_v19 = vpop.f32.mrb[23].mxu0  ;;  %2374 = vmatmul.mubr.f32.gmra.mrb[20].mxu1 %v3485_v17  ;;  %v3493_v21 = vadd.f32 %v2298_v18, %v3399_v37  ;;  %v1338_v18 = vld [vmem:[#allocation9 + $0x68] sm:$0xff] }
 0x1d1   : > { %v3490_v20 = vadd.f32 %v3399_v37, %v652_v19  ;;  %v2671_v19 = vpack.c.bf16 %v1338_v18, %v1337_v15 }
 0x1d3   : > { %v2301_v22 = vpop.f32.mrb[24].mxu0  ;;  %2376 = vmatprep.mubr.f32.mxu1 %v3490_v20 }
 0x1d4   : > { %v662_v23 = vpop.f32.mrb[25].mxu0  ;;  %2377 = vmatmul.mubr.f32.gmra.mrb[22].mxu1 %v3493_v21  ;;  %v3501_v25 = vadd.f32 %v2301_v22, %v3399_v37  ;;  %v3532_v22 = vld [vmem:[%s3981_s4] ss:$0 sm:$0xff] }
 0x1d5   : > { %v3498_v24 = vadd.f32 %v3399_v37, %v662_v23 }
 0x1d7   : > { %v2304_v26 = vpop.f32.mrb[26].mxu0  ;;  %2379 = vmatprep.mubr.f32.mxu1 %v3498_v24 }
 0x1d8   : > { %v672_v27 = vpop.f32.mrb[27].mxu0  ;;  %2380 = vmatmul.mubr.f32.gmra.mrb[24].mxu1 %v3501_v25  ;;  %v3509_v29 = vadd.f32 %v2304_v26, %v3399_v37 }
 0x1d9   : > { %v3506_v28 = vadd.f32 %v3399_v37, %v672_v27 }
 0x1db   : > { %v2307_v30 = vpop.f32.mrb[28].mxu0  ;;  %2382 = vmatprep.mubr.f32.mxu1 %v3506_v28 }
 0x1dc   : > { %v682_v31 = vpop.f32.mrb[29].mxu0  ;;  %2383 = vmatmul.mubr.f32.gmra.mrb[26].mxu1 %v3509_v29  ;;  %v3517_v33 = vadd.f32 %v2307_v30, %v3399_v37 }
 0x1dd   : > { %v3514_v32 = vadd.f32 %v3399_v37, %v682_v31 }
 0x1df   : > { %v2310_v34 = vpop.f32.mrb[30].mxu0  ;;  %2385 = vmatprep.mubr.f32.mxu1 %v3514_v32 }
 0x1e0   : > { %v692_v35 = vpop.f32.mrb[31].mxu0  ;;  %2386 = vmatmul.mubr.f32.gmra.mrb[28].mxu1 %v3517_v33  ;;  %v3525_v38 = vadd.f32 %v2310_v34, %v3399_v37 }
 0x1e1   : > { %v3522_v36 = vadd.f32 %v3399_v37, %v692_v35  ;;  %v2655_v37 = vpack.c.bf16 %v1330_v59, %v1329_v58 }
 0x1e3   : > { %2388 = vmatprep.mubr.f32.mxu1 %v3522_v36  ;;  %2656 = vmatprep.subr.bf16.mxu1 %v2655_v37 }
 0x1e4   : > { %2389 = vmatmul.mubr.f32.gmra.mrb[30].mxu1 %v3525_v38 }
 0x1e5   : > { %2658 = vmatpush3.bf16.msra.mxu1 %v2655_v37 }
 0x1e6   : > { %2660 = vmatprep.subr.bf16.mxu1 %v2659_v2 }
 0x1e9   : > { %2662 = vmatpush3.bf16.msra.mxu1 %v2659_v2 }
 0x1ea   : > { %2664 = vmatprep.subr.bf16.mxu1 %v2663_v7 }
 0x1ed   : > { %2666 = vmatpush3.bf16.msra.mxu1 %v2663_v7 }
 0x1ee   : > { %2668 = vmatprep.subr.bf16.mxu1 %v2667_v14 }
 0x1f1   : > { %2670 = vmatpush3.bf16.msra.mxu1 %v2667_v14 }
 0x1f2   : > { %2672 = vmatprep.subr.bf16.mxu1 %v2671_v19 }
 0x1f5   : > { %2674 = vmatpush3.bf16.msra.mxu1 %v2671_v19 }
 0x27b   : > { %v2345_v23 = vpop.f32.mrb[0].mxu1 }
 0x27c   : > { %v796_v26 = vadd.f32 %v2345_v23, %v3532_v22  ;;  %v790_v27 = vpop.f32.mrb[1].mxu1 }
 0x27d   : > { %v791_v30 = vadd.f32 %v3532_v22, %v790_v27 }
 0x27e   : > { %v950_v31 = vmax.f32 %v796_v26, 0.0 }
 0x27f   : > { %v949_v34 = vmax.f32 %v791_v30, 0.0  ;;  %v2348_v35 = vpop.f32.mrb[2].mxu1 }
 0x280   : > { %v806_v39 = vadd.f32 %v2348_v35, %v3532_v22  ;;  %v800_v42 = vpop.f32.mrb[3].mxu1  ;;  %v3542_v47 = vadd.f32 %v950_v31, %v3405_v41 }
 0x281   : > { %v3538_v43 = vadd.f32 %v949_v34, %v3402_v40  ;;  %v801_v46 = vadd.f32 %v3532_v22, %v800_v42 }
 0x282   : > { %v952_v50 = vmax.f32 %v806_v39, 0.0 }
 0x283   : > { %v951_v51 = vmax.f32 %v801_v46, 0.0  ;;  %v2351_v54 = vpop.f32.mrb[4].mxu1  ;;  %2423 = vmatprep.mubr.f32.mxu0 %v3538_v43 }
 0x284   : > { %v816_v55 = vadd.f32 %v2351_v54, %v3532_v22  ;;  %v810_v58 = vpop.f32.mrb[5].mxu1  ;;  %2424 = vmatmul.mubr.f32.vlgmr.msra.gmra.mrb[32].mxu0 %v3542_v47  ;;  %v3552_v37 = vadd.f32 %v952_v50, %v3413_v45 }
 0x285   : > { %v3548_v59 = vadd.f32 %v951_v51, %v3410_v44  ;;  %v811_v40 = vadd.f32 %v3532_v22, %v810_v58 }
 0x286   : > { %v954_v41 = vmax.f32 %v816_v55, 0.0 }
 0x287   : > { %v953_v62 = vmax.f32 %v811_v40, 0.0  ;;  %v2354_v63 = vpop.f32.mrb[6].mxu1  ;;  %2426 = vmatprep.mubr.f32.mxu0 %v3548_v59 }
 0x288   : > { %v826_v2 = vadd.f32 %v2354_v63, %v3532_v22  ;;  %v820_v3 = vpop.f32.mrb[7].mxu1  ;;  %2427 = vmatmul.mubr.f32.gmra.mrb[34].mxu0 %v3552_v37  ;;  %v3562_v7 = vadd.f32 %v954_v41, %v3421_v49 }
 0x289   : > { %v3558_v6 = vadd.f32 %v953_v62, %v3418_v48  ;;  %v821_v44 = vadd.f32 %v3532_v22, %v820_v3 }
 0x28a   : > { %v956_v45 = vmax.f32 %v826_v2, 0.0 }
 0x28b   : > { %v955_v10 = vmax.f32 %v821_v44, 0.0  ;;  %v2357_v11 = vpop.f32.mrb[8].mxu1  ;;  %2429 = vmatprep.mubr.f32.mxu0 %v3558_v6 }
 0x28c   : > { %v836_v14 = vadd.f32 %v2357_v11, %v3532_v22  ;;  %v830_v15 = vpop.f32.mrb[9].mxu1  ;;  %2430 = vmatmul.mubr.f32.gmra.mrb[36].mxu0 %v3562_v7  ;;  %v3572_v19 = vadd.f32 %v956_v45, %v3429_v53 }
 0x28d   : > { %v3568_v18 = vadd.f32 %v955_v10, %v3426_v52  ;;  %v831_v48 = vadd.f32 %v3532_v22, %v830_v15 }
 0x28e   : > { %v958_v49 = vmax.f32 %v836_v14, 0.0 }
 0x28f   : > { %v957_v23 = vmax.f32 %v831_v48, 0.0  ;;  %v2360_v26 = vpop.f32.mrb[10].mxu1  ;;  %2432 = vmatprep.mubr.f32.mxu0 %v3568_v18 }
 0x290   : > { %v846_v27 = vadd.f32 %v2360_v26, %v3532_v22  ;;  %v840_v30 = vpop.f32.mrb[11].mxu1  ;;  %2433 = vmatmul.mubr.f32.gmra.mrb[38].mxu0 %v3572_v19  ;;  %v3582_v34 = vadd.f32 %v958_v49, %v3437_v57 }
 0x291   : > { %v3578_v31 = vadd.f32 %v957_v23, %v3434_v56  ;;  %v841_v52 = vadd.f32 %v3532_v22, %v840_v30 }
 0x292   : > { %v960_v53 = vmax.f32 %v846_v27, 0.0 }
 0x293   : > { %v959_v35 = vmax.f32 %v841_v52, 0.0  ;;  %v2363_v39 = vpop.f32.mrb[12].mxu1  ;;  %2435 = vmatprep.mubr.f32.mxu0 %v3578_v31 }
 0x294   : > { %v856_v42 = vadd.f32 %v2363_v39, %v3532_v22  ;;  %v850_v46 = vpop.f32.mrb[13].mxu1  ;;  %2436 = vmatmul.mubr.f32.gmra.mrb[40].mxu0 %v3582_v34  ;;  %v3592_v51 = vadd.f32 %v960_v53, %v3445_v61 }
 0x295   : > { %v3588_v50 = vadd.f32 %v959_v35, %v3442_v60  ;;  %v851_v56 = vadd.f32 %v3532_v22, %v850_v46 }
 0x296   : > { %v962_v57 = vmax.f32 %v856_v42, 0.0 }
 0x297   : > { %v961_v54 = vmax.f32 %v851_v56, 0.0  ;;  %v2366_v55 = vpop.f32.mrb[14].mxu1  ;;  %2438 = vmatprep.mubr.f32.mxu0 %v3588_v50 }
 0x298   : > { %v866_v58 = vadd.f32 %v2366_v55, %v3532_v22  ;;  %v860_v40 = vpop.f32.mrb[15].mxu1  ;;  %2439 = vmatmul.mubr.f32.gmra.mrb[42].mxu0 %v3592_v51  ;;  %v3602_v62 = vadd.f32 %v962_v57, %v3453_v1 }
 0x299   : > { %v3598_v41 = vadd.f32 %v961_v54, %v3450_v0  ;;  %v861_v60 = vadd.f32 %v3532_v22, %v860_v40 }
 0x29a   : > { %v964_v61 = vmax.f32 %v866_v58, 0.0 }
 0x29b   : > { %v963_v63 = vmax.f32 %v861_v60, 0.0  ;;  %v2369_v2 = vpop.f32.mrb[16].mxu1  ;;  %2441 = vmatprep.mubr.f32.mxu0 %v3598_v41 }
 0x29c   : > { %v876_v3 = vadd.f32 %v2369_v2, %v3532_v22  ;;  %v870_v44 = vpop.f32.mrb[17].mxu1  ;;  %2442 = vmatmul.mubr.f32.gmra.mrb[44].mxu0 %v3602_v62  ;;  %v3612_v10 = vadd.f32 %v964_v61, %v3461_v5 }
 0x29d   : > { %v3608_v45 = vadd.f32 %v963_v63, %v3458_v4  ;;  %v871_v0 = vadd.f32 %v3532_v22, %v870_v44 }
 0x29e   : > { %v966_v1 = vmax.f32 %v876_v3, 0.0 }
 0x29f   : > { %v965_v11 = vmax.f32 %v871_v0, 0.0  ;;  %v2372_v14 = vpop.f32.mrb[18].mxu1  ;;  %2444 = vmatprep.mubr.f32.mxu0 %v3608_v45 }
 0x2a0   : > { %v886_v15 = vadd.f32 %v2372_v14, %v3532_v22  ;;  %v880_v48 = vpop.f32.mrb[19].mxu1  ;;  %2445 = vmatmul.mubr.f32.gmra.mrb[46].mxu0 %v3612_v10  ;;  %v3622_v23 = vadd.f32 %v966_v1, %v3469_v9 }
 0x2a1   : > { %v3618_v49 = vadd.f32 %v965_v11, %v3466_v8  ;;  %v881_v4 = vadd.f32 %v3532_v22, %v880_v48 }
 0x2a2   : > { %v968_v5 = vmax.f32 %v886_v15, 0.0 }
 0x2a3   : > { %v967_v26 = vmax.f32 %v881_v4, 0.0  ;;  %v2375_v27 = vpop.f32.mrb[20].mxu1  ;;  %2447 = vmatprep.mubr.f32.mxu0 %v3618_v49 }
 0x2a4   : > { %v896_v30 = vadd.f32 %v2375_v27, %v3532_v22  ;;  %v890_v52 = vpop.f32.mrb[21].mxu1  ;;  %2448 = vmatmul.mubr.f32.gmra.mrb[48].mxu0 %v3622_v23  ;;  %v3632_v35 = vadd.f32 %v968_v5, %v3477_v13 }
 0x2a5   : > { %v3628_v53 = vadd.f32 %v967_v26, %v3474_v12  ;;  %v891_v8 = vadd.f32 %v3532_v22, %v890_v52 }
 0x2a6   : > { %v970_v9 = vmax.f32 %v896_v30, 0.0 }
 0x2a7   : > { %v969_v39 = vmax.f32 %v891_v8, 0.0  ;;  %v2378_v42 = vpop.f32.mrb[22].mxu1  ;;  %2450 = vmatprep.mubr.f32.mxu0 %v3628_v53 }
 0x2a8   : > { %v906_v46 = vadd.f32 %v2378_v42, %v3532_v22  ;;  %v900_v56 = vpop.f32.mrb[23].mxu1  ;;  %2451 = vmatmul.mubr.f32.gmra.mrb[50].mxu0 %v3632_v35  ;;  %v3642_v54 = vadd.f32 %v970_v9, %v3485_v17 }
 0x2a9   : > { %v3638_v57 = vadd.f32 %v969_v39, %v3482_v16  ;;  %v901_v12 = vadd.f32 %v3532_v22, %v900_v56 }
 0x2aa   : > { %v972_v13 = vmax.f32 %v906_v46, 0.0 }
 0x2ab   : > { %v971_v55 = vmax.f32 %v901_v12, 0.0  ;;  %v2381_v58 = vpop.f32.mrb[24].mxu1  ;;  %2453 = vmatprep.mubr.f32.mxu0 %v3638_v57  ;;  %v3697_v12 = vld [vmem:[%s3983_s6] ss:$0 sm:$0xff] }
 0x2ac   : > { %v916_v40 = vadd.f32 %v2381_v58, %v3532_v22  ;;  %v910_v60 = vpop.f32.mrb[25].mxu1  ;;  %2454 = vmatmul.mubr.f32.gmra.mrb[52].mxu0 %v3642_v54  ;;  %v3652_v63 = vadd.f32 %v972_v13, %v3493_v21 }
 0x2ad   : > { %v3648_v61 = vadd.f32 %v971_v55, %v3490_v20  ;;  %v911_v16 = vadd.f32 %v3532_v22, %v910_v60 }
 0x2ae   : > { %v974_v17 = vmax.f32 %v916_v40, 0.0 }
 0x2af   : > { %v973_v2 = vmax.f32 %v911_v16, 0.0  ;;  %v2384_v3 = vpop.f32.mrb[26].mxu1  ;;  %2456 = vmatprep.mubr.f32.mxu0 %v3648_v61 }
 0x2b0   : > { %v926_v44 = vadd.f32 %v2384_v3, %v3532_v22  ;;  %v920_v0 = vpop.f32.mrb[27].mxu1  ;;  %2457 = vmatmul.mubr.f32.gmra.mrb[54].mxu0 %v3652_v63  ;;  %v3662_v11 = vadd.f32 %v974_v17, %v3501_v25 }
 0x2b1   : > { %v3658_v1 = vadd.f32 %v973_v2, %v3498_v24  ;;  %v921_v20 = vadd.f32 %v3532_v22, %v920_v0 }
 0x2b2   : > { %v976_v21 = vmax.f32 %v926_v44, 0.0 }
 0x2b3   : > { %v975_v14 = vmax.f32 %v921_v20, 0.0  ;;  %v2387_v15 = vpop.f32.mrb[28].mxu1  ;;  %2459 = vmatprep.mubr.f32.mxu0 %v3658_v1 }
 0x2b4   : > { %v936_v48 = vadd.f32 %v2387_v15, %v3532_v22  ;;  %v930_v4 = vpop.f32.mrb[29].mxu1  ;;  %2460 = vmatmul.mubr.f32.gmra.mrb[56].mxu0 %v3662_v11  ;;  %v3672_v26 = vadd.f32 %v976_v21, %v3509_v29 }
 0x2b5   : > { %v3668_v5 = vadd.f32 %v975_v14, %v3506_v28  ;;  %v931_v24 = vadd.f32 %v3532_v22, %v930_v4 }
 0x2b6   : > { %v978_v25 = vmax.f32 %v936_v48, 0.0 }
 0x2b7   : > { %v977_v27 = vmax.f32 %v931_v24, 0.0  ;;  %v2390_v30 = vpop.f32.mrb[30].mxu1  ;;  %2462 = vmatprep.mubr.f32.mxu0 %v3668_v5 }
 0x2b8   : > { %v946_v52 = vadd.f32 %v2390_v30, %v3532_v22  ;;  %v940_v8 = vpop.f32.mrb[31].mxu1  ;;  %2463 = vmatmul.mubr.f32.gmra.mrb[58].mxu0 %v3672_v26  ;;  %v3682_v39 = vadd.f32 %v978_v25, %v3517_v33 }
 0x2b9   : > { %v3678_v9 = vadd.f32 %v977_v27, %v3514_v32  ;;  %v941_v28 = vadd.f32 %v3532_v22, %v940_v8  ;;  %v1339_v32 = vld [vmem:[#allocation9 + $0x70] sm:$0xff]  ;;  %v1340_v22 = vld [vmem:[#allocation9 + $0x78] sm:$0xff] }
 0x2ba   : > { %v980_v29 = vmax.f32 %v946_v52, 0.0  ;;  %v2675_v33 = vpack.c.bf16 %v1340_v22, %v1339_v32 }
 0x2bb   : > { %v979_v42 = vmax.f32 %v941_v28, 0.0  ;;  %2465 = vmatprep.mubr.f32.mxu0 %v3678_v9 }
 0x2bc   : > { %2466 = vmatmul.mubr.f32.gmra.mrb[60].mxu0 %v3682_v39  ;;  %v3690_v56 = vadd.f32 %v980_v29, %v3525_v38  ;;  %2676 = vmatprep.subr.bf16.mxu1 %v2675_v33 }
 0x2bd   : > { %v3687_v46 = vadd.f32 %v979_v42, %v3522_v36  ;;  %2678 = vmatpush3.bf16.msra.mxu1 %v2675_v33 }
 0x2bf   : > { %2468 = vmatprep.mubr.f32.mxu0 %v3687_v46 }
 0x2c0   : > { %2469 = vmatmul.mubr.f32.gmra.mrb[62].mxu0 %v3690_v56 }
 0x357   : > { %v2425_v13 = vpop.f32.mrb[32].mxu0 }
 0x358   : > { %v1108_v36 = vadd.f32 %v2425_v13, %v3697_v12  ;;  %v1102_v55 = vpop.f32.mrb[33].mxu0 }
 0x359   : > { %v1103_v38 = vadd.f32 %v3697_v12, %v1102_v55 }
 0x35a   : > { %v1262_v58 = vmax.f32 %v1108_v36, 0.0 }
 0x35b   : > { %v1261_v40 = vmax.f32 %v1103_v38, 0.0  ;;  %v2428_v60 = vpop.f32.mrb[34].mxu0 }
 0x35c   : > { %v1118_v16 = vadd.f32 %v2428_v60, %v3697_v12  ;;  %v1112_v17 = vpop.f32.mrb[35].mxu0  ;;  %v1294_v44 = vadd.f32 %v1262_v58, %v3542_v47 }
 0x35d   : > { %v1293_v2 = vadd.f32 %v1261_v40, %v3538_v43  ;;  %v1113_v3 = vadd.f32 %v3697_v12, %v1112_v17 }
 0x35e   : > { %v1264_v0 = vmax.f32 %v1118_v16, 0.0 }
 0x35f   : > { %v1263_v20 = vmax.f32 %v1113_v3, 0.0  ;;  %v2431_v21 = vpop.f32.mrb[36].mxu0  ;;  %2503 = vmatprep.mubr.f32.mxu1 %v1293_v2 }
 0x360   : > { %v1128_v14 = vadd.f32 %v2431_v21, %v3697_v12  ;;  %v1122_v15 = vpop.f32.mrb[37].mxu0  ;;  %2504 = vmatmul.mubr.f32.vlgmr.msra.gmra.mrb[32].mxu1 %v1294_v44  ;;  %v1296_v24 = vadd.f32 %v1264_v0, %v3552_v37 }
 0x361   : > { %v1295_v48 = vadd.f32 %v1263_v20, %v3548_v59  ;;  %v1123_v4 = vadd.f32 %v3697_v12, %v1122_v15 }
 0x362   : > { %v1266_v25 = vmax.f32 %v1128_v14, 0.0 }
 0x363   : > { %v1265_v43 = vmax.f32 %v1123_v4, 0.0  ;;  %v2434_v27 = vpop.f32.mrb[38].mxu0  ;;  %2506 = vmatprep.mubr.f32.mxu1 %v1295_v48 }
 0x364   : > { %v1138_v47 = vadd.f32 %v2434_v27, %v3697_v12  ;;  %v1132_v30 = vpop.f32.mrb[39].mxu0  ;;  %2507 = vmatmul.mubr.f32.gmra.mrb[34].mxu1 %v1296_v24  ;;  %v1298_v28 = vadd.f32 %v1266_v25, %v3562_v7 }
 0x365   : > { %v1297_v52 = vadd.f32 %v1265_v43, %v3558_v6  ;;  %v1133_v8 = vadd.f32 %v3697_v12, %v1132_v30 }
 0x366   : > { %v1268_v29 = vmax.f32 %v1138_v47, 0.0 }
 0x367   : > { %v1267_v59 = vmax.f32 %v1133_v8, 0.0  ;;  %v2437_v42 = vpop.f32.mrb[40].mxu0  ;;  %2509 = vmatprep.mubr.f32.mxu1 %v1297_v52 }
 0x368   : > { %v1148_v37 = vadd.f32 %v2437_v42, %v3697_v12  ;;  %v1142_v32 = vpop.f32.mrb[41].mxu0  ;;  %2510 = vmatmul.mubr.f32.gmra.mrb[36].mxu1 %v1298_v28  ;;  %v1300_v13 = vadd.f32 %v1268_v29, %v3572_v19 }
 0x369   : > { %v1299_v22 = vadd.f32 %v1267_v59, %v3568_v18  ;;  %v1143_v33 = vadd.f32 %v3697_v12, %v1142_v32 }
 0x36a   : > { %v1270_v36 = vmax.f32 %v1148_v37, 0.0 }
 0x36b   : > { %v1269_v6 = vmax.f32 %v1143_v33, 0.0  ;;  %v2440_v55 = vpop.f32.mrb[42].mxu0  ;;  %2512 = vmatprep.mubr.f32.mxu1 %v1299_v22 }
 0x36c   : > { %v1158_v7 = vadd.f32 %v2440_v55, %v3697_v12  ;;  %v1152_v38 = vpop.f32.mrb[43].mxu0  ;;  %2513 = vmatmul.mubr.f32.gmra.mrb[38].mxu1 %v1300_v13  ;;  %v1302_v60 = vadd.f32 %v1270_v36, %v3582_v34 }
 0x36d   : > { %v1301_v58 = vadd.f32 %v1269_v6, %v3578_v31  ;;  %v1153_v40 = vadd.f32 %v3697_v12, %v1152_v38 }
 0x36e   : > { %v1272_v16 = vmax.f32 %v1158_v7, 0.0 }
 0x36f   : > { %v1271_v18 = vmax.f32 %v1153_v40, 0.0  ;;  %v2443_v17 = vpop.f32.mrb[44].mxu0  ;;  %2515 = vmatprep.mubr.f32.mxu1 %v1301_v58 }
 0x370   : > { %v1168_v19 = vadd.f32 %v2443_v17, %v3697_v12  ;;  %v1162_v2 = vpop.f32.mrb[45].mxu0  ;;  %2516 = vmatmul.mubr.f32.gmra.mrb[40].mxu1 %v1302_v60  ;;  %v1304_v0 = vadd.f32 %v1272_v16, %v3592_v51 }
 0x371   : > { %v1303_v3 = vadd.f32 %v1271_v18, %v3588_v50  ;;  %v1163_v44 = vadd.f32 %v3697_v12, %v1162_v2 }
 0x372   : > { %v1274_v20 = vmax.f32 %v1168_v19, 0.0 }
 0x373   : > { %v1273_v31 = vmax.f32 %v1163_v44, 0.0  ;;  %v2446_v21 = vpop.f32.mrb[46].mxu0  ;;  %2518 = vmatprep.mubr.f32.mxu1 %v1303_v3 }
 0x374   : > { %v1178_v34 = vadd.f32 %v2446_v21, %v3697_v12  ;;  %v1172_v14 = vpop.f32.mrb[47].mxu0  ;;  %2519 = vmatmul.mubr.f32.gmra.mrb[42].mxu1 %v1304_v0  ;;  %v1306_v4 = vadd.f32 %v1274_v20, %v3602_v62 }
 0x375   : > { %v1305_v15 = vadd.f32 %v1273_v31, %v3598_v41  ;;  %v1173_v48 = vadd.f32 %v3697_v12, %v1172_v14 }
 0x376   : > { %v1276_v24 = vmax.f32 %v1178_v34, 0.0 }
 0x377   : > { %v1275_v50 = vmax.f32 %v1173_v48, 0.0  ;;  %v2449_v25 = vpop.f32.mrb[48].mxu0  ;;  %2521 = vmatprep.mubr.f32.mxu1 %v1305_v15 }
 0x378   : > { %v1188_v51 = vadd.f32 %v2449_v25, %v3697_v12  ;;  %v1182_v43 = vpop.f32.mrb[49].mxu0  ;;  %2522 = vmatmul.mubr.f32.gmra.mrb[44].mxu1 %v1306_v4  ;;  %v1308_v30 = vadd.f32 %v1276_v24, %v3612_v10 }
 0x379   : > { %v1307_v27 = vadd.f32 %v1275_v50, %v3608_v45  ;;  %v1183_v47 = vadd.f32 %v3697_v12, %v1182_v43 }
 0x37a   : > { %v1278_v52 = vmax.f32 %v1188_v51, 0.0 }
 0x37b   : > { %v1277_v41 = vmax.f32 %v1183_v47, 0.0  ;;  %v2452_v8 = vpop.f32.mrb[50].mxu0  ;;  %2524 = vmatprep.mubr.f32.mxu1 %v1307_v27 }
 0x37c   : > { %v1198_v62 = vadd.f32 %v2452_v8, %v3697_v12  ;;  %v1192_v28 = vpop.f32.mrb[51].mxu0  ;;  %2525 = vmatmul.mubr.f32.gmra.mrb[46].mxu1 %v1308_v30  ;;  %v1310_v42 = vadd.f32 %v1278_v52, %v3622_v23 }
 0x37d   : > { %v1309_v29 = vadd.f32 %v1277_v41, %v3618_v49  ;;  %v1193_v59 = vadd.f32 %v3697_v12, %v1192_v28  ;;  %v3766_v41 = vld [vmem:[%s4011_s8] ss:$0 sm:$0xff] }
 0x37e   : > { %v1280_v37 = vmax.f32 %v1198_v62, 0.0 }
 0x37f   : > { %v1279_v45 = vmax.f32 %v1193_v59, 0.0  ;;  %v2455_v32 = vpop.f32.mrb[52].mxu0  ;;  %2527 = vmatprep.mubr.f32.mxu1 %v1309_v29 }
 0x380   : > { %v1208_v10 = vadd.f32 %v2455_v32, %v3697_v12  ;;  %v1202_v22 = vpop.f32.mrb[53].mxu0  ;;  %2528 = vmatmul.mubr.f32.gmra.mrb[48].mxu1 %v1310_v42  ;;  %v1312_v36 = vadd.f32 %v1280_v37, %v3632_v35 }
 0x381   : > { %v1311_v33 = vadd.f32 %v1279_v45, %v3628_v53  ;;  %v1203_v13 = vadd.f32 %v3697_v12, %v1202_v22 }
 0x382   : > { %v1282_v6 = vmax.f32 %v1208_v10, 0.0 }
 0x383   : > { %v1281_v49 = vmax.f32 %v1203_v13, 0.0  ;;  %v2458_v55 = vpop.f32.mrb[54].mxu0  ;;  %2530 = vmatprep.mubr.f32.mxu1 %v1311_v33 }
 0x384   : > { %v1218_v23 = vadd.f32 %v2458_v55, %v3697_v12  ;;  %v1212_v7 = vpop.f32.mrb[55].mxu0  ;;  %2531 = vmatmul.mubr.f32.gmra.mrb[50].mxu1 %v1312_v36  ;;  %v1314_v40 = vadd.f32 %v1282_v6, %v3642_v54 }
 0x385   : > { %v1313_v38 = vadd.f32 %v1281_v49, %v3638_v57  ;;  %v1213_v58 = vadd.f32 %v3697_v12, %v1212_v7 }
 0x386   : > { %v1284_v60 = vmax.f32 %v1218_v23, 0.0 }
 0x387   : > { %v1283_v53 = vmax.f32 %v1213_v58, 0.0  ;;  %v2461_v16 = vpop.f32.mrb[56].mxu0  ;;  %2533 = vmatprep.mubr.f32.mxu1 %v1313_v38 }
 0x388   : > { %v1228_v35 = vadd.f32 %v2461_v16, %v3697_v12  ;;  %v1222_v18 = vpop.f32.mrb[57].mxu0  ;;  %2534 = vmatmul.mubr.f32.gmra.mrb[52].mxu1 %v1314_v40  ;;  %v1316_v2 = vadd.f32 %v1284_v60, %v3652_v63 }
 0x389   : > { %v1315_v17 = vadd.f32 %v1283_v53, %v3648_v61  ;;  %v1223_v19 = vadd.f32 %v3697_v12, %v1222_v18 }
 0x38a   : > { %v1286_v3 = vmax.f32 %v1228_v35, 0.0 }
 0x38b   : > { %v1285_v57 = vmax.f32 %v1223_v19, 0.0  ;;  %v2464_v44 = vpop.f32.mrb[58].mxu0  ;;  %2536 = vmatprep.mubr.f32.mxu1 %v1315_v17 }
 0x38c   : > { %v1238_v54 = vadd.f32 %v2464_v44, %v3697_v12  ;;  %v1232_v0 = vpop.f32.mrb[59].mxu0  ;;  %2537 = vmatmul.mubr.f32.gmra.mrb[54].mxu1 %v1316_v2  ;;  %v1318_v21 = vadd.f32 %v1286_v3, %v3662_v11 }
 0x38d   : > { %v1317_v20 = vadd.f32 %v1285_v57, %v3658_v1  ;;  %v1233_v31 = vadd.f32 %v3697_v12, %v1232_v0 }
 0x38e   : > { %v1288_v34 = vmax.f32 %v1238_v54, 0.0 }
 0x38f   : > { %v1287_v61 = vmax.f32 %v1233_v31, 0.0  ;;  %v2467_v14 = vpop.f32.mrb[60].mxu0  ;;  %2539 = vmatprep.mubr.f32.mxu1 %v1317_v20 }
 0x390   : > { %v1248_v63 = vadd.f32 %v2467_v14, %v3697_v12  ;;  %v1242_v15 = vpop.f32.mrb[61].mxu0  ;;  %2540 = vmatmul.mubr.f32.gmra.mrb[56].mxu1 %v1318_v21  ;;  %v1320_v24 = vadd.f32 %v1288_v34, %v3672_v26 }
 0x391   : > { %v1319_v48 = vadd.f32 %v1287_v61, %v3668_v5  ;;  %v1243_v4 = vadd.f32 %v3697_v12, %v1242_v15 }
 0x392   : > { %v1290_v50 = vmax.f32 %v1248_v63, 0.0 }
 0x393   : > { %v1289_v1 = vmax.f32 %v1243_v4, 0.0  ;;  %v2470_v25 = vpop.f32.mrb[62].mxu0  ;;  %2542 = vmatprep.mubr.f32.mxu1 %v1319_v48 }
 0x394   : > { %v1258_v11 = vadd.f32 %v2470_v25, %v3697_v12  ;;  %v1252_v51 = vpop.f32.mrb[63].mxu0  ;;  %2543 = vmatmul.mubr.f32.gmra.mrb[58].mxu1 %v1320_v24  ;;  %v1322_v47 = vadd.f32 %v1290_v50, %v3682_v39 }
 0x395   : > { %v1321_v43 = vadd.f32 %v1289_v1, %v3678_v9  ;;  %v1253_v27 = vadd.f32 %v3697_v12, %v1252_v51 }
 0x396   : > { %v1292_v5 = vmax.f32 %v1258_v11, 0.0 }
 0x397   : > { %v1291_v30 = vmax.f32 %v1253_v27, 0.0  ;;  %2545 = vmatprep.mubr.f32.mxu1 %v1321_v43 }
 0x398   : > { %2546 = vmatmul.mubr.f32.gmra.mrb[60].mxu1 %v1322_v47  ;;  %v1324_v52 = vadd.f32 %v1292_v5, %v3690_v56 }
 0x399   : > { %v1323_v26 = vadd.f32 %v1291_v30, %v3687_v46 }
 0x39b   : > { %2548 = vmatprep.mubr.f32.mxu1 %v1323_v26 }
 0x39c   : > { %2549 = vmatmul.mubr.f32.gmra.mrb[62].mxu1 %v1324_v52 }
 0x433   : > { %v2505_v9 = vpop.f32.mrb[32].mxu1 }
 0x434   : > { %v1420_v12 = vadd.f32 %v2505_v9, %v3766_v41  ;;  %v1414_v8 = vpop.f32.mrb[33].mxu1 }
 0x435   : > { %v1415_v39 = vadd.f32 %v3766_v41, %v1414_v8 }
 0x436   : > { %1574 = vst [vmem:[%s3771_s17 + $0x8] sm:$0xff] %v1420_v12 }
 0x437   : > { %1573 = vst [vmem:[%s3771_s17] sm:$0xff] %v1415_v39  ;;  %v2508_v46 = vpop.f32.mrb[34].mxu1 }
 0x438   : > { %v1430_v56 = vadd.f32 %v2508_v46, %v3766_v41  ;;  %v1424_v62 = vpop.f32.mrb[35].mxu1 }
 0x439   : > { %v1425_v28 = vadd.f32 %v3766_v41, %v1424_v62 }
 0x43a   : > { %1576 = vst [vmem:[%s3771_s17 + $0x18] sm:$0xff] %v1430_v56 }
 0x43b   : > { %1575 = vst [vmem:[%s3771_s17 + $0x10] sm:$0xff] %v1425_v28  ;;  %v2511_v29 = vpop.f32.mrb[36].mxu1 }
 0x43c   : > { %v1440_v59 = vadd.f32 %v2511_v29, %v3766_v41  ;;  %v1434_v42 = vpop.f32.mrb[37].mxu1 }
 0x43d   : > { %v1435_v37 = vadd.f32 %v3766_v41, %v1434_v42 }
 0x43e   : > { %1578 = vst [vmem:[%s3771_s17 + $0x28] sm:$0xff] %v1440_v59 }
 0x43f   : > { %1577 = vst [vmem:[%s3771_s17 + $0x20] sm:$0xff] %v1435_v37  ;;  %v2514_v45 = vpop.f32.mrb[38].mxu1 }
 0x440   : > { %v1450_v32 = vadd.f32 %v2514_v45, %v3766_v41  ;;  %v1444_v10 = vpop.f32.mrb[39].mxu1 }
 0x441   : > { %v1445_v22 = vadd.f32 %v3766_v41, %v1444_v10 }
 0x442   : > { %1580 = vst [vmem:[%s3771_s17 + $0x38] sm:$0xff] %v1450_v32 }
 0x443   : > { %1579 = vst [vmem:[%s3771_s17 + $0x30] sm:$0xff] %v1445_v22  ;;  %v2517_v33 = vpop.f32.mrb[40].mxu1 }
 0x444   : > { %v1460_v13 = vadd.f32 %v2517_v33, %v3766_v41  ;;  %v1454_v36 = vpop.f32.mrb[41].mxu1 }
 0x445   : > { %v1455_v6 = vadd.f32 %v3766_v41, %v1454_v36 }
 0x446   : > { %1582 = vst [vmem:[%s3771_s17 + $0x48] sm:$0xff] %v1460_v13 }
 0x447   : > { %1581 = vst [vmem:[%s3771_s17 + $0x40] sm:$0xff] %v1455_v6  ;;  %v2520_v49 = vpop.f32.mrb[42].mxu1 }
 0x448   : > { %v1470_v55 = vadd.f32 %v2520_v49, %v3766_v41  ;;  %v1464_v23 = vpop.f32.mrb[43].mxu1 }
 0x449   : > { %v1465_v7 = vadd.f32 %v3766_v41, %v1464_v23 }
 0x44a   : > { %1584 = vst [vmem:[%s3771_s17 + $0x58] sm:$0xff] %v1470_v55 }
 0x44b   : > { %1583 = vst [vmem:[%s3771_s17 + $0x50] sm:$0xff] %v1465_v7  ;;  %v2523_v38 = vpop.f32.mrb[44].mxu1 }
 0x44c   : > { %v1480_v58 = vadd.f32 %v2523_v38, %v3766_v41  ;;  %v1474_v40 = vpop.f32.mrb[45].mxu1 }
 0x44d   : > { %v1475_v60 = vadd.f32 %v3766_v41, %v1474_v40 }
 0x44e   : > { %1586 = vst [vmem:[%s3771_s17 + $0x68] sm:$0xff] %v1480_v58 }
 0x44f   : > { %1585 = vst [vmem:[%s3771_s17 + $0x60] sm:$0xff] %v1475_v60  ;;  %v2526_v53 = vpop.f32.mrb[46].mxu1 }
 0x450   : > { %v1490_v16 = vadd.f32 %v2526_v53, %v3766_v41  ;;  %v1484_v35 = vpop.f32.mrb[47].mxu1 }
 0x451   : > { %v1485_v18 = vadd.f32 %v3766_v41, %v1484_v35 }
 0x452   : > { %1588 = vst [vmem:[%s3771_s17 + $0x78] sm:$0xff] %v1490_v16 }
 0x453   : > { %1587 = vst [vmem:[%s3771_s17 + $0x70] sm:$0xff] %v1485_v18  ;;  %v2529_v17 = vpop.f32.mrb[48].mxu1 }
 0x454   : > { %v1500_v19 = vadd.f32 %v2529_v17, %v3766_v41  ;;  %v1494_v2 = vpop.f32.mrb[49].mxu1 }
 0x455   : > { %v1495_v3 = vadd.f32 %v3766_v41, %v1494_v2 }
 0x456   : > { %1590 = vst [vmem:[%s3771_s17 + $0x88] sm:$0xff] %v1500_v19 }
 0x457   : > { %1589 = vst [vmem:[%s3771_s17 + $0x80] sm:$0xff] %v1495_v3  ;;  %v2532_v57 = vpop.f32.mrb[50].mxu1 }
 0x458   : > { %v1510_v44 = vadd.f32 %v2532_v57, %v3766_v41  ;;  %v1504_v54 = vpop.f32.mrb[51].mxu1 }
 0x459   : > { %v1505_v0 = vadd.f32 %v3766_v41, %v1504_v54 }
 0x45a   : > { %1592 = vst [vmem:[%s3771_s17 + $0x98] sm:$0xff] %v1510_v44 }
 0x45b   : > { %1591 = vst [vmem:[%s3771_s17 + $0x90] sm:$0xff] %v1505_v0  ;;  %v2535_v20 = vpop.f32.mrb[52].mxu1 }
 0x45c   : > { %v1520_v31 = vadd.f32 %v2535_v20, %v3766_v41  ;;  %v1514_v21 = vpop.f32.mrb[53].mxu1 }
 0x45d   : > { %v1515_v34 = vadd.f32 %v3766_v41, %v1514_v21 }
 0x45e   : > { %1594 = vst [vmem:[%s3771_s17 + $0xa8] sm:$0xff] %v1520_v31 }
 0x45f   : > { %1593 = vst [vmem:[%s3771_s17 + $0xa0] sm:$0xff] %v1515_v34  ;;  %v2538_v61 = vpop.f32.mrb[54].mxu1 }
 0x460   : > { %v1530_v14 = vadd.f32 %v2538_v61, %v3766_v41  ;;  %v1524_v63 = vpop.f32.mrb[55].mxu1 }
 0x461   : > { %v1525_v15 = vadd.f32 %v3766_v41, %v1524_v63 }
 0x462   : > { %1596 = vst [vmem:[%s3771_s17 + $0xb8] sm:$0xff] %v1530_v14 }
 0x463   : > { %1595 = vst [vmem:[%s3771_s17 + $0xb0] sm:$0xff] %v1525_v15  ;;  %v2541_v48 = vpop.f32.mrb[56].mxu1 }
 0x464   : > { %v1540_v4 = vadd.f32 %v2541_v48, %v3766_v41  ;;  %v1534_v24 = vpop.f32.mrb[57].mxu1 }
 0x465   : > { %v1535_v50 = vadd.f32 %v3766_v41, %v1534_v24 }
 0x466   : > { %1598 = vst [vmem:[%s3771_s17 + $0xc8] sm:$0xff] %v1540_v4 }
 0x467   : > { %1597 = vst [vmem:[%s3771_s17 + $0xc0] sm:$0xff] %v1535_v50  ;;  %v2544_v1 = vpop.f32.mrb[58].mxu1 }
 0x468   : > { %v1550_v25 = vadd.f32 %v2544_v1, %v3766_v41  ;;  %v1544_v11 = vpop.f32.mrb[59].mxu1 }
 0x469   : > { %v1545_v51 = vadd.f32 %v3766_v41, %v1544_v11 }
 0x46a   : > { %1600 = vst [vmem:[%s3771_s17 + $0xd8] sm:$0xff] %v1550_v25 }
 0x46b   : > { %1599 = vst [vmem:[%s3771_s17 + $0xd0] sm:$0xff] %v1545_v51  ;;  %v2547_v43 = vpop.f32.mrb[60].mxu1 }
 0x46c   : > { %v1560_v27 = vadd.f32 %v2547_v43, %v3766_v41  ;;  %v1554_v47 = vpop.f32.mrb[61].mxu1 }
 0x46d   : > { %v1555_v5 = vadd.f32 %v3766_v41, %v1554_v47  ;;  %1611 = sbr.rel (!%p4013_p5) target bundleno = 1196 (0x4ac), region = 80 }
 0x46e   : > { %1602 = vst [vmem:[%s3771_s17 + $0xe8] sm:$0xff] %v1560_v27 }
 0x46f   : > { %1601 = vst [vmem:[%s3771_s17 + $0xe0] sm:$0xff] %v1555_v5  ;;  %v2550_v30 = vpop.f32.mrb[62].mxu1 }
 0x470   : > { %v1570_v26 = vadd.f32 %v2550_v30, %v3766_v41  ;;  %v1564_v52 = vpop.f32.mrb[63].mxu1 }
 0x471   : > { %v1565_v9 = vadd.f32 %v3766_v41, %v1564_v52 }
 0x472   : > { %1604 = vst [vmem:[%s3771_s17 + $0xf8] sm:$0xff] %v1570_v26 }
 0x473   : > { %1603 = vst [vmem:[%s3771_s17 + $0xf0] sm:$0xff] %v1565_v9 }
 0x474   : > { %s4028_s22 = smov (!%p1614_p8, %s1613_s22), 32 }
 0x475   : > { %s2020_s23 = sshll.u32 %s4028_s22, 7 }
 0x476   : > { %p2023_p4 = scmp.eq.s32.totalorder %s2020_s23, 0 }
 0x477   : > { %s3848_s28 = sshrl.u32 (!%p2023_p4), %s4028_s22, 5 }
 0x478   : > { %1622 = sbr.rel (%p2023_p4) target bundleno = 1196 (0x4ac), region = 84  ;;  %p2024_p1 = scmp.le.s32.totalorder (!%p2023_p4), %s3848_s28, 0 }
 0x47f   : > { %1910 = sbr.rel (%p2024_p1) target bundleno = 1175 (0x497), region = 166  ;;  %s4015_s13 = smov (!%p2024_p1), %s3842_s14 }
 0x480   : > { %s4016_s19 = smov (!%p2024_p1), %s3771_s17  ;;  %s3857_s21 = smov (!%p2024_p1), 0  }
 0x481   : > { %s3859_s24 = smov (!%p2024_p1), 0  }
 0x486 LB: >> { %v1746_v41 = vld [vmem:[%s3043_s19] sm:$0xff]  ;;  %v1748_v12 = vld [vmem:[%s3043_s19 + $0x8] sm:$0xff]  ;;  %v1750_v8 = vld [vmem:[%s3043_s19 + $0x10] sm:$0xff]  ;;  %s1810_s25 = sadd.s32 1, %s3047_s21  ;;  %s1740_s24 = sadd.s32 1, %s3051_s24   ;;  %s3051_s24 = sphi %s3859_s24, %s1740_s24   ;;  %s3047_s21 = sphi %s3857_s21, %s4019_s21   ;;  %s3043_s19 = sphi %s4016_s19, %s4018_s19   ;;  %s3039_s13 = sphi %s4015_s13, %s4017_s13  }
 0x487   : >> { %1747 = vst [vmem:[%s3039_s13] sm:$0xff] %v1746_v41  ;;  %1749 = vst [vmem:[%s3039_s13 + $0x8] sm:$0xff] %v1748_v12  ;;  %v1752_v39 = vld [vmem:[%s3043_s19 + $0x18] sm:$0xff]  ;;  %v1754_v46 = vld [vmem:[%s3043_s19 + $0x20] sm:$0xff]  ;;  %p1811_p11 = scmp.ge.s32.totalorder %s1810_s25, %s3848_s28  ;;  %p1739_p10 = scmp.ge.s32.totalorder %s1740_s24, %s3848_s28 }
 0x488   : >> { %1751 = vst [vmem:[%s3039_s13 + $0x10] sm:$0xff] %v1750_v8  ;;  %v1756_v56 = vld [vmem:[%s3043_s19 + $0x28] sm:$0xff]  ;;  %1753 = vst [vmem:[%s3039_s13 + $0x18] sm:$0xff] %v1752_v39  ;;  %v1758_v62 = vld [vmem:[%s3043_s19 + $0x30] sm:$0xff] }
 0x489   : >> { %1755 = vst [vmem:[%s3039_s13 + $0x20] sm:$0xff] %v1754_v46  ;;  %1757 = vst [vmem:[%s3039_s13 + $0x28] sm:$0xff] %v1756_v56  ;;  %v1760_v28 = vld [vmem:[%s3043_s19 + $0x38] sm:$0xff]  ;;  %v1762_v29 = vld [vmem:[%s3043_s19 + $0x40] sm:$0xff]  ;;  %s4030_s25 = smov (%p1811_p11, %s1810_s25), 0 }
 0x48a   : >> { %1759 = vst [vmem:[%s3039_s13 + $0x30] sm:$0xff] %v1758_v62  ;;  %1761 = vst [vmem:[%s3039_s13 + $0x38] sm:$0xff] %v1760_v28  ;;  %v1764_v59 = vld [vmem:[%s3043_s19 + $0x48] sm:$0xff]  ;;  %v1766_v42 = vld [vmem:[%s3043_s19 + $0x50] sm:$0xff]  ;;  %s2025_s27 = sshll.u32 %s4030_s25, 8  ;;  %s4019_s21 = smov %s4030_s25 }
 0x48b   : >> { %1763 = vst [vmem:[%s3039_s13 + $0x40] sm:$0xff] %v1762_v29  ;;  %v1768_v37 = vld [vmem:[%s3043_s19 + $0x58] sm:$0xff]  ;;  %1765 = vst [vmem:[%s3039_s13 + $0x48] sm:$0xff] %v1764_v59  ;;  %v1770_v45 = vld [vmem:[%s3043_s19 + $0x60] sm:$0xff]  ;;  %s3915_s29 = scalar_lea.vmem %s3771_s17, %s2025_s27 [#allocation10]   ;;  %s1816_s26 = scalar_lea.vmem %s3842_s14, %s2025_s27  }
 0x48c   : >> { %1767 = vst [vmem:[%s3039_s13 + $0x50] sm:$0xff] %v1766_v42  ;;  %1769 = vst [vmem:[%s3039_s13 + $0x58] sm:$0xff] %v1768_v37  ;;  %v1772_v32 = vld [vmem:[%s3043_s19 + $0x68] sm:$0xff]  ;;  %v1774_v10 = vld [vmem:[%s3043_s19 + $0x70] sm:$0xff] }
 0x48d   : >> { %1771 = vst [vmem:[%s3039_s13 + $0x60] sm:$0xff] %v1770_v45  ;;  %1773 = vst [vmem:[%s3039_s13 + $0x68] sm:$0xff] %v1772_v32  ;;  %v1776_v22 = vld [vmem:[%s3043_s19 + $0x78] sm:$0xff]  ;;  %v1778_v33 = vld [vmem:[%s3043_s19 + $0x80] sm:$0xff] }
 0x48e   : >> { %1775 = vst [vmem:[%s3039_s13 + $0x70] sm:$0xff] %v1774_v10  ;;  %v1780_v13 = vld [vmem:[%s3043_s19 + $0x88] sm:$0xff]  ;;  %1777 = vst [vmem:[%s3039_s13 + $0x78] sm:$0xff] %v1776_v22  ;;  %v1782_v36 = vld [vmem:[%s3043_s19 + $0x90] sm:$0xff] }
 0x48f   : >> { %1779 = vst [vmem:[%s3039_s13 + $0x80] sm:$0xff] %v1778_v33  ;;  %1781 = vst [vmem:[%s3039_s13 + $0x88] sm:$0xff] %v1780_v13  ;;  %v1784_v6 = vld [vmem:[%s3043_s19 + $0x98] sm:$0xff]  ;;  %v1786_v49 = vld [vmem:[%s3043_s19 + $0xa0] sm:$0xff] }
 0x490   : >> { %1783 = vst [vmem:[%s3039_s13 + $0x90] sm:$0xff] %v1782_v36  ;;  %1785 = vst [vmem:[%s3039_s13 + $0x98] sm:$0xff] %v1784_v6  ;;  %v1788_v55 = vld [vmem:[%s3043_s19 + $0xa8] sm:$0xff]  ;;  %v1790_v23 = vld [vmem:[%s3043_s19 + $0xb0] sm:$0xff]  ;;  %1742 = sbr.rel (!%p1739_p10) target bundleno = 1158 (0x486), region = 172 }
 0x491   : >> { %1787 = vst [vmem:[%s3039_s13 + $0xa0] sm:$0xff] %v1786_v49  ;;  %v1792_v7 = vld [vmem:[%s3043_s19 + $0xb8] sm:$0xff]  ;;  %1789 = vst [vmem:[%s3039_s13 + $0xa8] sm:$0xff] %v1788_v55  ;;  %v1794_v38 = vld [vmem:[%s3043_s19 + $0xc0] sm:$0xff] }
 0x492   : >> { %1791 = vst [vmem:[%s3039_s13 + $0xb0] sm:$0xff] %v1790_v23  ;;  %1793 = vst [vmem:[%s3039_s13 + $0xb8] sm:$0xff] %v1792_v7  ;;  %v1796_v58 = vld [vmem:[%s3043_s19 + $0xc8] sm:$0xff]  ;;  %v1798_v40 = vld [vmem:[%s3043_s19 + $0xd0] sm:$0xff] }
 0x493   : >> { %1795 = vst [vmem:[%s3039_s13 + $0xc0] sm:$0xff] %v1794_v38  ;;  %1797 = vst [vmem:[%s3039_s13 + $0xc8] sm:$0xff] %v1796_v58  ;;  %v1800_v60 = vld [vmem:[%s3043_s19 + $0xd8] sm:$0xff]  ;;  %v1802_v53 = vld [vmem:[%s3043_s19 + $0xe0] sm:$0xff] }
 0x494   : >> { %1799 = vst [vmem:[%s3039_s13 + $0xd0] sm:$0xff] %v1798_v40  ;;  %v1804_v16 = vld [vmem:[%s3043_s19 + $0xe8] sm:$0xff]  ;;  %1801 = vst [vmem:[%s3039_s13 + $0xd8] sm:$0xff] %v1800_v60  ;;  %v1806_v35 = vld [vmem:[%s3043_s19 + $0xf0] sm:$0xff] }
 0x495   : >> { %1803 = vst [vmem:[%s3039_s13 + $0xe0] sm:$0xff] %v1802_v53  ;;  %1805 = vst [vmem:[%s3039_s13 + $0xe8] sm:$0xff] %v1804_v16  ;;  %v1808_v18 = vld [vmem:[%s3043_s19 + $0xf8] sm:$0xff]  ;;  %s4018_s19 = smov %s3915_s29 }
 0x496   : >> { %1807 = vst [vmem:[%s3039_s13 + $0xf0] sm:$0xff] %v1806_v35  ;;  %1809 = vst [vmem:[%s3039_s13 + $0xf8] sm:$0xff] %v1808_v18  ;;  %s4017_s13 = smov %s1816_s26 }
 0x497 PF: > { %s3956_s12 = sand.u32 31, %s4028_s22   ;;  %s2037_s8 = sshll.u32 %s3848_s28, 8 }
 0x498   : > { %s1821_s9 = scalar_lea.vmem %s3771_s17, %s2037_s8 [#allocation10]   ;;  %s1823_s20 = scalar_lea.vmem %s3842_s14, %s2037_s8  }
 0x499   : > { %p2030_p3 = scmp.le.s32.totalorder %s3956_s12, 0 }
 0x49a   : > { %s3053_s16 = smov (!%p2030_p3), %s1823_s20   ;;  %s3057_s30 = smov (!%p2030_p3), %s1821_s9  }
 0x49b   : > { %1924 = sbr.rel (%p2030_p3) target bundleno = 1196 (0x4ac), region = 177  ;;  %s3061_s18 = smov (!%p2030_p3), 0  }
 0x49c   : > { %s3065_s15 = smov (!%p2030_p3), 0  }
 0x4a2 LB: >> { %v1833_v17 = vld [vmem:[%s3059_s30] sm:$0xff]  ;;  %s1835_s22 = sadd.s32 1, %s3063_s18  ;;  %s1827_s15 = sadd.s32 1, %s3067_s15   ;;  %s3067_s15 = sphi %s3065_s15, %s1827_s15   ;;  %s3063_s18 = sphi %s3061_s18, %s3062_s18   ;;  %s3059_s30 = sphi %s3057_s30, %s1840_s30   ;;  %s3055_s16 = sphi %s3053_s16, %s1841_s16  }
 0x4a3   : >> { %1834 = vst [vmem:[%s3055_s16] sm:$0xff] %v1833_v17  ;;  %p1836_p7 = scmp.ge.s32.totalorder %s1835_s22, %s3956_s12  ;;  %p1826_p6 = scmp.ge.s32.totalorder %s1827_s15, %s3956_s12 }
 0x4a5   : >> { %s4032_s22 = smov (%p1836_p7, %s1835_s22), 0  ;;  %1829 = sbr.rel (!%p1826_p6) target bundleno = 1186 (0x4a2), region = 183 }
 0x4a6   : >> { %s2031_s17 = sshll.u32 %s4032_s22, 3  ;;  %s3062_s18 = smov %s4032_s22  }
 0x4a7   : >> { %s1840_s30 = scalar_lea.vmem %s1821_s9, %s2031_s17 [#allocation10]   ;;  %s1841_s16 = scalar_lea.vmem %s1823_s20, %s2031_s17  }
 0x4ac PF: > { %s4020_s12 = sld [smem:[#allocation14_spill]]  ;;  %s4021_s14 = sld [smem:[#allocation15_spill]] }
 0x4ad   : > { %s4022_s30 = smov %s3027_s10  ;;  %s4023_s10 = smov %s3031_s11 }
 0x4b2   : > { %p21_p9 = scmp.ge.s32.totalorder %s4020_s12, 4   ;;  %s4024_s11 = smov %s4021_s14 }
 0x4b4   :  { %23 = sbr.rel (!%p21_p9) target bundleno = 8 (0x8), region = 194 }
 0x4bb   :  { %1857 = vsyncpa [#allocation3], 1 }
 0x4bc   :  { %1859 = vsyncpa [#allocation3 + $0x1], 1 }
 0x4bd   :  { %1860 = vsyncpa [#allocation5], 1 }
 0x4be   :  { %1861 = vsyncpa [#allocation8], 1 }

</bundles_post_ra>
